<compile_context>
chip_gen: v6e
topology: v6e:2x2x1
jax: 0.10.0
libtpu: 0.0.40
codegen_flags: <defaults>
</compile_context>

<pallas_src>
import jax
import jax.numpy as jnp
import numpy as np
from jax.experimental import pallas as pl
from jax.experimental.pallas import tpu as pltpu

_EPS = 1e-5


def _vmem_limit_bytes():
    # Per-generation VMEM budget (review item): ~80% of physical, capped at 100 MiB.
    try:
        cap = getattr(pltpu.get_tpu_info(), "vmem_capacity_bytes", None)
        if cap:
            return int(min(cap * 0.8, 100 * 1024 * 1024))
    except Exception:
        pass
    return 48 * 1024 * 1024


def _compiler_params():
    return pltpu.CompilerParams(
        dimension_semantics=("parallel",),          # batch axis -> both TCs on v7x
        vmem_limit_bytes=_vmem_limit_bytes())


# ---------------------------------------------------------------------------
# In-kernel helpers (all operate on (C, P) padded-flat activations)
# ---------------------------------------------------------------------------
def _lane_shift(a, s):
    """Circular read-offset along the lane axis: out[:, p] = a[:, (p + s) % P].

    This is a lane roll (XLU work); written as slice+concat so the read direction
    is explicit.  Wrapped values only land on border/garbage positions that are
    masked or never selected downstream.
    """
    P = a.shape[-1]
    s = s % P
    if s == 0:
        return a
    return jnp.concatenate([a[:, s:], a[:, :s]], axis=1)


def _im2col(a, k, Wp):
    """a: (Cin, P) bf16 padded-flat activation -> im2col patch (k*k*Cin, P).

    Row order is (dh, dw, cin), matching w.reshape(k*k*cin, cout).
    """
    if k == 1:
        # fsize=1 / padding=1 conv: it simply reads the padded-grid value at the
        # same position, so the patch is the padded activation itself.
        return a
    taps = []
    for dh in range(k):
        for dw in range(k):
            taps.append(_lane_shift(a, (dh - 1) * Wp + (dw - 1)))
    return jnp.concatenate(taps, axis=0)


def _max4(y, Wp):
    """Elementwise max over the forward 2x2 window on the flat padded grid."""
    return jnp.maximum(jnp.maximum(y, _lane_shift(y, 1)),
                       jnp.maximum(_lane_shift(y, Wp), _lane_shift(y, Wp + 1)))


def _maxpool3x3(a, Wp):
    """3x3 / stride-1 max on the flat padded grid (zero border == padding)."""
    y = a
    for dh in (-1, 0, 1):
        for dw in (-1, 0, 1):
            if dh == 0 and dw == 0:
                continue
            y = jnp.maximum(y, _lane_shift(a, dh * Wp + dw))
    return y


def _make_path_kernel(ops, n_act):
    """Fused straight-line kernel for one batch element.

    refs = (act_0 .. act_{n_act-1}, param_0 .. param_{m-1}, out).
    `ops` is a static tuple; params are consumed in order.
    """

    def kernel(*refs):
        out_ref = refs[-1]
        prm = refs[n_act:-1]
        cursor = [0]

        def nxt():
            r = prm[cursor[0]]
            cursor[0] += 1
            return r[...]

        streams = [refs[i][...] for i in range(n_act)]
        cur = None
        for op in ops:
            kind = op[0]
            if kind == "conv":                      # wide-K lane-dense MXU matmul
                _, k, Wp = op
                ws = [nxt() for _ in streams]       # one weight chunk per stream
                shift = nxt()
                acc = None
                for w, s in zip(ws, streams):
                    patch = _im2col(s.astype(jnp.bfloat16), k, Wp)
                    d = jnp.dot(w, patch, preferred_element_type=jnp.float32)
                    acc = d if acc is None else acc + d
                cur = jnp.maximum(acc + shift, 0.0)  # folded BN(+bias) + ReLU, f32
            elif kind == "mask":                     # zero the padding ring
                cur = cur * nxt()
            elif kind == "embed":                    # re-embed into a grown padded grid
                cur = jnp.dot(cur, nxt(), preferred_element_type=jnp.float32)
            elif kind == "pool":                     # 2x2/2 max-pool + re-embed (selection matmul)
                _, Wp = op
                cur = jnp.dot(_max4(cur, Wp), nxt(),
                              preferred_element_type=jnp.float32)
            elif kind == "maxpool3":                 # 3x3/1 max-pool (zero pad OK: x >= 0)
                _, Wp = op
                cur = _maxpool3x3(cur, Wp)
            elif kind == "extract":                  # padded grid -> compact interior
                cur = jnp.dot(cur, nxt(), preferred_element_type=jnp.float32)
            else:
                raise ValueError(kind)
            streams = [cur]
        out_ref[...] = cur.astype(out_ref.dtype)

    return kernel


# ---------------------------------------------------------------------------
# Constant selection / mask matrices (built once in the wrapper)
# ---------------------------------------------------------------------------
def _border_mask(Hp, Wp):
    m = np.zeros((Hp, Wp), np.float32)
    m[1:-1, 1:-1] = 1.0
    return jnp.asarray(m.reshape(1, Hp * Wp))


def _pool_select(Hp, Wp):
    """0/1 (Hp*Wp, Hpo*Wpo): 2x2/2 pooled interior -> interior of the next padded grid."""
    H, W = Hp - 2, Wp - 2
    Ho, Wo = H // 2, W // 2
    Hpo, Wpo = Ho + 2, Wo + 2
    S = np.zeros((Hp * Wp, Hpo * Wpo), np.float32)
    for i in range(Ho):
        for j in range(Wo):
            S[(1 + 2 * i) * Wp + (1 + 2 * j), (1 + i) * Wpo + (1 + j)] = 1.0
    return jnp.asarray(S), (Hpo, Wpo)


def _embed_select(Hs, Ws):
    """0/1 (Hs*Ws, (Hs+2)*(Ws+2)): full grid -> interior of a grown padded grid."""
    Ht, Wt = Hs + 2, Ws + 2
    E = np.zeros((Hs * Ws, Ht * Wt), np.float32)
    for i in range(Hs):
        for j in range(Ws):
            E[i * Ws + j, (1 + i) * Wt + (1 + j)] = 1.0
    return jnp.asarray(E), (Ht, Wt)


def _extract_select(Hp, Wp):
    """0/1 (Hp*Wp, H*W): interior of padded grid -> compact row-major output."""
    H, W = Hp - 2, Wp - 2
    S = np.zeros((Hp * Wp, H * W), np.float32)
    for i in range(H):
        for j in range(W):
            S[(1 + i) * Wp + (1 + j), i * W + j] = 1.0
    return jnp.asarray(S)


# ---------------------------------------------------------------------------
# Parameter folding + path program builders
# ---------------------------------------------------------------------------
def _fold_conv(p):
    """BN scale folded into transposed im2col bf16 weights; bias+BN into the shift."""
    w = p["w"]                                     # (k, k, cin, cout)
    k, _, cin, cout = w.shape
    scale = p["gamma"] / jnp.sqrt(p["var"] + _EPS)
    shift = p["beta"] + (p["b"] - p["mean"]) * scale
    wm = (w.reshape(k * k * cin, cout).T * scale[:, None]).astype(jnp.bfloat16)
    return wm, shift.reshape(cout, 1).astype(jnp.float32), k


def _build_branch(path, H, W):
    """Ops + params for one zoom branch (conv1 + ConvBlocks, each pool=True)."""
    Hp, Wp = H + 2, W + 2
    ops, params = [], []

    def conv(p, with_mask):
        wm, sh, k = _fold_conv(p)
        ops.append(("conv", k, Wp))
        params.extend([wm, sh])
        if with_mask:
            ops.append(("mask",))
            params.append(_border_mask(Hp, Wp))
        return wm.shape[0]

    def pool():
        nonlocal Hp, Wp
        ops.append(("pool", Wp))
        S, (Hp, Wp) = _pool_select(Hp, Wp)
        params.append(S)

    conv(path["conv1"], with_mask=True)
    out_c = None
    for blk in path["blocks"]:
        conv(blk["c1"], with_mask=True)
        out_c = conv(blk["c2"], with_mask=False)   # pool reads interior only
        pool()
    return tuple(ops), params, out_c, (Hp, Wp)


def _build_merged(merged, branch_channels, Hp, Wp):
    """Ops + params for the merged path + the final 3x3/s1 max-pool."""
    ops, params = [], []
    first = True
    out_c = None

    for entry in merged:
        blk, do_pool = entry["block"], entry["pool"]
        for name, is_last in (("c1", False), ("c2", True)):
            wm, sh, k = _fold_conv(blk[name])
            out_c = wm.shape[0]
            ops.append(("conv", k, Wp))
            if first:
                # Split the first conv's weight along Cin per branch: one MXU
                # matmul per branch, accumulated in f32 (no XLA-level concat).
                assert k == 1, "module uses fsize=1 for the merge block"
                off = 0
                for cb in branch_channels:
                    params.append(wm[:, off:off + cb])
                    off += cb
                first = False
            else:
                params.append(wm)
            params.append(sh)
            if is_last and do_pool:
                ops.append(("pool", Wp))
                S, (Hp, Wp) = _pool_select(Hp, Wp)
                params.append(S)
            elif k == 1:
                # fsize=1 / padding=1: the conv output occupies the whole current
                # padded grid (ring value = relu(shift), as in PyTorch); grow the
                # grid by a fresh zero ring for the next conv.
                ops.append(("embed",))
                E, (Hp, Wp) = _embed_select(Hp, Wp)
                params.append(E)
            else:
                ops.append(("mask",))
                params.append(_border_mask(Hp, Wp))

    # Final 3x3 / stride-1 / pad-1 max pool; zero padding is equivalent to -inf
    # padding here because all activations are post-ReLU (>= 0).
    ops.append(("maxpool3", Wp))
    ops.append(("extract",))
    params.append(_extract_select(Hp, Wp))
    return tuple(ops), params, out_c, (Hp - 2, Wp - 2)


def _run_path(ops, params, acts, out_c, out_p, out_dtype):
    B = acts[0].shape[0]
    kernel = _make_path_kernel(ops, len(acts))
    in_specs = [pl.BlockSpec((None,) + a.shape[1:], lambda b: (b, 0, 0)) for a in acts]
    # Grid-invariant weights / masks / selection matrices: block index never
    # changes, so Pallas only fetches them once across the batch grid.
    # TODO(synk): pipeline_mode=pl.Buffered(1) here to drop the unused second
    #             buffer on v7x (64 MiB VMEM) once larger shapes need it.
    in_specs += [pl.BlockSpec(p.shape, lambda b, n=p.ndim: (0,) * n) for p in params]
    return pl.pallas_call(
        kernel,
        grid=(B,),
        in_specs=in_specs,
        out_specs=pl.BlockSpec((None, out_c, out_p), lambda b: (b, 0, 0)),
        out_shape=jax.ShapeDtypeStruct((B, out_c, out_p), out_dtype),
        compiler_params=_compiler_params(),
    )(*acts, *params)


# ---------------------------------------------------------------------------
# Deterministic parameter construction (matches nn.Module __init__ shapes)
# ---------------------------------------------------------------------------
def _conv_params(key, cin, cout, fsize):
    w = 0.1 * jax.random.normal(key, (fsize, fsize, cin, cout), jnp.float32)
    return dict(
        w=w,
        b=jnp.zeros((cout,), jnp.float32),
        gamma=jnp.ones((cout,), jnp.float32),   # BatchNorm eval-mode defaults
        beta=jnp.zeros((cout,), jnp.float32),
        mean=jnp.zeros((cout,), jnp.float32),
        var=jnp.ones((cout,), jnp.float32),
    )


def _convblock_params(keys, cin, cout, fsize):
    return dict(c1=_conv_params(next(keys), cin, cout, fsize),
                c2=_conv_params(next(keys), cout, cout, fsize))


class MultiScaleNetworkPallas:
    def __init__(self, inplanes, zooms, n_out_blocks=3, seed=42):
        self.zooms = list(zooms)
        self.n_out_blocks = n_out_blocks
        self.inplanes = inplanes
        max_zoom = max(zooms)
        self.outplanes = inplanes * 2 ** (max_zoom + 1)

        keys = iter(jax.random.split(jax.random.PRNGKey(seed), 256))
        self.in_paths = {}
        for zoom in self.zooms:
            nb_blocks = max_zoom - zoom + 1
            start = inplanes * 2 ** zoom
            self.in_paths[zoom] = dict(
                conv1=_conv_params(next(keys), 3, start, 3),
                blocks=[_convblock_params(keys, start * 2 ** i,
                                          start * 2 ** (i + 1), 3)
                        for i in range(nb_blocks)])

        # merged path: first ConvBlock has fsize=1 (padding=1 grows spatial by 2/conv)
        self.merged = [dict(block=_convblock_params(
            keys, self.outplanes * len(self.zooms), self.outplanes, 1),
            pool=False)]
        for i in range(n_out_blocks):
            self.merged.append(dict(block=_convblock_params(
                keys, self.outplanes * 2 ** i, self.outplanes * 2 ** (i + 1), 3),
                pool=True))

        self._forward = jax.jit(self._forward_impl)

    def n_features(self):
        return self.outplanes * 2 ** self.n_out_blocks

    def _forward_impl(self, x_nchw):
        x = x_nchw.astype(jnp.float32)
        B = x.shape[0]
        branch_outs, branch_channels = [], []
        grid = None
        for z in self.zooms:
            # nearest-neighbour downsample by 1/2**z (== F.interpolate nearest)
            xi = x if z == 0 else x[:, :, ::2 ** z, ::2 ** z]
            _, C, H, W = xi.shape
            # wrapper-side layout plumbing: zero-pad + flatten the spatial grid
            xp = jnp.pad(xi, ((0, 0), (0, 0), (1, 1), (1, 1)))
            xp = xp.reshape(B, C, (H + 2) * (W + 2))
            ops, params, out_c, g = _build_branch(self.in_paths[z], H, W)
            if grid is None:
                grid = g
            assert g == grid, "all branches must end on the same padded grid"
            out = _run_path(ops, params, [xp], out_c, g[0] * g[1], jnp.bfloat16)
            branch_outs.append(out)
            branch_channels.append(out_c)

        ops, params, out_c, (hf, wf) = _build_merged(
            self.merged, branch_channels, grid[0], grid[1])
        out = _run_path(ops, params, branch_outs, out_c, hf * wf, jnp.float32)
        return out.reshape(B, out_c, hf, wf)       # channel-major == NCHW already

    def __call__(self, x_nchw):
        return self._forward(x_nchw)


# ---------------------------------------------------------------------------
# Pure-JAX reference (same bf16-operand / f32-accumulate convention, unfolded BN)
# ---------------------------------------------------------------------------
def _ref_conv_bn_relu(x, p):
    y = jax.lax.conv_general_dilated(
        x.astype(jnp.bfloat16), p["w"].astype(jnp.bfloat16),
        window_strides=(1, 1), padding=((1, 1), (1, 1)),
        dimension_numbers=("NHWC", "HWIO", "NHWC"),
        preferred_element_type=jnp.float32)
    scale = p["gamma"] / jnp.sqrt(p["var"] + _EPS)
    y = (y + p["b"]) * scale + (p["beta"] - p["mean"] * scale)
    return jnp.maximum(y, 0.0)


def _ref_maxpool(x, win, stride, pad):
    return jax.lax.reduce_window(
        x, -jnp.inf, jax.lax.max, (1, win, win, 1), (1, stride, stride, 1),
        padding=((0, 0), (pad, pad), (pad, pad), (0, 0)))


def _ref_block(blk, x, *, pool):
    x = _ref_conv_bn_relu(x, blk["c1"])
    x = _ref_conv_bn_relu(x, blk["c2"])
    return _ref_maxpool(x, 2, 2, 0) if pool else x


def _ref_forward(net, x_nchw):
    x = jnp.transpose(x_nchw, (0, 2, 3, 1)).astype(jnp.float32)
    branches = []
    for z in net.zooms:
        xi = x if z == 0 else x[:, ::2 ** z, ::2 ** z, :]
        p = net.in_paths[z]
        h = _ref_conv_bn_relu(xi, p["conv1"])
        for blk in p["blocks"]:
            h = _ref_block(blk, h, pool=True)
        branches.append(h)
    out = jnp.concatenate(branches, axis=-1)
    for entry in net.merged:
        out = _ref_block(entry["block"], out, pool=entry["pool"])
    out = _ref_maxpool(out, 3, 1, 1)
    return jnp.transpose(out, (0, 3, 1, 2))


if __name__ == "__main__":
    # Small deterministic example: NCHW input with 3 channels (required by conv1).
    x = jax.random.normal(jax.random.PRNGKey(0), (2, 3, 16, 16), jnp.float32)

    net = MultiScaleNetworkPallas(inplanes=2, zooms=[0, 1], n_out_blocks=1)
    out = jax.block_until_ready(net(x))
    assert out.shape == (2, net.n_features(), 4, 4), out.shape

    ref = jax.block_until_ready(_ref_forward(net, x))
    err = float(jnp.max(jnp.abs(out - ref)))
    assert jnp.allclose(out, ref, atol=2e-2, rtol=2e-2), f"max abs err {err}"

    print("KERNEL_OK")
</pallas_src>

<mosaic_0001>
module attributes {stable_mosaic.version = 11 : i64} {
  func.func @kernel(%arg0: i32, %arg1: memref<1x3x100xf32, #tpu.memory_space<vmem>>, %arg2: memref<4x27xbf16, #tpu.memory_space<vmem>>, %arg3: memref<4x1xf32, #tpu.memory_space<vmem>>, %arg4: memref<1x100xf32, #tpu.memory_space<vmem>>, %arg5: memref<8x36xbf16, #tpu.memory_space<vmem>>, %arg6: memref<8x1xf32, #tpu.memory_space<vmem>>, %arg7: memref<1x100xf32, #tpu.memory_space<vmem>>, %arg8: memref<8x72xbf16, #tpu.memory_space<vmem>>, %arg9: memref<8x1xf32, #tpu.memory_space<vmem>>, %arg10: memref<100x36xf32, #tpu.memory_space<vmem>>, %arg11: memref<1x8x36xbf16, #tpu.memory_space<vmem>>) attributes {dimension_semantics = [#tpu.dimension_semantics<parallel>], iteration_bounds = array<i64: 2>, scalar_prefetch = 0 : i64, scratch_operands = 0 : i64, tpu.core_type = #tpu.core_type<tc>, window_params = [{transform_indices = @transform_0, window_bounds = array<i64: 1, 3, 100>}, {pipeline_mode = #tpu.pipeline_mode<synchronous>, transform_indices = @transform_1, window_bounds = array<i64: 4, 27>}, {pipeline_mode = #tpu.pipeline_mode<synchronous>, transform_indices = @transform_2, window_bounds = array<i64: 4, 1>}, {pipeline_mode = #tpu.pipeline_mode<synchronous>, transform_indices = @transform_3, window_bounds = array<i64: 1, 100>}, {pipeline_mode = #tpu.pipeline_mode<synchronous>, transform_indices = @transform_4, window_bounds = array<i64: 8, 36>}, {pipeline_mode = #tpu.pipeline_mode<synchronous>, transform_indices = @transform_5, window_bounds = array<i64: 8, 1>}, {pipeline_mode = #tpu.pipeline_mode<synchronous>, transform_indices = @transform_6, window_bounds = array<i64: 1, 100>}, {pipeline_mode = #tpu.pipeline_mode<synchronous>, transform_indices = @transform_7, window_bounds = array<i64: 8, 72>}, {pipeline_mode = #tpu.pipeline_mode<synchronous>, transform_indices = @transform_8, window_bounds = array<i64: 8, 1>}, {pipeline_mode = #tpu.pipeline_mode<synchronous>, transform_indices = @transform_9, window_bounds = array<i64: 100, 36>}, {transform_indices = @transform_10, window_bounds = array<i64: 1, 8, 36>}]} {
    %c0 = arith.constant 0 : index
    %c0_0 = arith.constant 0 : index
    %c0_1 = arith.constant 0 : index
    %0 = vector.load %arg1[%c0, %c0_0, %c0_1] : memref<1x3x100xf32, #tpu.memory_space<vmem>>, vector<1x3x100xf32>
    %1 = vector.shape_cast %0 : vector<1x3x100xf32> to vector<3x100xf32>
    %c0_2 = arith.constant 0 : index
    %c0_3 = arith.constant 0 : index
    %2 = vector.load %arg2[%c0_2, %c0_3] : memref<4x27xbf16, #tpu.memory_space<vmem>>, vector<4x27xbf16>
    %c0_4 = arith.constant 0 : index
    %c0_5 = arith.constant 0 : index
    %3 = vector.load %arg3[%c0_4, %c0_5] : memref<4x1xf32, #tpu.memory_space<vmem>>, vector<4x1xf32>
    %4 = arith.truncf %1 : vector<3x100xf32> to vector<3x100xbf16>
    %5 = vector.extract_strided_slice %4 {offsets = [0, 89], sizes = [3, 11], strides = [1, 1]} : vector<3x100xbf16> to vector<3x11xbf16>
    %6 = vector.extract_strided_slice %4 {offsets = [0, 0], sizes = [3, 89], strides = [1, 1]} : vector<3x100xbf16> to vector<3x89xbf16>
    %7 = tpu.concatenate %5, %6 in 1 : vector<3x11xbf16>, vector<3x89xbf16> -> vector<3x100xbf16>
    %8 = vector.extract_strided_slice %4 {offsets = [0, 90], sizes = [3, 10], strides = [1, 1]} : vector<3x100xbf16> to vector<3x10xbf16>
    %9 = vector.extract_strided_slice %4 {offsets = [0, 0], sizes = [3, 90], strides = [1, 1]} : vector<3x100xbf16> to vector<3x90xbf16>
    %10 = tpu.concatenate %8, %9 in 1 : vector<3x10xbf16>, vector<3x90xbf16> -> vector<3x100xbf16>
    %11 = vector.extract_strided_slice %4 {offsets = [0, 91], sizes = [3, 9], strides = [1, 1]} : vector<3x100xbf16> to vector<3x9xbf16>
    %12 = vector.extract_strided_slice %4 {offsets = [0, 0], sizes = [3, 91], strides = [1, 1]} : vector<3x100xbf16> to vector<3x91xbf16>
    %13 = tpu.concatenate %11, %12 in 1 : vector<3x9xbf16>, vector<3x91xbf16> -> vector<3x100xbf16>
    %14 = vector.extract_strided_slice %4 {offsets = [0, 99], sizes = [3, 1], strides = [1, 1]} : vector<3x100xbf16> to vector<3x1xbf16>
    %15 = vector.extract_strided_slice %4 {offsets = [0, 0], sizes = [3, 99], strides = [1, 1]} : vector<3x100xbf16> to vector<3x99xbf16>
    %16 = tpu.concatenate %14, %15 in 1 : vector<3x1xbf16>, vector<3x99xbf16> -> vector<3x100xbf16>
    %17 = vector.extract_strided_slice %4 {offsets = [0, 1], sizes = [3, 99], strides = [1, 1]} : vector<3x100xbf16> to vector<3x99xbf16>
    %18 = vector.extract_strided_slice %4 {offsets = [0, 0], sizes = [3, 1], strides = [1, 1]} : vector<3x100xbf16> to vector<3x1xbf16>
    %19 = tpu.concatenate %17, %18 in 1 : vector<3x99xbf16>, vector<3x1xbf16> -> vector<3x100xbf16>
    %20 = vector.extract_strided_slice %4 {offsets = [0, 9], sizes = [3, 91], strides = [1, 1]} : vector<3x100xbf16> to vector<3x91xbf16>
    %21 = vector.extract_strided_slice %4 {offsets = [0, 0], sizes = [3, 9], strides = [1, 1]} : vector<3x100xbf16> to vector<3x9xbf16>
    %22 = tpu.concatenate %20, %21 in 1 : vector<3x91xbf16>, vector<3x9xbf16> -> vector<3x100xbf16>
    %23 = vector.extract_strided_slice %4 {offsets = [0, 10], sizes = [3, 90], strides = [1, 1]} : vector<3x100xbf16> to vector<3x90xbf16>
    %24 = vector.extract_strided_slice %4 {offsets = [0, 0], sizes = [3, 10], strides = [1, 1]} : vector<3x100xbf16> to vector<3x10xbf16>
    %25 = tpu.concatenate %23, %24 in 1 : vector<3x90xbf16>, vector<3x10xbf16> -> vector<3x100xbf16>
    %26 = vector.extract_strided_slice %4 {offsets = [0, 11], sizes = [3, 89], strides = [1, 1]} : vector<3x100xbf16> to vector<3x89xbf16>
    %27 = vector.extract_strided_slice %4 {offsets = [0, 0], sizes = [3, 11], strides = [1, 1]} : vector<3x100xbf16> to vector<3x11xbf16>
    %28 = tpu.concatenate %26, %27 in 1 : vector<3x89xbf16>, vector<3x11xbf16> -> vector<3x100xbf16>
    %29 = tpu.concatenate %7, %10, %13, %16, %4, %19, %22, %25, %28 in 0 : vector<3x100xbf16>, vector<3x100xbf16>, vector<3x100xbf16>, vector<3x100xbf16>, vector<3x100xbf16>, vector<3x100xbf16>, vector<3x100xbf16>, vector<3x100xbf16>, vector<3x100xbf16> -> vector<27x100xbf16>
    %cst = arith.constant dense<0.000000e+00> : vector<4x100xf32>
    %30 = tpu.matmul %2, %29, %cst {dimension_numbers = #tpu.dot_dimension_numbers<[1], [0], [0], [1], [0, 0, 1, 1], [], []>} : vector<4x27xbf16>, vector<27x100xbf16>, vector<4x100xf32> -> vector<4x100xf32>
    %31 = vector.broadcast %3 : vector<4x1xf32> to vector<4x100xf32>
    %32 = arith.addf %30, %31 : vector<4x100xf32>
    %cst_6 = arith.constant 0.000000e+00 : f32
    %33 = vector.broadcast %cst_6 : f32 to vector<4x100xf32>
    %34 = arith.maximumf %32, %33 : vector<4x100xf32>
    %c0_7 = arith.constant 0 : index
    %c0_8 = arith.constant 0 : index
    %35 = vector.load %arg4[%c0_7, %c0_8] : memref<1x100xf32, #tpu.memory_space<vmem>>, vector<1x100xf32>
    %36 = vector.broadcast %35 : vector<1x100xf32> to vector<4x100xf32>
    %37 = arith.mulf %34, %36 : vector<4x100xf32>
    %c0_9 = arith.constant 0 : index
    %c0_10 = arith.constant 0 : index
    %38 = vector.load %arg5[%c0_9, %c0_10] : memref<8x36xbf16, #tpu.memory_space<vmem>>, vector<8x36xbf16>
    %c0_11 = arith.constant 0 : index
    %c0_12 = arith.constant 0 : index
    %39 = vector.load %arg6[%c0_11, %c0_12] : memref<8x1xf32, #tpu.memory_space<vmem>>, vector<8x1xf32>
    %40 = arith.truncf %37 : vector<4x100xf32> to vector<4x100xbf16>
    %41 = vector.extract_strided_slice %40 {offsets = [0, 89], sizes = [4, 11], strides = [1, 1]} : vector<4x100xbf16> to vector<4x11xbf16>
    %42 = vector.extract_strided_slice %40 {offsets = [0, 0], sizes = [4, 89], strides = [1, 1]} : vector<4x100xbf16> to vector<4x89xbf16>
    %43 = tpu.concatenate %41, %42 in 1 : vector<4x11xbf16>, vector<4x89xbf16> -> vector<4x100xbf16>
    %44 = vector.extract_strided_slice %40 {offsets = [0, 90], sizes = [4, 10], strides = [1, 1]} : vector<4x100xbf16> to vector<4x10xbf16>
    %45 = vector.extract_strided_slice %40 {offsets = [0, 0], sizes = [4, 90], strides = [1, 1]} : vector<4x100xbf16> to vector<4x90xbf16>
    %46 = tpu.concatenate %44, %45 in 1 : vector<4x10xbf16>, vector<4x90xbf16> -> vector<4x100xbf16>
    %47 = vector.extract_strided_slice %40 {offsets = [0, 91], sizes = [4, 9], strides = [1, 1]} : vector<4x100xbf16> to vector<4x9xbf16>
    %48 = vector.extract_strided_slice %40 {offsets = [0, 0], sizes = [4, 91], strides = [1, 1]} : vector<4x100xbf16> to vector<4x91xbf16>
    %49 = tpu.concatenate %47, %48 in 1 : vector<4x9xbf16>, vector<4x91xbf16> -> vector<4x100xbf16>
    %50 = vector.extract_strided_slice %40 {offsets = [0, 99], sizes = [4, 1], strides = [1, 1]} : vector<4x100xbf16> to vector<4x1xbf16>
    %51 = vector.extract_strided_slice %40 {offsets = [0, 0], sizes = [4, 99], strides = [1, 1]} : vector<4x100xbf16> to vector<4x99xbf16>
    %52 = tpu.concatenate %50, %51 in 1 : vector<4x1xbf16>, vector<4x99xbf16> -> vector<4x100xbf16>
    %53 = vector.extract_strided_slice %40 {offsets = [0, 1], sizes = [4, 99], strides = [1, 1]} : vector<4x100xbf16> to vector<4x99xbf16>
    %54 = vector.extract_strided_slice %40 {offsets = [0, 0], sizes = [4, 1], strides = [1, 1]} : vector<4x100xbf16> to vector<4x1xbf16>
    %55 = tpu.concatenate %53, %54 in 1 : vector<4x99xbf16>, vector<4x1xbf16> -> vector<4x100xbf16>
    %56 = vector.extract_strided_slice %40 {offsets = [0, 9], sizes = [4, 91], strides = [1, 1]} : vector<4x100xbf16> to vector<4x91xbf16>
    %57 = vector.extract_strided_slice %40 {offsets = [0, 0], sizes = [4, 9], strides = [1, 1]} : vector<4x100xbf16> to vector<4x9xbf16>
    %58 = tpu.concatenate %56, %57 in 1 : vector<4x91xbf16>, vector<4x9xbf16> -> vector<4x100xbf16>
    %59 = vector.extract_strided_slice %40 {offsets = [0, 10], sizes = [4, 90], strides = [1, 1]} : vector<4x100xbf16> to vector<4x90xbf16>
    %60 = vector.extract_strided_slice %40 {offsets = [0, 0], sizes = [4, 10], strides = [1, 1]} : vector<4x100xbf16> to vector<4x10xbf16>
    %61 = tpu.concatenate %59, %60 in 1 : vector<4x90xbf16>, vector<4x10xbf16> -> vector<4x100xbf16>
    %62 = vector.extract_strided_slice %40 {offsets = [0, 11], sizes = [4, 89], strides = [1, 1]} : vector<4x100xbf16> to vector<4x89xbf16>
    %63 = vector.extract_strided_slice %40 {offsets = [0, 0], sizes = [4, 11], strides = [1, 1]} : vector<4x100xbf16> to vector<4x11xbf16>
    %64 = tpu.concatenate %62, %63 in 1 : vector<4x89xbf16>, vector<4x11xbf16> -> vector<4x100xbf16>
    %65 = tpu.concatenate %43, %46, %49, %52, %40, %55, %58, %61, %64 in 0 : vector<4x100xbf16>, vector<4x100xbf16>, vector<4x100xbf16>, vector<4x100xbf16>, vector<4x100xbf16>, vector<4x100xbf16>, vector<4x100xbf16>, vector<4x100xbf16>, vector<4x100xbf16> -> vector<36x100xbf16>
    %cst_13 = arith.constant dense<0.000000e+00> : vector<8x100xf32>
    %66 = tpu.matmul %38, %65, %cst_13 {dimension_numbers = #tpu.dot_dimension_numbers<[1], [0], [0], [1], [0, 0, 1, 1], [], []>} : vector<8x36xbf16>, vector<36x100xbf16>, vector<8x100xf32> -> vector<8x100xf32>
    %67 = vector.broadcast %39 : vector<8x1xf32> to vector<8x100xf32>
    %68 = arith.addf %66, %67 : vector<8x100xf32>
    %cst_14 = arith.constant 0.000000e+00 : f32
    %69 = vector.broadcast %cst_14 : f32 to vector<8x100xf32>
    %70 = arith.maximumf %68, %69 : vector<8x100xf32>
    %c0_15 = arith.constant 0 : index
    %c0_16 = arith.constant 0 : index
    %71 = vector.load %arg7[%c0_15, %c0_16] : memref<1x100xf32, #tpu.memory_space<vmem>>, vector<1x100xf32>
    %72 = vector.broadcast %71 : vector<1x100xf32> to vector<8x100xf32>
    %73 = arith.mulf %70, %72 : vector<8x100xf32>
    %c0_17 = arith.constant 0 : index
    %c0_18 = arith.constant 0 : index
    %74 = vector.load %arg8[%c0_17, %c0_18] : memref<8x72xbf16, #tpu.memory_space<vmem>>, vector<8x72xbf16>
    %c0_19 = arith.constant 0 : index
    %c0_20 = arith.constant 0 : index
    %75 = vector.load %arg9[%c0_19, %c0_20] : memref<8x1xf32, #tpu.memory_space<vmem>>, vector<8x1xf32>
    %76 = arith.truncf %73 : vector<8x100xf32> to vector<8x100xbf16>
    %77 = vector.extract_strided_slice %76 {offsets = [0, 89], sizes = [8, 11], strides = [1, 1]} : vector<8x100xbf16> to vector<8x11xbf16>
    %78 = vector.extract_strided_slice %76 {offsets = [0, 0], sizes = [8, 89], strides = [1, 1]} : vector<8x100xbf16> to vector<8x89xbf16>
    %79 = tpu.concatenate %77, %78 in 1 : vector<8x11xbf16>, vector<8x89xbf16> -> vector<8x100xbf16>
    %80 = vector.extract_strided_slice %76 {offsets = [0, 90], sizes = [8, 10], strides = [1, 1]} : vector<8x100xbf16> to vector<8x10xbf16>
    %81 = vector.extract_strided_slice %76 {offsets = [0, 0], sizes = [8, 90], strides = [1, 1]} : vector<8x100xbf16> to vector<8x90xbf16>
    %82 = tpu.concatenate %80, %81 in 1 : vector<8x10xbf16>, vector<8x90xbf16> -> vector<8x100xbf16>
    %83 = vector.extract_strided_slice %76 {offsets = [0, 91], sizes = [8, 9], strides = [1, 1]} : vector<8x100xbf16> to vector<8x9xbf16>
    %84 = vector.extract_strided_slice %76 {offsets = [0, 0], sizes = [8, 91], strides = [1, 1]} : vector<8x100xbf16> to vector<8x91xbf16>
    %85 = tpu.concatenate %83, %84 in 1 : vector<8x9xbf16>, vector<8x91xbf16> -> vector<8x100xbf16>
    %86 = vector.extract_strided_slice %76 {offsets = [0, 99], sizes = [8, 1], strides = [1, 1]} : vector<8x100xbf16> to vector<8x1xbf16>
    %87 = vector.extract_strided_slice %76 {offsets = [0, 0], sizes = [8, 99], strides = [1, 1]} : vector<8x100xbf16> to vector<8x99xbf16>
    %88 = tpu.concatenate %86, %87 in 1 : vector<8x1xbf16>, vector<8x99xbf16> -> vector<8x100xbf16>
    %89 = vector.extract_strided_slice %76 {offsets = [0, 1], sizes = [8, 99], strides = [1, 1]} : vector<8x100xbf16> to vector<8x99xbf16>
    %90 = vector.extract_strided_slice %76 {offsets = [0, 0], sizes = [8, 1], strides = [1, 1]} : vector<8x100xbf16> to vector<8x1xbf16>
    %91 = tpu.concatenate %89, %90 in 1 : vector<8x99xbf16>, vector<8x1xbf16> -> vector<8x100xbf16>
    %92 = vector.extract_strided_slice %76 {offsets = [0, 9], sizes = [8, 91], strides = [1, 1]} : vector<8x100xbf16> to vector<8x91xbf16>
    %93 = vector.extract_strided_slice %76 {offsets = [0, 0], sizes = [8, 9], strides = [1, 1]} : vector<8x100xbf16> to vector<8x9xbf16>
    %94 = tpu.concatenate %92, %93 in 1 : vector<8x91xbf16>, vector<8x9xbf16> -> vector<8x100xbf16>
    %95 = vector.extract_strided_slice %76 {offsets = [0, 10], sizes = [8, 90], strides = [1, 1]} : vector<8x100xbf16> to vector<8x90xbf16>
    %96 = vector.extract_strided_slice %76 {offsets = [0, 0], sizes = [8, 10], strides = [1, 1]} : vector<8x100xbf16> to vector<8x10xbf16>
    %97 = tpu.concatenate %95, %96 in 1 : vector<8x90xbf16>, vector<8x10xbf16> -> vector<8x100xbf16>
    %98 = vector.extract_strided_slice %76 {offsets = [0, 11], sizes = [8, 89], strides = [1, 1]} : vector<8x100xbf16> to vector<8x89xbf16>
    %99 = vector.extract_strided_slice %76 {offsets = [0, 0], sizes = [8, 11], strides = [1, 1]} : vector<8x100xbf16> to vector<8x11xbf16>
    %100 = tpu.concatenate %98, %99 in 1 : vector<8x89xbf16>, vector<8x11xbf16> -> vector<8x100xbf16>
    %101 = tpu.concatenate %79, %82, %85, %88, %76, %91, %94, %97, %100 in 0 : vector<8x100xbf16>, vector<8x100xbf16>, vector<8x100xbf16>, vector<8x100xbf16>, vector<8x100xbf16>, vector<8x100xbf16>, vector<8x100xbf16>, vector<8x100xbf16>, vector<8x100xbf16> -> vector<72x100xbf16>
    %cst_21 = arith.constant dense<0.000000e+00> : vector<8x100xf32>
    %102 = tpu.matmul %74, %101, %cst_21 {dimension_numbers = #tpu.dot_dimension_numbers<[1], [0], [0], [1], [0, 0, 1, 1], [], []>} : vector<8x72xbf16>, vector<72x100xbf16>, vector<8x100xf32> -> vector<8x100xf32>
    %103 = vector.broadcast %75 : vector<8x1xf32> to vector<8x100xf32>
    %104 = arith.addf %102, %103 : vector<8x100xf32>
    %cst_22 = arith.constant 0.000000e+00 : f32
    %105 = vector.broadcast %cst_22 : f32 to vector<8x100xf32>
    %106 = arith.maximumf %104, %105 : vector<8x100xf32>
    %107 = vector.extract_strided_slice %106 {offsets = [0, 1], sizes = [8, 99], strides = [1, 1]} : vector<8x100xf32> to vector<8x99xf32>
    %108 = vector.extract_strided_slice %106 {offsets = [0, 0], sizes = [8, 1], strides = [1, 1]} : vector<8x100xf32> to vector<8x1xf32>
    %109 = tpu.concatenate %107, %108 in 1 : vector<8x99xf32>, vector<8x1xf32> -> vector<8x100xf32>
    %110 = arith.maximumf %106, %109 : vector<8x100xf32>
    %111 = vector.extract_strided_slice %106 {offsets = [0, 10], sizes = [8, 90], strides = [1, 1]} : vector<8x100xf32> to vector<8x90xf32>
    %112 = vector.extract_strided_slice %106 {offsets = [0, 0], sizes = [8, 10], strides = [1, 1]} : vector<8x100xf32> to vector<8x10xf32>
    %113 = tpu.concatenate %111, %112 in 1 : vector<8x90xf32>, vector<8x10xf32> -> vector<8x100xf32>
    %114 = vector.extract_strided_slice %106 {offsets = [0, 11], sizes = [8, 89], strides = [1, 1]} : vector<8x100xf32> to vector<8x89xf32>
    %115 = vector.extract_strided_slice %106 {offsets = [0, 0], sizes = [8, 11], strides = [1, 1]} : vector<8x100xf32> to vector<8x11xf32>
    %116 = tpu.concatenate %114, %115 in 1 : vector<8x89xf32>, vector<8x11xf32> -> vector<8x100xf32>
    %117 = arith.maximumf %113, %116 : vector<8x100xf32>
    %118 = arith.maximumf %110, %117 : vector<8x100xf32>
    %c0_23 = arith.constant 0 : index
    %c0_24 = arith.constant 0 : index
    %119 = vector.load %arg10[%c0_23, %c0_24] : memref<100x36xf32, #tpu.memory_space<vmem>>, vector<100x36xf32>
    %cst_25 = arith.constant dense<0.000000e+00> : vector<8x36xf32>
    %120 = tpu.matmul %118, %119, %cst_25 {dimension_numbers = #tpu.dot_dimension_numbers<[1], [0], [0], [1], [0, 0, 1, 1], [], []>} : vector<8x100xf32>, vector<100x36xf32>, vector<8x36xf32> -> vector<8x36xf32>
    %121 = arith.truncf %120 : vector<8x36xf32> to vector<8x36xbf16>
    %c0_26 = arith.constant 0 : index
    %c0_27 = arith.constant 0 : index
    %c0_28 = arith.constant 0 : index
    %122 = vector.load %arg11[%c0_26, %c0_27, %c0_28] : memref<1x8x36xbf16, #tpu.memory_space<vmem>>, vector<1x8x36xbf16>
    %123 = vector.shape_cast %122 : vector<1x8x36xbf16> to vector<8x36xbf16>
    %124 = vector.shape_cast %121 : vector<8x36xbf16> to vector<1x8x36xbf16>
    tpu.vector_store %arg11[%c0_26, %c0_27, %c0_28], %124 {strides = array<i32>} : memref<1x8x36xbf16, #tpu.memory_space<vmem>>, vector<1x8x36xbf16>,
    return
  }
  func.func @transform_0(%arg0: i32) -> (i32, i32, i32) {
    %c0_i32 = arith.constant 0 : i32
    %c0_i32_0 = arith.constant 0 : i32
    %c0_i32_1 = arith.constant 0 : i32
    return %arg0, %c0_i32, %c0_i32_0 : i32, i32, i32
  }
  func.func @transform_1(%arg0: i32) -> (i32, i32) {
    %c0_i32 = arith.constant 0 : i32
    %c0_i32_0 = arith.constant 0 : i32
    %c0_i32_1 = arith.constant 0 : i32
    return %c0_i32, %c0_i32_0 : i32, i32
  }
  func.func @transform_2(%arg0: i32) -> (i32, i32) {
    %c0_i32 = arith.constant 0 : i32
    %c0_i32_0 = arith.constant 0 : i32
    %c0_i32_1 = arith.constant 0 : i32
    return %c0_i32, %c0_i32_0 : i32, i32
  }
  func.func @transform_3(%arg0: i32) -> (i32, i32) {
    %c0_i32 = arith.constant 0 : i32
    %c0_i32_0 = arith.constant 0 : i32
    %c0_i32_1 = arith.constant 0 : i32
    return %c0_i32, %c0_i32_0 : i32, i32
  }
  func.func @transform_4(%arg0: i32) -> (i32, i32) {
    %c0_i32 = arith.constant 0 : i32
    %c0_i32_0 = arith.constant 0 : i32
    %c0_i32_1 = arith.constant 0 : i32
    return %c0_i32, %c0_i32_0 : i32, i32
  }
  func.func @transform_5(%arg0: i32) -> (i32, i32) {
    %c0_i32 = arith.constant 0 : i32
    %c0_i32_0 = arith.constant 0 : i32
    %c0_i32_1 = arith.constant 0 : i32
    return %c0_i32, %c0_i32_0 : i32, i32
  }
  func.func @transform_6(%arg0: i32) -> (i32, i32) {
    %c0_i32 = arith.constant 0 : i32
    %c0_i32_0 = arith.constant 0 : i32
    %c0_i32_1 = arith.constant 0 : i32
    return %c0_i32, %c0_i32_0 : i32, i32
  }
  func.func @transform_7(%arg0: i32) -> (i32, i32) {
    %c0_i32 = arith.constant 0 : i32
    %c0_i32_0 = arith.constant 0 : i32
    %c0_i32_1 = arith.constant 0 : i32
    return %c0_i32, %c0_i32_0 : i32, i32
  }
  func.func @transform_8(%arg0: i32) -> (i32, i32) {
    %c0_i32 = arith.constant 0 : i32
    %c0_i32_0 = arith.constant 0 : i32
    %c0_i32_1 = arith.constant 0 : i32
    return %c0_i32, %c0_i32_0 : i32, i32
  }
  func.func @transform_9(%arg0: i32) -> (i32, i32) {
    %c0_i32 = arith.constant 0 : i32
    %c0_i32_0 = arith.constant 0 : i32
    %c0_i32_1 = arith.constant 0 : i32
    return %c0_i32, %c0_i32_0 : i32, i32
  }
  func.func @transform_10(%arg0: i32) -> (i32, i32, i32) {
    %c0_i32 = arith.constant 0 : i32
    %c0_i32_0 = arith.constant 0 : i32
    %c0_i32_1 = arith.constant 0 : i32
    return %arg0, %c0_i32, %c0_i32_0 : i32, i32, i32
  }
}

module attributes {stable_mosaic.version = 11 : i64} {
  func.func @kernel(%arg0: i32, %arg1: memref<1x3x324xf32, #tpu.memory_space<vmem>>, %arg2: memref<2x27xbf16, #tpu.memory_space<vmem>>, %arg3: memref<2x1xf32, #tpu.memory_space<vmem>>, %arg4: memref<1x324xf32, #tpu.memory_space<vmem>>, %arg5: memref<4x18xbf16, #tpu.memory_space<vmem>>, %arg6: memref<4x1xf32, #tpu.memory_space<vmem>>, %arg7: memref<1x324xf32, #tpu.memory_space<vmem>>, %arg8: memref<4x36xbf16, #tpu.memory_space<vmem>>, %arg9: memref<4x1xf32, #tpu.memory_space<vmem>>, %arg10: memref<324x100xf32, #tpu.memory_space<vmem>>, %arg11: memref<8x36xbf16, #tpu.memory_space<vmem>>, %arg12: memref<8x1xf32, #tpu.memory_space<vmem>>, %arg13: memref<1x100xf32, #tpu.memory_space<vmem>>, %arg14: memref<8x72xbf16, #tpu.memory_space<vmem>>, %arg15: memref<8x1xf32, #tpu.memory_space<vmem>>, %arg16: memref<100x36xf32, #tpu.memory_space<vmem>>, %arg17: memref<1x8x36xbf16, #tpu.memory_space<vmem>>) attributes {dimension_semantics = [#tpu.dimension_semantics<parallel>], iteration_bounds = array<i64: 2>, scalar_prefetch = 0 : i64, scratch_operands = 0 : i64, tpu.core_type = #tpu.core_type<tc>, window_params = [{transform_indices = @transform_0, window_bounds = array<i64: 1, 3, 324>}, {pipeline_mode = #tpu.pipeline_mode<synchronous>, transform_indices = @transform_1, window_bounds = array<i64: 2, 27>}, {pipeline_mode = #tpu.pipeline_mode<synchronous>, transform_indices = @transform_2, window_bounds = array<i64: 2, 1>}, {pipeline_mode = #tpu.pipeline_mode<synchronous>, transform_indices = @transform_3, window_bounds = array<i64: 1, 324>}, {pipeline_mode = #tpu.pipeline_mode<synchronous>, transform_indices = @transform_4, window_bounds = array<i64: 4, 18>}, {pipeline_mode = #tpu.pipeline_mode<synchronous>, transform_indices = @transform_5, window_bounds = array<i64: 4, 1>}, {pipeline_mode = #tpu.pipeline_mode<synchronous>, transform_indices = @transform_6, window_bounds = array<i64: 1, 324>}, {pipeline_mode = #tpu.pipeline_mode<synchronous>, transform_indices = @transform_7, window_bounds = array<i64: 4, 36>}, {pipeline_mode = #tpu.pipeline_mode<synchronous>, transform_indices = @transform_8, window_bounds = array<i64: 4, 1>}, {pipeline_mode = #tpu.pipeline_mode<synchronous>, transform_indices = @transform_9, window_bounds = array<i64: 324, 100>}, {pipeline_mode = #tpu.pipeline_mode<synchronous>, transform_indices = @transform_10, window_bounds = array<i64: 8, 36>}, {pipeline_mode = #tpu.pipeline_mode<synchronous>, transform_indices = @transform_11, window_bounds = array<i64: 8, 1>}, {pipeline_mode = #tpu.pipeline_mode<synchronous>, transform_indices = @transform_12, window_bounds = array<i64: 1, 100>}, {pipeline_mode = #tpu.pipeline_mode<synchronous>, transform_indices = @transform_13, window_bounds = array<i64: 8, 72>}, {pipeline_mode = #tpu.pipeline_mode<synchronous>, transform_indices = @transform_14, window_bounds = array<i64: 8, 1>}, {pipeline_mode = #tpu.pipeline_mode<synchronous>, transform_indices = @transform_15, window_bounds = array<i64: 100, 36>}, {transform_indices = @transform_16, window_bounds = array<i64: 1, 8, 36>}]} {
    %c0 = arith.constant 0 : index
    %c0_0 = arith.constant 0 : index
    %c0_1 = arith.constant 0 : index
    %0 = vector.load %arg1[%c0, %c0_0, %c0_1] : memref<1x3x324xf32, #tpu.memory_space<vmem>>, vector<1x3x324xf32>
    %1 = vector.shape_cast %0 : vector<1x3x324xf32> to vector<3x324xf32>
    %c0_2 = arith.constant 0 : index
    %c0_3 = arith.constant 0 : index
    %2 = vector.load %arg2[%c0_2, %c0_3] : memref<2x27xbf16, #tpu.memory_space<vmem>>, vector<2x27xbf16>
    %c0_4 = arith.constant 0 : index
    %c0_5 = arith.constant 0 : index
    %3 = vector.load %arg3[%c0_4, %c0_5] : memref<2x1xf32, #tpu.memory_space<vmem>>, vector<2x1xf32>
    %4 = arith.truncf %1 : vector<3x324xf32> to vector<3x324xbf16>
    %5 = vector.extract_strided_slice %4 {offsets = [0, 305], sizes = [3, 19], strides = [1, 1]} : vector<3x324xbf16> to vector<3x19xbf16>
    %6 = vector.extract_strided_slice %4 {offsets = [0, 0], sizes = [3, 305], strides = [1, 1]} : vector<3x324xbf16> to vector<3x305xbf16>
    %7 = tpu.concatenate %5, %6 in 1 : vector<3x19xbf16>, vector<3x305xbf16> -> vector<3x324xbf16>
    %8 = vector.extract_strided_slice %4 {offsets = [0, 306], sizes = [3, 18], strides = [1, 1]} : vector<3x324xbf16> to vector<3x18xbf16>
    %9 = vector.extract_strided_slice %4 {offsets = [0, 0], sizes = [3, 306], strides = [1, 1]} : vector<3x324xbf16> to vector<3x306xbf16>
    %10 = tpu.concatenate %8, %9 in 1 : vector<3x18xbf16>, vector<3x306xbf16> -> vector<3x324xbf16>
    %11 = vector.extract_strided_slice %4 {offsets = [0, 307], sizes = [3, 17], strides = [1, 1]} : vector<3x324xbf16> to vector<3x17xbf16>
    %12 = vector.extract_strided_slice %4 {offsets = [0, 0], sizes = [3, 307], strides = [1, 1]} : vector<3x324xbf16> to vector<3x307xbf16>
    %13 = tpu.concatenate %11, %12 in 1 : vector<3x17xbf16>, vector<3x307xbf16> -> vector<3x324xbf16>
    %14 = vector.extract_strided_slice %4 {offsets = [0, 323], sizes = [3, 1], strides = [1, 1]} : vector<3x324xbf16> to vector<3x1xbf16>
    %15 = vector.extract_strided_slice %4 {offsets = [0, 0], sizes = [3, 323], strides = [1, 1]} : vector<3x324xbf16> to vector<3x323xbf16>
    %16 = tpu.concatenate %14, %15 in 1 : vector<3x1xbf16>, vector<3x323xbf16> -> vector<3x324xbf16>
    %17 = vector.extract_strided_slice %4 {offsets = [0, 1], sizes = [3, 323], strides = [1, 1]} : vector<3x324xbf16> to vector<3x323xbf16>
    %18 = vector.extract_strided_slice %4 {offsets = [0, 0], sizes = [3, 1], strides = [1, 1]} : vector<3x324xbf16> to vector<3x1xbf16>
    %19 = tpu.concatenate %17, %18 in 1 : vector<3x323xbf16>, vector<3x1xbf16> -> vector<3x324xbf16>
    %20 = vector.extract_strided_slice %4 {offsets = [0, 17], sizes = [3, 307], strides = [1, 1]} : vector<3x324xbf16> to vector<3x307xbf16>
    %21 = vector.extract_strided_slice %4 {offsets = [0, 0], sizes = [3, 17], strides = [1, 1]} : vector<3x324xbf16> to vector<3x17xbf16>
    %22 = tpu.concatenate %20, %21 in 1 : vector<3x307xbf16>, vector<3x17xbf16> -> vector<3x324xbf16>
    %23 = vector.extract_strided_slice %4 {offsets = [0, 18], sizes = [3, 306], strides = [1, 1]} : vector<3x324xbf16> to vector<3x306xbf16>
    %24 = vector.extract_strided_slice %4 {offsets = [0, 0], sizes = [3, 18], strides = [1, 1]} : vector<3x324xbf16> to vector<3x18xbf16>
    %25 = tpu.concatenate %23, %24 in 1 : vector<3x306xbf16>, vector<3x18xbf16> -> vector<3x324xbf16>
    %26 = vector.extract_strided_slice %4 {offsets = [0, 19], sizes = [3, 305], strides = [1, 1]} : vector<3x324xbf16> to vector<3x305xbf16>
    %27 = vector.extract_strided_slice %4 {offsets = [0, 0], sizes = [3, 19], strides = [1, 1]} : vector<3x324xbf16> to vector<3x19xbf16>
    %28 = tpu.concatenate %26, %27 in 1 : vector<3x305xbf16>, vector<3x19xbf16> -> vector<3x324xbf16>
    %29 = tpu.concatenate %7, %10, %13, %16, %4, %19, %22, %25, %28 in 0 : vector<3x324xbf16>, vector<3x324xbf16>, vector<3x324xbf16>, vector<3x324xbf16>, vector<3x324xbf16>, vector<3x324xbf16>, vector<3x324xbf16>, vector<3x324xbf16>, vector<3x324xbf16> -> vector<27x324xbf16>
    %cst = arith.constant dense<0.000000e+00> : vector<2x324xf32>
    %30 = tpu.matmul %2, %29, %cst {dimension_numbers = #tpu.dot_dimension_numbers<[1], [0], [0], [1], [0, 0, 1, 1], [], []>} : vector<2x27xbf16>, vector<27x324xbf16>, vector<2x324xf32> -> vector<2x324xf32>
    %31 = vector.broadcast %3 : vector<2x1xf32> to vector<2x324xf32>
    %32 = arith.addf %30, %31 : vector<2x324xf32>
    %cst_6 = arith.constant 0.000000e+00 : f32
    %33 = vector.broadcast %cst_6 : f32 to vector<2x324xf32>
    %34 = arith.maximumf %32, %33 : vector<2x324xf32>
    %c0_7 = arith.constant 0 : index
    %c0_8 = arith.constant 0 : index
    %35 = vector.load %arg4[%c0_7, %c0_8] : memref<1x324xf32, #tpu.memory_space<vmem>>, vector<1x324xf32>
    %36 = vector.broadcast %35 : vector<1x324xf32> to vector<2x324xf32>
    %37 = arith.mulf %34, %36 : vector<2x324xf32>
    %c0_9 = arith.constant 0 : index
    %c0_10 = arith.constant 0 : index
    %38 = vector.load %arg5[%c0_9, %c0_10] : memref<4x18xbf16, #tpu.memory_space<vmem>>, vector<4x18xbf16>
    %c0_11 = arith.constant 0 : index
    %c0_12 = arith.constant 0 : index
    %39 = vector.load %arg6[%c0_11, %c0_12] : memref<4x1xf32, #tpu.memory_space<vmem>>, vector<4x1xf32>
    %40 = arith.truncf %37 : vector<2x324xf32> to vector<2x324xbf16>
    %41 = vector.extract_strided_slice %40 {offsets = [0, 305], sizes = [2, 19], strides = [1, 1]} : vector<2x324xbf16> to vector<2x19xbf16>
    %42 = vector.extract_strided_slice %40 {offsets = [0, 0], sizes = [2, 305], strides = [1, 1]} : vector<2x324xbf16> to vector<2x305xbf16>
    %43 = tpu.concatenate %41, %42 in 1 : vector<2x19xbf16>, vector<2x305xbf16> -> vector<2x324xbf16>
    %44 = vector.extract_strided_slice %40 {offsets = [0, 306], sizes = [2, 18], strides = [1, 1]} : vector<2x324xbf16> to vector<2x18xbf16>
    %45 = vector.extract_strided_slice %40 {offsets = [0, 0], sizes = [2, 306], strides = [1, 1]} : vector<2x324xbf16> to vector<2x306xbf16>
    %46 = tpu.concatenate %44, %45 in 1 : vector<2x18xbf16>, vector<2x306xbf16> -> vector<2x324xbf16>
    %47 = vector.extract_strided_slice %40 {offsets = [0, 307], sizes = [2, 17], strides = [1, 1]} : vector<2x324xbf16> to vector<2x17xbf16>
    %48 = vector.extract_strided_slice %40 {offsets = [0, 0], sizes = [2, 307], strides = [1, 1]} : vector<2x324xbf16> to vector<2x307xbf16>
    %49 = tpu.concatenate %47, %48 in 1 : vector<2x17xbf16>, vector<2x307xbf16> -> vector<2x324xbf16>
    %50 = vector.extract_strided_slice %40 {offsets = [0, 323], sizes = [2, 1], strides = [1, 1]} : vector<2x324xbf16> to vector<2x1xbf16>
    %51 = vector.extract_strided_slice %40 {offsets = [0, 0], sizes = [2, 323], strides = [1, 1]} : vector<2x324xbf16> to vector<2x323xbf16>
    %52 = tpu.concatenate %50, %51 in 1 : vector<2x1xbf16>, vector<2x323xbf16> -> vector<2x324xbf16>
    %53 = vector.extract_strided_slice %40 {offsets = [0, 1], sizes = [2, 323], strides = [1, 1]} : vector<2x324xbf16> to vector<2x323xbf16>
    %54 = vector.extract_strided_slice %40 {offsets = [0, 0], sizes = [2, 1], strides = [1, 1]} : vector<2x324xbf16> to vector<2x1xbf16>
    %55 = tpu.concatenate %53, %54 in 1 : vector<2x323xbf16>, vector<2x1xbf16> -> vector<2x324xbf16>
    %56 = vector.extract_strided_slice %40 {offsets = [0, 17], sizes = [2, 307], strides = [1, 1]} : vector<2x324xbf16> to vector<2x307xbf16>
    %57 = vector.extract_strided_slice %40 {offsets = [0, 0], sizes = [2, 17], strides = [1, 1]} : vector<2x324xbf16> to vector<2x17xbf16>
    %58 = tpu.concatenate %56, %57 in 1 : vector<2x307xbf16>, vector<2x17xbf16> -> vector<2x324xbf16>
    %59 = vector.extract_strided_slice %40 {offsets = [0, 18], sizes = [2, 306], strides = [1, 1]} : vector<2x324xbf16> to vector<2x306xbf16>
    %60 = vector.extract_strided_slice %40 {offsets = [0, 0], sizes = [2, 18], strides = [1, 1]} : vector<2x324xbf16> to vector<2x18xbf16>
    %61 = tpu.concatenate %59, %60 in 1 : vector<2x306xbf16>, vector<2x18xbf16> -> vector<2x324xbf16>
    %62 = vector.extract_strided_slice %40 {offsets = [0, 19], sizes = [2, 305], strides = [1, 1]} : vector<2x324xbf16> to vector<2x305xbf16>
    %63 = vector.extract_strided_slice %40 {offsets = [0, 0], sizes = [2, 19], strides = [1, 1]} : vector<2x324xbf16> to vector<2x19xbf16>
    %64 = tpu.concatenate %62, %63 in 1 : vector<2x305xbf16>, vector<2x19xbf16> -> vector<2x324xbf16>
    %65 = tpu.concatenate %43, %46, %49, %52, %40, %55, %58, %61, %64 in 0 : vector<2x324xbf16>, vector<2x324xbf16>, vector<2x324xbf16>, vector<2x324xbf16>, vector<2x324xbf16>, vector<2x324xbf16>, vector<2x324xbf16>, vector<2x324xbf16>, vector<2x324xbf16> -> vector<18x324xbf16>
    %cst_13 = arith.constant dense<0.000000e+00> : vector<4x324xf32>
    %66 = tpu.matmul %38, %65, %cst_13 {dimension_numbers = #tpu.dot_dimension_numbers<[1], [0], [0], [1], [0, 0, 1, 1], [], []>} : vector<4x18xbf16>, vector<18x324xbf16>, vector<4x324xf32> -> vector<4x324xf32>
    %67 = vector.broadcast %39 : vector<4x1xf32> to vector<4x324xf32>
    %68 = arith.addf %66, %67 : vector<4x324xf32>
    %cst_14 = arith.constant 0.000000e+00 : f32
    %69 = vector.broadcast %cst_14 : f32 to vector<4x324xf32>
    %70 = arith.maximumf %68, %69 : vector<4x324xf32>
    %c0_15 = arith.constant 0 : index
    %c0_16 = arith.constant 0 : index
    %71 = vector.load %arg7[%c0_15, %c0_16] : memref<1x324xf32, #tpu.memory_space<vmem>>, vector<1x324xf32>
    %72 = vector.broadcast %71 : vector<1x324xf32> to vector<4x324xf32>
    %73 = arith.mulf %70, %72 : vector<4x324xf32>
    %c0_17 = arith.constant 0 : index
    %c0_18 = arith.constant 0 : index
    %74 = vector.load %arg8[%c0_17, %c0_18] : memref<4x36xbf16, #tpu.memory_space<vmem>>, vector<4x36xbf16>
    %c0_19 = arith.constant 0 : index
    %c0_20 = arith.constant 0 : index
    %75 = vector.load %arg9[%c0_19, %c0_20] : memref<4x1xf32, #tpu.memory_space<vmem>>, vector<4x1xf32>
    %76 = arith.truncf %73 : vector<4x324xf32> to vector<4x324xbf16>
    %77 = vector.extract_strided_slice %76 {offsets = [0, 305], sizes = [4, 19], strides = [1, 1]} : vector<4x324xbf16> to vector<4x19xbf16>
    %78 = vector.extract_strided_slice %76 {offsets = [0, 0], sizes = [4, 305], strides = [1, 1]} : vector<4x324xbf16> to vector<4x305xbf16>
    %79 = tpu.concatenate %77, %78 in 1 : vector<4x19xbf16>, vector<4x305xbf16> -> vector<4x324xbf16>
    %80 = vector.extract_strided_slice %76 {offsets = [0, 306], sizes = [4, 18], strides = [1, 1]} : vector<4x324xbf16> to vector<4x18xbf16>
    %81 = vector.extract_strided_slice %76 {offsets = [0, 0], sizes = [4, 306], strides = [1, 1]} : vector<4x324xbf16> to vector<4x306xbf16>
    %82 = tpu.concatenate %80, %81 in 1 : vector<4x18xbf16>, vector<4x306xbf16> -> vector<4x324xbf16>
    %83 = vector.extract_strided_slice %76 {offsets = [0, 307], sizes = [4, 17], strides = [1, 1]} : vector<4x324xbf16> to vector<4x17xbf16>
    %84 = vector.extract_strided_slice %76 {offsets = [0, 0], sizes = [4, 307], strides = [1, 1]} : vector<4x324xbf16> to vector<4x307xbf16>
    %85 = tpu.concatenate %83, %84 in 1 : vector<4x17xbf16>, vector<4x307xbf16> -> vector<4x324xbf16>
    %86 = vector.extract_strided_slice %76 {offsets = [0, 323], sizes = [4, 1], strides = [1, 1]} : vector<4x324xbf16> to vector<4x1xbf16>
    %87 = vector.extract_strided_slice %76 {offsets = [0, 0], sizes = [4, 323], strides = [1, 1]} : vector<4x324xbf16> to vector<4x323xbf16>
    %88 = tpu.concatenate %86, %87 in 1 : vector<4x1xbf16>, vector<4x323xbf16> -> vector<4x324xbf16>
    %89 = vector.extract_strided_slice %76 {offsets = [0, 1], sizes = [4, 323], strides = [1, 1]} : vector<4x324xbf16> to vector<4x323xbf16>
    %90 = vector.extract_strided_slice %76 {offsets = [0, 0], sizes = [4, 1], strides = [1, 1]} : vector<4x324xbf16> to vector<4x1xbf16>
    %91 = tpu.concatenate %89, %90 in 1 : vector<4x323xbf16>, vector<4x1xbf16> -> vector<4x324xbf16>
    %92 = vector.extract_strided_slice %76 {offsets = [0, 17], sizes = [4, 307], strides = [1, 1]} : vector<4x324xbf16> to vector<4x307xbf16>
    %93 = vector.extract_strided_slice %76 {offsets = [0, 0], sizes = [4, 17], strides = [1, 1]} : vector<4x324xbf16> to vector<4x17xbf16>
    %94 = tpu.concatenate %92, %93 in 1 : vector<4x307xbf16>, vector<4x17xbf16> -> vector<4x324xbf16>
    %95 = vector.extract_strided_slice %76 {offsets = [0, 18], sizes = [4, 306], strides = [1, 1]} : vector<4x324xbf16> to vector<4x306xbf16>
    %96 = vector.extract_strided_slice %76 {offsets = [0, 0], sizes = [4, 18], strides = [1, 1]} : vector<4x324xbf16> to vector<4x18xbf16>
    %97 = tpu.concatenate %95, %96 in 1 : vector<4x306xbf16>, vector<4x18xbf16> -> vector<4x324xbf16>
    %98 = vector.extract_strided_slice %76 {offsets = [0, 19], sizes = [4, 305], strides = [1, 1]} : vector<4x324xbf16> to vector<4x305xbf16>
    %99 = vector.extract_strided_slice %76 {offsets = [0, 0], sizes = [4, 19], strides = [1, 1]} : vector<4x324xbf16> to vector<4x19xbf16>
    %100 = tpu.concatenate %98, %99 in 1 : vector<4x305xbf16>, vector<4x19xbf16> -> vector<4x324xbf16>
    %101 = tpu.concatenate %79, %82, %85, %88, %76, %91, %94, %97, %100 in 0 : vector<4x324xbf16>, vector<4x324xbf16>, vector<4x324xbf16>, vector<4x324xbf16>, vector<4x324xbf16>, vector<4x324xbf16>, vector<4x324xbf16>, vector<4x324xbf16>, vector<4x324xbf16> -> vector<36x324xbf16>
    %cst_21 = arith.constant dense<0.000000e+00> : vector<4x324xf32>
    %102 = tpu.matmul %74, %101, %cst_21 {dimension_numbers = #tpu.dot_dimension_numbers<[1], [0], [0], [1], [0, 0, 1, 1], [], []>} : vector<4x36xbf16>, vector<36x324xbf16>, vector<4x324xf32> -> vector<4x324xf32>
    %103 = vector.broadcast %75 : vector<4x1xf32> to vector<4x324xf32>
    %104 = arith.addf %102, %103 : vector<4x324xf32>
    %cst_22 = arith.constant 0.000000e+00 : f32
    %105 = vector.broadcast %cst_22 : f32 to vector<4x324xf32>
    %106 = arith.maximumf %104, %105 : vector<4x324xf32>
    %107 = vector.extract_strided_slice %106 {offsets = [0, 1], sizes = [4, 323], strides = [1, 1]} : vector<4x324xf32> to vector<4x323xf32>
    %108 = vector.extract_strided_slice %106 {offsets = [0, 0], sizes = [4, 1], strides = [1, 1]} : vector<4x324xf32> to vector<4x1xf32>
    %109 = tpu.concatenate %107, %108 in 1 : vector<4x323xf32>, vector<4x1xf32> -> vector<4x324xf32>
    %110 = arith.maximumf %106, %109 : vector<4x324xf32>
    %111 = vector.extract_strided_slice %106 {offsets = [0, 18], sizes = [4, 306], strides = [1, 1]} : vector<4x324xf32> to vector<4x306xf32>
    %112 = vector.extract_strided_slice %106 {offsets = [0, 0], sizes = [4, 18], strides = [1, 1]} : vector<4x324xf32> to vector<4x18xf32>
    %113 = tpu.concatenate %111, %112 in 1 : vector<4x306xf32>, vector<4x18xf32> -> vector<4x324xf32>
    %114 = vector.extract_strided_slice %106 {offsets = [0, 19], sizes = [4, 305], strides = [1, 1]} : vector<4x324xf32> to vector<4x305xf32>
    %115 = vector.extract_strided_slice %106 {offsets = [0, 0], sizes = [4, 19], strides = [1, 1]} : vector<4x324xf32> to vector<4x19xf32>
    %116 = tpu.concatenate %114, %115 in 1 : vector<4x305xf32>, vector<4x19xf32> -> vector<4x324xf32>
    %117 = arith.maximumf %113, %116 : vector<4x324xf32>
    %118 = arith.maximumf %110, %117 : vector<4x324xf32>
    %c0_23 = arith.constant 0 : index
    %c0_24 = arith.constant 0 : index
    %119 = vector.load %arg10[%c0_23, %c0_24] : memref<324x100xf32, #tpu.memory_space<vmem>>, vector<324x100xf32>
    %cst_25 = arith.constant dense<0.000000e+00> : vector<4x100xf32>
    %120 = tpu.matmul %118, %119, %cst_25 {dimension_numbers = #tpu.dot_dimension_numbers<[1], [0], [0], [1], [0, 0, 1, 1], [], []>} : vector<4x324xf32>, vector<324x100xf32>, vector<4x100xf32> -> vector<4x100xf32>
    %c0_26 = arith.constant 0 : index
    %c0_27 = arith.constant 0 : index
    %121 = vector.load %arg11[%c0_26, %c0_27] : memref<8x36xbf16, #tpu.memory_space<vmem>>, vector<8x36xbf16>
    %c0_28 = arith.constant 0 : index
    %c0_29 = arith.constant 0 : index
    %122 = vector.load %arg12[%c0_28, %c0_29] : memref<8x1xf32, #tpu.memory_space<vmem>>, vector<8x1xf32>
    %123 = arith.truncf %120 : vector<4x100xf32> to vector<4x100xbf16>
    %124 = vector.extract_strided_slice %123 {offsets = [0, 89], sizes = [4, 11], strides = [1, 1]} : vector<4x100xbf16> to vector<4x11xbf16>
    %125 = vector.extract_strided_slice %123 {offsets = [0, 0], sizes = [4, 89], strides = [1, 1]} : vector<4x100xbf16> to vector<4x89xbf16>
    %126 = tpu.concatenate %124, %125 in 1 : vector<4x11xbf16>, vector<4x89xbf16> -> vector<4x100xbf16>
    %127 = vector.extract_strided_slice %123 {offsets = [0, 90], sizes = [4, 10], strides = [1, 1]} : vector<4x100xbf16> to vector<4x10xbf16>
    %128 = vector.extract_strided_slice %123 {offsets = [0, 0], sizes = [4, 90], strides = [1, 1]} : vector<4x100xbf16> to vector<4x90xbf16>
    %129 = tpu.concatenate %127, %128 in 1 : vector<4x10xbf16>, vector<4x90xbf16> -> vector<4x100xbf16>
    %130 = vector.extract_strided_slice %123 {offsets = [0, 91], sizes = [4, 9], strides = [1, 1]} : vector<4x100xbf16> to vector<4x9xbf16>
    %131 = vector.extract_strided_slice %123 {offsets = [0, 0], sizes = [4, 91], strides = [1, 1]} : vector<4x100xbf16> to vector<4x91xbf16>
    %132 = tpu.concatenate %130, %131 in 1 : vector<4x9xbf16>, vector<4x91xbf16> -> vector<4x100xbf16>
    %133 = vector.extract_strided_slice %123 {offsets = [0, 99], sizes = [4, 1], strides = [1, 1]} : vector<4x100xbf16> to vector<4x1xbf16>
    %134 = vector.extract_strided_slice %123 {offsets = [0, 0], sizes = [4, 99], strides = [1, 1]} : vector<4x100xbf16> to vector<4x99xbf16>
    %135 = tpu.concatenate %133, %134 in 1 : vector<4x1xbf16>, vector<4x99xbf16> -> vector<4x100xbf16>
    %136 = vector.extract_strided_slice %123 {offsets = [0, 1], sizes = [4, 99], strides = [1, 1]} : vector<4x100xbf16> to vector<4x99xbf16>
    %137 = vector.extract_strided_slice %123 {offsets = [0, 0], sizes = [4, 1], strides = [1, 1]} : vector<4x100xbf16> to vector<4x1xbf16>
    %138 = tpu.concatenate %136, %137 in 1 : vector<4x99xbf16>, vector<4x1xbf16> -> vector<4x100xbf16>
    %139 = vector.extract_strided_slice %123 {offsets = [0, 9], sizes = [4, 91], strides = [1, 1]} : vector<4x100xbf16> to vector<4x91xbf16>
    %140 = vector.extract_strided_slice %123 {offsets = [0, 0], sizes = [4, 9], strides = [1, 1]} : vector<4x100xbf16> to vector<4x9xbf16>
    %141 = tpu.concatenate %139, %140 in 1 : vector<4x91xbf16>, vector<4x9xbf16> -> vector<4x100xbf16>
    %142 = vector.extract_strided_slice %123 {offsets = [0, 10], sizes = [4, 90], strides = [1, 1]} : vector<4x100xbf16> to vector<4x90xbf16>
    %143 = vector.extract_strided_slice %123 {offsets = [0, 0], sizes = [4, 10], strides = [1, 1]} : vector<4x100xbf16> to vector<4x10xbf16>
    %144 = tpu.concatenate %142, %143 in 1 : vector<4x90xbf16>, vector<4x10xbf16> -> vector<4x100xbf16>
    %145 = vector.extract_strided_slice %123 {offsets = [0, 11], sizes = [4, 89], strides = [1, 1]} : vector<4x100xbf16> to vector<4x89xbf16>
    %146 = vector.extract_strided_slice %123 {offsets = [0, 0], sizes = [4, 11], strides = [1, 1]} : vector<4x100xbf16> to vector<4x11xbf16>
    %147 = tpu.concatenate %145, %146 in 1 : vector<4x89xbf16>, vector<4x11xbf16> -> vector<4x100xbf16>
    %148 = tpu.concatenate %126, %129, %132, %135, %123, %138, %141, %144, %147 in 0 : vector<4x100xbf16>, vector<4x100xbf16>, vector<4x100xbf16>, vector<4x100xbf16>, vector<4x100xbf16>, vector<4x100xbf16>, vector<4x100xbf16>, vector<4x100xbf16>, vector<4x100xbf16> -> vector<36x100xbf16>
    %cst_30 = arith.constant dense<0.000000e+00> : vector<8x100xf32>
    %149 = tpu.matmul %121, %148, %cst_30 {dimension_numbers = #tpu.dot_dimension_numbers<[1], [0], [0], [1], [0, 0, 1, 1], [], []>} : vector<8x36xbf16>, vector<36x100xbf16>, vector<8x100xf32> -> vector<8x100xf32>
    %150 = vector.broadcast %122 : vector<8x1xf32> to vector<8x100xf32>
    %151 = arith.addf %149, %150 : vector<8x100xf32>
    %cst_31 = arith.constant 0.000000e+00 : f32
    %152 = vector.broadcast %cst_31 : f32 to vector<8x100xf32>
    %153 = arith.maximumf %151, %152 : vector<8x100xf32>
    %c0_32 = arith.constant 0 : index
    %c0_33 = arith.constant 0 : index
    %154 = vector.load %arg13[%c0_32, %c0_33] : memref<1x100xf32, #tpu.memory_space<vmem>>, vector<1x100xf32>
    %155 = vector.broadcast %154 : vector<1x100xf32> to vector<8x100xf32>
    %156 = arith.mulf %153, %155 : vector<8x100xf32>
    %c0_34 = arith.constant 0 : index
    %c0_35 = arith.constant 0 : index
    %157 = vector.load %arg14[%c0_34, %c0_35] : memref<8x72xbf16, #tpu.memory_space<vmem>>, vector<8x72xbf16>
    %c0_36 = arith.constant 0 : index
    %c0_37 = arith.constant 0 : index
    %158 = vector.load %arg15[%c0_36, %c0_37] : memref<8x1xf32, #tpu.memory_space<vmem>>, vector<8x1xf32>
    %159 = arith.truncf %156 : vector<8x100xf32> to vector<8x100xbf16>
    %160 = vector.extract_strided_slice %159 {offsets = [0, 89], sizes = [8, 11], strides = [1, 1]} : vector<8x100xbf16> to vector<8x11xbf16>
    %161 = vector.extract_strided_slice %159 {offsets = [0, 0], sizes = [8, 89], strides = [1, 1]} : vector<8x100xbf16> to vector<8x89xbf16>
    %162 = tpu.concatenate %160, %161 in 1 : vector<8x11xbf16>, vector<8x89xbf16> -> vector<8x100xbf16>
    %163 = vector.extract_strided_slice %159 {offsets = [0, 90], sizes = [8, 10], strides = [1, 1]} : vector<8x100xbf16> to vector<8x10xbf16>
    %164 = vector.extract_strided_slice %159 {offsets = [0, 0], sizes = [8, 90], strides = [1, 1]} : vector<8x100xbf16> to vector<8x90xbf16>
    %165 = tpu.concatenate %163, %164 in 1 : vector<8x10xbf16>, vector<8x90xbf16> -> vector<8x100xbf16>
    %166 = vector.extract_strided_slice %159 {offsets = [0, 91], sizes = [8, 9], strides = [1, 1]} : vector<8x100xbf16> to vector<8x9xbf16>
    %167 = vector.extract_strided_slice %159 {offsets = [0, 0], sizes = [8, 91], strides = [1, 1]} : vector<8x100xbf16> to vector<8x91xbf16>
    %168 = tpu.concatenate %166, %167 in 1 : vector<8x9xbf16>, vector<8x91xbf16> -> vector<8x100xbf16>
    %169 = vector.extract_strided_slice %159 {offsets = [0, 99], sizes = [8, 1], strides = [1, 1]} : vector<8x100xbf16> to vector<8x1xbf16>
    %170 = vector.extract_strided_slice %159 {offsets = [0, 0], sizes = [8, 99], strides = [1, 1]} : vector<8x100xbf16> to vector<8x99xbf16>
    %171 = tpu.concatenate %169, %170 in 1 : vector<8x1xbf16>, vector<8x99xbf16> -> vector<8x100xbf16>
    %172 = vector.extract_strided_slice %159 {offsets = [0, 1], sizes = [8, 99], strides = [1, 1]} : vector<8x100xbf16> to vector<8x99xbf16>
    %173 = vector.extract_strided_slice %159 {offsets = [0, 0], sizes = [8, 1], strides = [1, 1]} : vector<8x100xbf16> to vector<8x1xbf16>
    %174 = tpu.concatenate %172, %173 in 1 : vector<8x99xbf16>, vector<8x1xbf16> -> vector<8x100xbf16>
    %175 = vector.extract_strided_slice %159 {offsets = [0, 9], sizes = [8, 91], strides = [1, 1]} : vector<8x100xbf16> to vector<8x91xbf16>
    %176 = vector.extract_strided_slice %159 {offsets = [0, 0], sizes = [8, 9], strides = [1, 1]} : vector<8x100xbf16> to vector<8x9xbf16>
    %177 = tpu.concatenate %175, %176 in 1 : vector<8x91xbf16>, vector<8x9xbf16> -> vector<8x100xbf16>
    %178 = vector.extract_strided_slice %159 {offsets = [0, 10], sizes = [8, 90], strides = [1, 1]} : vector<8x100xbf16> to vector<8x90xbf16>
    %179 = vector.extract_strided_slice %159 {offsets = [0, 0], sizes = [8, 10], strides = [1, 1]} : vector<8x100xbf16> to vector<8x10xbf16>
    %180 = tpu.concatenate %178, %179 in 1 : vector<8x90xbf16>, vector<8x10xbf16> -> vector<8x100xbf16>
    %181 = vector.extract_strided_slice %159 {offsets = [0, 11], sizes = [8, 89], strides = [1, 1]} : vector<8x100xbf16> to vector<8x89xbf16>
    %182 = vector.extract_strided_slice %159 {offsets = [0, 0], sizes = [8, 11], strides = [1, 1]} : vector<8x100xbf16> to vector<8x11xbf16>
    %183 = tpu.concatenate %181, %182 in 1 : vector<8x89xbf16>, vector<8x11xbf16> -> vector<8x100xbf16>
    %184 = tpu.concatenate %162, %165, %168, %171, %159, %174, %177, %180, %183 in 0 : vector<8x100xbf16>, vector<8x100xbf16>, vector<8x100xbf16>, vector<8x100xbf16>, vector<8x100xbf16>, vector<8x100xbf16>, vector<8x100xbf16>, vector<8x100xbf16>, vector<8x100xbf16> -> vector<72x100xbf16>
    %cst_38 = arith.constant dense<0.000000e+00> : vector<8x100xf32>
    %185 = tpu.matmul %157, %184, %cst_38 {dimension_numbers = #tpu.dot_dimension_numbers<[1], [0], [0], [1], [0, 0, 1, 1], [], []>} : vector<8x72xbf16>, vector<72x100xbf16>, vector<8x100xf32> -> vector<8x100xf32>
    %186 = vector.broadcast %158 : vector<8x1xf32> to vector<8x100xf32>
    %187 = arith.addf %185, %186 : vector<8x100xf32>
    %cst_39 = arith.constant 0.000000e+00 : f32
    %188 = vector.broadcast %cst_39 : f32 to vector<8x100xf32>
    %189 = arith.maximumf %187, %188 : vector<8x100xf32>
    %190 = vector.extract_strided_slice %189 {offsets = [0, 1], sizes = [8, 99], strides = [1, 1]} : vector<8x100xf32> to vector<8x99xf32>
    %191 = vector.extract_strided_slice %189 {offsets = [0, 0], sizes = [8, 1], strides = [1, 1]} : vector<8x100xf32> to vector<8x1xf32>
    %192 = tpu.concatenate %190, %191 in 1 : vector<8x99xf32>, vector<8x1xf32> -> vector<8x100xf32>
    %193 = arith.maximumf %189, %192 : vector<8x100xf32>
    %194 = vector.extract_strided_slice %189 {offsets = [0, 10], sizes = [8, 90], strides = [1, 1]} : vector<8x100xf32> to vector<8x90xf32>
    %195 = vector.extract_strided_slice %189 {offsets = [0, 0], sizes = [8, 10], strides = [1, 1]} : vector<8x100xf32> to vector<8x10xf32>
    %196 = tpu.concatenate %194, %195 in 1 : vector<8x90xf32>, vector<8x10xf32> -> vector<8x100xf32>
    %197 = vector.extract_strided_slice %189 {offsets = [0, 11], sizes = [8, 89], strides = [1, 1]} : vector<8x100xf32> to vector<8x89xf32>
    %198 = vector.extract_strided_slice %189 {offsets = [0, 0], sizes = [8, 11], strides = [1, 1]} : vector<8x100xf32> to vector<8x11xf32>
    %199 = tpu.concatenate %197, %198 in 1 : vector<8x89xf32>, vector<8x11xf32> -> vector<8x100xf32>
    %200 = arith.maximumf %196, %199 : vector<8x100xf32>
    %201 = arith.maximumf %193, %200 : vector<8x100xf32>
    %c0_40 = arith.constant 0 : index
    %c0_41 = arith.constant 0 : index
    %202 = vector.load %arg16[%c0_40, %c0_41] : memref<100x36xf32, #tpu.memory_space<vmem>>, vector<100x36xf32>
    %cst_42 = arith.constant dense<0.000000e+00> : vector<8x36xf32>
    %203 = tpu.matmul %201, %202, %cst_42 {dimension_numbers = #tpu.dot_dimension_numbers<[1], [0], [0], [1], [0, 0, 1, 1], [], []>} : vector<8x100xf32>, vector<100x36xf32>, vector<8x36xf32> -> vector<8x36xf32>
    %204 = arith.truncf %203 : vector<8x36xf32> to vector<8x36xbf16>
    %c0_43 = arith.constant 0 : index
    %c0_44 = arith.constant 0 : index
    %c0_45 = arith.constant 0 : index
    %205 = vector.load %arg17[%c0_43, %c0_44, %c0_45] : memref<1x8x36xbf16, #tpu.memory_space<vmem>>, vector<1x8x36xbf16>
    %206 = vector.shape_cast %205 : vector<1x8x36xbf16> to vector<8x36xbf16>
    %207 = vector.shape_cast %204 : vector<8x36xbf16> to vector<1x8x36xbf16>
    tpu.vector_store %arg17[%c0_43, %c0_44, %c0_45], %207 {strides = array<i32>} : memref<1x8x36xbf16, #tpu.memory_space<vmem>>, vector<1x8x36xbf16>,
    return
  }
  func.func @transform_0(%arg0: i32) -> (i32, i32, i32) {
    %c0_i32 = arith.constant 0 : i32
    %c0_i32_0 = arith.constant 0 : i32
    %c0_i32_1 = arith.constant 0 : i32
    return %arg0, %c0_i32, %c0_i32_0 : i32, i32, i32
  }
  func.func @transform_1(%arg0: i32) -> (i32, i32) {
    %c0_i32 = arith.constant 0 : i32
    %c0_i32_0 = arith.constant 0 : i32
    %c0_i32_1 = arith.constant 0 : i32
    return %c0_i32, %c0_i32_0 : i32, i32
  }
  func.func @transform_2(%arg0: i32) -> (i32, i32) {
    %c0_i32 = arith.constant 0 : i32
    %c0_i32_0 = arith.constant 0 : i32
    %c0_i32_1 = arith.constant 0 : i32
    return %c0_i32, %c0_i32_0 : i32, i32
  }
  func.func @transform_3(%arg0: i32) -> (i32, i32) {
    %c0_i32 = arith.constant 0 : i32
    %c0_i32_0 = arith.constant 0 : i32
    %c0_i32_1 = arith.constant 0 : i32
    return %c0_i32, %c0_i32_0 : i32, i32
  }
  func.func @transform_4(%arg0: i32) -> (i32, i32) {
    %c0_i32 = arith.constant 0 : i32
    %c0_i32_0 = arith.constant 0 : i32
    %c0_i32_1 = arith.constant 0 : i32
    return %c0_i32, %c0_i32_0 : i32, i32
  }
  func.func @transform_5(%arg0: i32) -> (i32, i32) {
    %c0_i32 = arith.constant 0 : i32
    %c0_i32_0 = arith.constant 0 : i32
    %c0_i32_1 = arith.constant 0 : i32
    return %c0_i32, %c0_i32_0 : i32, i32
  }
  func.func @transform_6(%arg0: i32) -> (i32, i32) {
    %c0_i32 = arith.constant 0 : i32
    %c0_i32_0 = arith.constant 0 : i32
    %c0_i32_1 = arith.constant 0 : i32
    return %c0_i32, %c0_i32_0 : i32, i32
  }
  func.func @transform_7(%arg0: i32) -> (i32, i32) {
    %c0_i32 = arith.constant 0 : i32
    %c0_i32_0 = arith.constant 0 : i32
    %c0_i32_1 = arith.constant 0 : i32
    return %c0_i32, %c0_i32_0 : i32, i32
  }
  func.func @transform_8(%arg0: i32) -> (i32, i32) {
    %c0_i32 = arith.constant 0 : i32
    %c0_i32_0 = arith.constant 0 : i32
    %c0_i32_1 = arith.constant 0 : i32
    return %c0_i32, %c0_i32_0 : i32, i32
  }
  func.func @transform_9(%arg0: i32) -> (i32, i32) {
    %c0_i32 = arith.constant 0 : i32
    %c0_i32_0 = arith.constant 0 : i32
    %c0_i32_1 = arith.constant 0 : i32
    return %c0_i32, %c0_i32_0 : i32, i32
  }
  func.func @transform_10(%arg0: i32) -> (i32, i32) {
    %c0_i32 = arith.constant 0 : i32
    %c0_i32_0 = arith.constant 0 : i32
    %c0_i32_1 = arith.constant 0 : i32
    return %c0_i32, %c0_i32_0 : i32, i32
  }
  func.func @transform_11(%arg0: i32) -> (i32, i32) {
    %c0_i32 = arith.constant 0 : i32
    %c0_i32_0 = arith.constant 0 : i32
    %c0_i32_1 = arith.constant 0 : i32
    return %c0_i32, %c0_i32_0 : i32, i32
  }
  func.func @transform_12(%arg0: i32) -> (i32, i32) {
    %c0_i32 = arith.constant 0 : i32
    %c0_i32_0 = arith.constant 0 : i32
    %c0_i32_1 = arith.constant 0 : i32
    return %c0_i32, %c0_i32_0 : i32, i32
  }
  func.func @transform_13(%arg0: i32) -> (i32, i32) {
    %c0_i32 = arith.constant 0 : i32
    %c0_i32_0 = arith.constant 0 : i32
    %c0_i32_1 = arith.constant 0 : i32
    return %c0_i32, %c0_i32_0 : i32, i32
  }
  func.func @transform_14(%arg0: i32) -> (i32, i32) {
    %c0_i32 = arith.constant 0 : i32
    %c0_i32_0 = arith.constant 0 : i32
    %c0_i32_1 = arith.constant 0 : i32
    return %c0_i32, %c0_i32_0 : i32, i32
  }
  func.func @transform_15(%arg0: i32) -> (i32, i32) {
    %c0_i32 = arith.constant 0 : i32
    %c0_i32_0 = arith.constant 0 : i32
    %c0_i32_1 = arith.constant 0 : i32
    return %c0_i32, %c0_i32_0 : i32, i32
  }
  func.func @transform_16(%arg0: i32) -> (i32, i32, i32) {
    %c0_i32 = arith.constant 0 : i32
    %c0_i32_0 = arith.constant 0 : i32
    %c0_i32_1 = arith.constant 0 : i32
    return %arg0, %c0_i32, %c0_i32_0 : i32, i32, i32
  }
}

module attributes {stable_mosaic.version = 11 : i64} {
  func.func @kernel(%arg0: i32, %arg1: memref<1x8x36xbf16, #tpu.memory_space<vmem>>, %arg2: memref<1x8x36xbf16, #tpu.memory_space<vmem>>, %arg3: memref<8x8xbf16, #tpu.memory_space<vmem>>, %arg4: memref<8x8xbf16, #tpu.memory_space<vmem>>, %arg5: memref<8x1xf32, #tpu.memory_space<vmem>>, %arg6: memref<36x64xf32, #tpu.memory_space<vmem>>, %arg7: memref<8x8xbf16, #tpu.memory_space<vmem>>, %arg8: memref<8x1xf32, #tpu.memory_space<vmem>>, %arg9: memref<64x100xf32, #tpu.memory_space<vmem>>, %arg10: memref<16x72xbf16, #tpu.memory_space<vmem>>, %arg11: memref<16x1xf32, #tpu.memory_space<vmem>>, %arg12: memref<1x100xf32, #tpu.memory_space<vmem>>, %arg13: memref<16x144xbf16, #tpu.memory_space<vmem>>, %arg14: memref<16x1xf32, #tpu.memory_space<vmem>>, %arg15: memref<100x36xf32, #tpu.memory_space<vmem>>, %arg16: memref<36x16xf32, #tpu.memory_space<vmem>>, %arg17: memref<1x16x16xf32, #tpu.memory_space<vmem>>) attributes {dimension_semantics = [#tpu.dimension_semantics<parallel>], iteration_bounds = array<i64: 2>, scalar_prefetch = 0 : i64, scratch_operands = 0 : i64, tpu.core_type = #tpu.core_type<tc>, window_params = [{transform_indices = @transform_0, window_bounds = array<i64: 1, 8, 36>}, {transform_indices = @transform_1, window_bounds = array<i64: 1, 8, 36>}, {pipeline_mode = #tpu.pipeline_mode<synchronous>, transform_indices = @transform_2, window_bounds = array<i64: 8, 8>}, {pipeline_mode = #tpu.pipeline_mode<synchronous>, transform_indices = @transform_3, window_bounds = array<i64: 8, 8>}, {pipeline_mode = #tpu.pipeline_mode<synchronous>, transform_indices = @transform_4, window_bounds = array<i64: 8, 1>}, {pipeline_mode = #tpu.pipeline_mode<synchronous>, transform_indices = @transform_5, window_bounds = array<i64: 36, 64>}, {pipeline_mode = #tpu.pipeline_mode<synchronous>, transform_indices = @transform_6, window_bounds = array<i64: 8, 8>}, {pipeline_mode = #tpu.pipeline_mode<synchronous>, transform_indices = @transform_7, window_bounds = array<i64: 8, 1>}, {pipeline_mode = #tpu.pipeline_mode<synchronous>, transform_indices = @transform_8, window_bounds = array<i64: 64, 100>}, {pipeline_mode = #tpu.pipeline_mode<synchronous>, transform_indices = @transform_9, window_bounds = array<i64: 16, 72>}, {pipeline_mode = #tpu.pipeline_mode<synchronous>, transform_indices = @transform_10, window_bounds = array<i64: 16, 1>}, {pipeline_mode = #tpu.pipeline_mode<synchronous>, transform_indices = @transform_11, window_bounds = array<i64: 1, 100>}, {pipeline_mode = #tpu.pipeline_mode<synchronous>, transform_indices = @transform_12, window_bounds = array<i64: 16, 144>}, {pipeline_mode = #tpu.pipeline_mode<synchronous>, transform_indices = @transform_13, window_bounds = array<i64: 16, 1>}, {pipeline_mode = #tpu.pipeline_mode<synchronous>, transform_indices = @transform_14, window_bounds = array<i64: 100, 36>}, {pipeline_mode = #tpu.pipeline_mode<synchronous>, transform_indices = @transform_15, window_bounds = array<i64: 36, 16>}, {transform_indices = @transform_16, window_bounds = array<i64: 1, 16, 16>}]} {
    %c0 = arith.constant 0 : index
    %c0_0 = arith.constant 0 : index
    %c0_1 = arith.constant 0 : index
    %0 = vector.load %arg1[%c0, %c0_0, %c0_1] : memref<1x8x36xbf16, #tpu.memory_space<vmem>>, vector<1x8x36xbf16>
    %1 = vector.shape_cast %0 : vector<1x8x36xbf16> to vector<8x36xbf16>
    %c0_2 = arith.constant 0 : index
    %c0_3 = arith.constant 0 : index
    %c0_4 = arith.constant 0 : index
    %2 = vector.load %arg2[%c0_2, %c0_3, %c0_4] : memref<1x8x36xbf16, #tpu.memory_space<vmem>>, vector<1x8x36xbf16>
    %3 = vector.shape_cast %2 : vector<1x8x36xbf16> to vector<8x36xbf16>
    %c0_5 = arith.constant 0 : index
    %c0_6 = arith.constant 0 : index
    %4 = vector.load %arg3[%c0_5, %c0_6] : memref<8x8xbf16, #tpu.memory_space<vmem>>, vector<8x8xbf16>
    %c0_7 = arith.constant 0 : index
    %c0_8 = arith.constant 0 : index
    %5 = vector.load %arg4[%c0_7, %c0_8] : memref<8x8xbf16, #tpu.memory_space<vmem>>, vector<8x8xbf16>
    %c0_9 = arith.constant 0 : index
    %c0_10 = arith.constant 0 : index
    %6 = vector.load %arg5[%c0_9, %c0_10] : memref<8x1xf32, #tpu.memory_space<vmem>>, vector<8x1xf32>
    %cst = arith.constant dense<0.000000e+00> : vector<8x36xf32>
    %7 = tpu.matmul %4, %1, %cst {dimension_numbers = #tpu.dot_dimension_numbers<[1], [0], [0], [1], [0, 0, 1, 1], [], []>} : vector<8x8xbf16>, vector<8x36xbf16>, vector<8x36xf32> -> vector<8x36xf32>
    %cst_11 = arith.constant dense<0.000000e+00> : vector<8x36xf32>
    %8 = tpu.matmul %5, %3, %cst_11 {dimension_numbers = #tpu.dot_dimension_numbers<[1], [0], [0], [1], [0, 0, 1, 1], [], []>} : vector<8x8xbf16>, vector<8x36xbf16>, vector<8x36xf32> -> vector<8x36xf32>
    %9 = arith.addf %7, %8 : vector<8x36xf32>
    %10 = vector.broadcast %6 : vector<8x1xf32> to vector<8x36xf32>
    %11 = arith.addf %9, %10 : vector<8x36xf32>
    %cst_12 = arith.constant 0.000000e+00 : f32
    %12 = vector.broadcast %cst_12 : f32 to vector<8x36xf32>
    %13 = arith.maximumf %11, %12 : vector<8x36xf32>
    %c0_13 = arith.constant 0 : index
    %c0_14 = arith.constant 0 : index
    %14 = vector.load %arg6[%c0_13, %c0_14] : memref<36x64xf32, #tpu.memory_space<vmem>>, vector<36x64xf32>
    %cst_15 = arith.constant dense<0.000000e+00> : vector<8x64xf32>
    %15 = tpu.matmul %13, %14, %cst_15 {dimension_numbers = #tpu.dot_dimension_numbers<[1], [0], [0], [1], [0, 0, 1, 1], [], []>} : vector<8x36xf32>, vector<36x64xf32>, vector<8x64xf32> -> vector<8x64xf32>
    %c0_16 = arith.constant 0 : index
    %c0_17 = arith.constant 0 : index
    %16 = vector.load %arg7[%c0_16, %c0_17] : memref<8x8xbf16, #tpu.memory_space<vmem>>, vector<8x8xbf16>
    %c0_18 = arith.constant 0 : index
    %c0_19 = arith.constant 0 : index
    %17 = vector.load %arg8[%c0_18, %c0_19] : memref<8x1xf32, #tpu.memory_space<vmem>>, vector<8x1xf32>
    %18 = arith.truncf %15 : vector<8x64xf32> to vector<8x64xbf16>
    %cst_20 = arith.constant dense<0.000000e+00> : vector<8x64xf32>
    %19 = tpu.matmul %16, %18, %cst_20 {dimension_numbers = #tpu.dot_dimension_numbers<[1], [0], [0], [1], [0, 0, 1, 1], [], []>} : vector<8x8xbf16>, vector<8x64xbf16>, vector<8x64xf32> -> vector<8x64xf32>
    %20 = vector.broadcast %17 : vector<8x1xf32> to vector<8x64xf32>
    %21 = arith.addf %19, %20 : vector<8x64xf32>
    %cst_21 = arith.constant 0.000000e+00 : f32
    %22 = vector.broadcast %cst_21 : f32 to vector<8x64xf32>
    %23 = arith.maximumf %21, %22 : vector<8x64xf32>
    %c0_22 = arith.constant 0 : index
    %c0_23 = arith.constant 0 : index
    %24 = vector.load %arg9[%c0_22, %c0_23] : memref<64x100xf32, #tpu.memory_space<vmem>>, vector<64x100xf32>
    %cst_24 = arith.constant dense<0.000000e+00> : vector<8x100xf32>
    %25 = tpu.matmul %23, %24, %cst_24 {dimension_numbers = #tpu.dot_dimension_numbers<[1], [0], [0], [1], [0, 0, 1, 1], [], []>} : vector<8x64xf32>, vector<64x100xf32>, vector<8x100xf32> -> vector<8x100xf32>
    %c0_25 = arith.constant 0 : index
    %c0_26 = arith.constant 0 : index
    %26 = vector.load %arg10[%c0_25, %c0_26] : memref<16x72xbf16, #tpu.memory_space<vmem>>, vector<16x72xbf16>
    %c0_27 = arith.constant 0 : index
    %c0_28 = arith.constant 0 : index
    %27 = vector.load %arg11[%c0_27, %c0_28] : memref<16x1xf32, #tpu.memory_space<vmem>>, vector<16x1xf32>
    %28 = arith.truncf %25 : vector<8x100xf32> to vector<8x100xbf16>
    %29 = vector.extract_strided_slice %28 {offsets = [0, 89], sizes = [8, 11], strides = [1, 1]} : vector<8x100xbf16> to vector<8x11xbf16>
    %30 = vector.extract_strided_slice %28 {offsets = [0, 0], sizes = [8, 89], strides = [1, 1]} : vector<8x100xbf16> to vector<8x89xbf16>
    %31 = tpu.concatenate %29, %30 in 1 : vector<8x11xbf16>, vector<8x89xbf16> -> vector<8x100xbf16>
    %32 = vector.extract_strided_slice %28 {offsets = [0, 90], sizes = [8, 10], strides = [1, 1]} : vector<8x100xbf16> to vector<8x10xbf16>
    %33 = vector.extract_strided_slice %28 {offsets = [0, 0], sizes = [8, 90], strides = [1, 1]} : vector<8x100xbf16> to vector<8x90xbf16>
    %34 = tpu.concatenate %32, %33 in 1 : vector<8x10xbf16>, vector<8x90xbf16> -> vector<8x100xbf16>
    %35 = vector.extract_strided_slice %28 {offsets = [0, 91], sizes = [8, 9], strides = [1, 1]} : vector<8x100xbf16> to vector<8x9xbf16>
    %36 = vector.extract_strided_slice %28 {offsets = [0, 0], sizes = [8, 91], strides = [1, 1]} : vector<8x100xbf16> to vector<8x91xbf16>
    %37 = tpu.concatenate %35, %36 in 1 : vector<8x9xbf16>, vector<8x91xbf16> -> vector<8x100xbf16>
    %38 = vector.extract_strided_slice %28 {offsets = [0, 99], sizes = [8, 1], strides = [1, 1]} : vector<8x100xbf16> to vector<8x1xbf16>
    %39 = vector.extract_strided_slice %28 {offsets = [0, 0], sizes = [8, 99], strides = [1, 1]} : vector<8x100xbf16> to vector<8x99xbf16>
    %40 = tpu.concatenate %38, %39 in 1 : vector<8x1xbf16>, vector<8x99xbf16> -> vector<8x100xbf16>
    %41 = vector.extract_strided_slice %28 {offsets = [0, 1], sizes = [8, 99], strides = [1, 1]} : vector<8x100xbf16> to vector<8x99xbf16>
    %42 = vector.extract_strided_slice %28 {offsets = [0, 0], sizes = [8, 1], strides = [1, 1]} : vector<8x100xbf16> to vector<8x1xbf16>
    %43 = tpu.concatenate %41, %42 in 1 : vector<8x99xbf16>, vector<8x1xbf16> -> vector<8x100xbf16>
    %44 = vector.extract_strided_slice %28 {offsets = [0, 9], sizes = [8, 91], strides = [1, 1]} : vector<8x100xbf16> to vector<8x91xbf16>
    %45 = vector.extract_strided_slice %28 {offsets = [0, 0], sizes = [8, 9], strides = [1, 1]} : vector<8x100xbf16> to vector<8x9xbf16>
    %46 = tpu.concatenate %44, %45 in 1 : vector<8x91xbf16>, vector<8x9xbf16> -> vector<8x100xbf16>
    %47 = vector.extract_strided_slice %28 {offsets = [0, 10], sizes = [8, 90], strides = [1, 1]} : vector<8x100xbf16> to vector<8x90xbf16>
    %48 = vector.extract_strided_slice %28 {offsets = [0, 0], sizes = [8, 10], strides = [1, 1]} : vector<8x100xbf16> to vector<8x10xbf16>
    %49 = tpu.concatenate %47, %48 in 1 : vector<8x90xbf16>, vector<8x10xbf16> -> vector<8x100xbf16>
    %50 = vector.extract_strided_slice %28 {offsets = [0, 11], sizes = [8, 89], strides = [1, 1]} : vector<8x100xbf16> to vector<8x89xbf16>
    %51 = vector.extract_strided_slice %28 {offsets = [0, 0], sizes = [8, 11], strides = [1, 1]} : vector<8x100xbf16> to vector<8x11xbf16>
    %52 = tpu.concatenate %50, %51 in 1 : vector<8x89xbf16>, vector<8x11xbf16> -> vector<8x100xbf16>
    %53 = tpu.concatenate %31, %34, %37, %40, %28, %43, %46, %49, %52 in 0 : vector<8x100xbf16>, vector<8x100xbf16>, vector<8x100xbf16>, vector<8x100xbf16>, vector<8x100xbf16>, vector<8x100xbf16>, vector<8x100xbf16>, vector<8x100xbf16>, vector<8x100xbf16> -> vector<72x100xbf16>
    %cst_29 = arith.constant dense<0.000000e+00> : vector<16x100xf32>
    %54 = tpu.matmul %26, %53, %cst_29 {dimension_numbers = #tpu.dot_dimension_numbers<[1], [0], [0], [1], [0, 0, 1, 1], [], []>} : vector<16x72xbf16>, vector<72x100xbf16>, vector<16x100xf32> -> vector<16x100xf32>
    %55 = vector.broadcast %27 : vector<16x1xf32> to vector<16x100xf32>
    %56 = arith.addf %54, %55 : vector<16x100xf32>
    %cst_30 = arith.constant 0.000000e+00 : f32
    %57 = vector.broadcast %cst_30 : f32 to vector<16x100xf32>
    %58 = arith.maximumf %56, %57 : vector<16x100xf32>
    %c0_31 = arith.constant 0 : index
    %c0_32 = arith.constant 0 : index
    %59 = vector.load %arg12[%c0_31, %c0_32] : memref<1x100xf32, #tpu.memory_space<vmem>>, vector<1x100xf32>
    %60 = vector.broadcast %59 : vector<1x100xf32> to vector<16x100xf32>
    %61 = arith.mulf %58, %60 : vector<16x100xf32>
    %c0_33 = arith.constant 0 : index
    %c0_34 = arith.constant 0 : index
    %62 = vector.load %arg13[%c0_33, %c0_34] : memref<16x144xbf16, #tpu.memory_space<vmem>>, vector<16x144xbf16>
    %c0_35 = arith.constant 0 : index
    %c0_36 = arith.constant 0 : index
    %63 = vector.load %arg14[%c0_35, %c0_36] : memref<16x1xf32, #tpu.memory_space<vmem>>, vector<16x1xf32>
    %64 = arith.truncf %61 : vector<16x100xf32> to vector<16x100xbf16>
    %65 = vector.extract_strided_slice %64 {offsets = [0, 89], sizes = [16, 11], strides = [1, 1]} : vector<16x100xbf16> to vector<16x11xbf16>
    %66 = vector.extract_strided_slice %64 {offsets = [0, 0], sizes = [16, 89], strides = [1, 1]} : vector<16x100xbf16> to vector<16x89xbf16>
    %67 = tpu.concatenate %65, %66 in 1 : vector<16x11xbf16>, vector<16x89xbf16> -> vector<16x100xbf16>
    %68 = vector.extract_strided_slice %64 {offsets = [0, 90], sizes = [16, 10], strides = [1, 1]} : vector<16x100xbf16> to vector<16x10xbf16>
    %69 = vector.extract_strided_slice %64 {offsets = [0, 0], sizes = [16, 90], strides = [1, 1]} : vector<16x100xbf16> to vector<16x90xbf16>
    %70 = tpu.concatenate %68, %69 in 1 : vector<16x10xbf16>, vector<16x90xbf16> -> vector<16x100xbf16>
    %71 = vector.extract_strided_slice %64 {offsets = [0, 91], sizes = [16, 9], strides = [1, 1]} : vector<16x100xbf16> to vector<16x9xbf16>
    %72 = vector.extract_strided_slice %64 {offsets = [0, 0], sizes = [16, 91], strides = [1, 1]} : vector<16x100xbf16> to vector<16x91xbf16>
    %73 = tpu.concatenate %71, %72 in 1 : vector<16x9xbf16>, vector<16x91xbf16> -> vector<16x100xbf16>
    %74 = vector.extract_strided_slice %64 {offsets = [0, 99], sizes = [16, 1], strides = [1, 1]} : vector<16x100xbf16> to vector<16x1xbf16>
    %75 = vector.extract_strided_slice %64 {offsets = [0, 0], sizes = [16, 99], strides = [1, 1]} : vector<16x100xbf16> to vector<16x99xbf16>
    %76 = tpu.concatenate %74, %75 in 1 : vector<16x1xbf16>, vector<16x99xbf16> -> vector<16x100xbf16>
    %77 = vector.extract_strided_slice %64 {offsets = [0, 1], sizes = [16, 99], strides = [1, 1]} : vector<16x100xbf16> to vector<16x99xbf16>
    %78 = vector.extract_strided_slice %64 {offsets = [0, 0], sizes = [16, 1], strides = [1, 1]} : vector<16x100xbf16> to vector<16x1xbf16>
    %79 = tpu.concatenate %77, %78 in 1 : vector<16x99xbf16>, vector<16x1xbf16> -> vector<16x100xbf16>
    %80 = vector.extract_strided_slice %64 {offsets = [0, 9], sizes = [16, 91], strides = [1, 1]} : vector<16x100xbf16> to vector<16x91xbf16>
    %81 = vector.extract_strided_slice %64 {offsets = [0, 0], sizes = [16, 9], strides = [1, 1]} : vector<16x100xbf16> to vector<16x9xbf16>
    %82 = tpu.concatenate %80, %81 in 1 : vector<16x91xbf16>, vector<16x9xbf16> -> vector<16x100xbf16>
    %83 = vector.extract_strided_slice %64 {offsets = [0, 10], sizes = [16, 90], strides = [1, 1]} : vector<16x100xbf16> to vector<16x90xbf16>
    %84 = vector.extract_strided_slice %64 {offsets = [0, 0], sizes = [16, 10], strides = [1, 1]} : vector<16x100xbf16> to vector<16x10xbf16>
    %85 = tpu.concatenate %83, %84 in 1 : vector<16x90xbf16>, vector<16x10xbf16> -> vector<16x100xbf16>
    %86 = vector.extract_strided_slice %64 {offsets = [0, 11], sizes = [16, 89], strides = [1, 1]} : vector<16x100xbf16> to vector<16x89xbf16>
    %87 = vector.extract_strided_slice %64 {offsets = [0, 0], sizes = [16, 11], strides = [1, 1]} : vector<16x100xbf16> to vector<16x11xbf16>
    %88 = tpu.concatenate %86, %87 in 1 : vector<16x89xbf16>, vector<16x11xbf16> -> vector<16x100xbf16>
    %89 = tpu.concatenate %67, %70, %73, %76, %64, %79, %82, %85, %88 in 0 : vector<16x100xbf16>, vector<16x100xbf16>, vector<16x100xbf16>, vector<16x100xbf16>, vector<16x100xbf16>, vector<16x100xbf16>, vector<16x100xbf16>, vector<16x100xbf16>, vector<16x100xbf16> -> vector<144x100xbf16>
    %cst_37 = arith.constant dense<0.000000e+00> : vector<16x100xf32>
    %90 = tpu.matmul %62, %89, %cst_37 {dimension_numbers = #tpu.dot_dimension_numbers<[1], [0], [0], [1], [0, 0, 1, 1], [], []>} : vector<16x144xbf16>, vector<144x100xbf16>, vector<16x100xf32> -> vector<16x100xf32>
    %91 = vector.broadcast %63 : vector<16x1xf32> to vector<16x100xf32>
    %92 = arith.addf %90, %91 : vector<16x100xf32>
    %cst_38 = arith.constant 0.000000e+00 : f32
    %93 = vector.broadcast %cst_38 : f32 to vector<16x100xf32>
    %94 = arith.maximumf %92, %93 : vector<16x100xf32>
    %95 = vector.extract_strided_slice %94 {offsets = [0, 1], sizes = [16, 99], strides = [1, 1]} : vector<16x100xf32> to vector<16x99xf32>
    %96 = vector.extract_strided_slice %94 {offsets = [0, 0], sizes = [16, 1], strides = [1, 1]} : vector<16x100xf32> to vector<16x1xf32>
    %97 = tpu.concatenate %95, %96 in 1 : vector<16x99xf32>, vector<16x1xf32> -> vector<16x100xf32>
    %98 = arith.maximumf %94, %97 : vector<16x100xf32>
    %99 = vector.extract_strided_slice %94 {offsets = [0, 10], sizes = [16, 90], strides = [1, 1]} : vector<16x100xf32> to vector<16x90xf32>
    %100 = vector.extract_strided_slice %94 {offsets = [0, 0], sizes = [16, 10], strides = [1, 1]} : vector<16x100xf32> to vector<16x10xf32>
    %101 = tpu.concatenate %99, %100 in 1 : vector<16x90xf32>, vector<16x10xf32> -> vector<16x100xf32>
    %102 = vector.extract_strided_slice %94 {offsets = [0, 11], sizes = [16, 89], strides = [1, 1]} : vector<16x100xf32> to vector<16x89xf32>
    %103 = vector.extract_strided_slice %94 {offsets = [0, 0], sizes = [16, 11], strides = [1, 1]} : vector<16x100xf32> to vector<16x11xf32>
    %104 = tpu.concatenate %102, %103 in 1 : vector<16x89xf32>, vector<16x11xf32> -> vector<16x100xf32>
    %105 = arith.maximumf %101, %104 : vector<16x100xf32>
    %106 = arith.maximumf %98, %105 : vector<16x100xf32>
    %c0_39 = arith.constant 0 : index
    %c0_40 = arith.constant 0 : index
    %107 = vector.load %arg15[%c0_39, %c0_40] : memref<100x36xf32, #tpu.memory_space<vmem>>, vector<100x36xf32>
    %cst_41 = arith.constant dense<0.000000e+00> : vector<16x36xf32>
    %108 = tpu.matmul %106, %107, %cst_41 {dimension_numbers = #tpu.dot_dimension_numbers<[1], [0], [0], [1], [0, 0, 1, 1], [], []>} : vector<16x100xf32>, vector<100x36xf32>, vector<16x36xf32> -> vector<16x36xf32>
    %109 = vector.extract_strided_slice %108 {offsets = [0, 29], sizes = [16, 7], strides = [1, 1]} : vector<16x36xf32> to vector<16x7xf32>
    %110 = vector.extract_strided_slice %108 {offsets = [0, 0], sizes = [16, 29], strides = [1, 1]} : vector<16x36xf32> to vector<16x29xf32>
    %111 = tpu.concatenate %109, %110 in 1 : vector<16x7xf32>, vector<16x29xf32> -> vector<16x36xf32>
    %112 = arith.maximumf %108, %111 : vector<16x36xf32>
    %113 = vector.extract_strided_slice %108 {offsets = [0, 30], sizes = [16, 6], strides = [1, 1]} : vector<16x36xf32> to vector<16x6xf32>
    %114 = vector.extract_strided_slice %108 {offsets = [0, 0], sizes = [16, 30], strides = [1, 1]} : vector<16x36xf32> to vector<16x30xf32>
    %115 = tpu.concatenate %113, %114 in 1 : vector<16x6xf32>, vector<16x30xf32> -> vector<16x36xf32>
    %116 = arith.maximumf %112, %115 : vector<16x36xf32>
    %117 = vector.extract_strided_slice %108 {offsets = [0, 31], sizes = [16, 5], strides = [1, 1]} : vector<16x36xf32> to vector<16x5xf32>
    %118 = vector.extract_strided_slice %108 {offsets = [0, 0], sizes = [16, 31], strides = [1, 1]} : vector<16x36xf32> to vector<16x31xf32>
    %119 = tpu.concatenate %117, %118 in 1 : vector<16x5xf32>, vector<16x31xf32> -> vector<16x36xf32>
    %120 = arith.maximumf %116, %119 : vector<16x36xf32>
    %121 = vector.extract_strided_slice %108 {offsets = [0, 35], sizes = [16, 1], strides = [1, 1]} : vector<16x36xf32> to vector<16x1xf32>
    %122 = vector.extract_strided_slice %108 {offsets = [0, 0], sizes = [16, 35], strides = [1, 1]} : vector<16x36xf32> to vector<16x35xf32>
    %123 = tpu.concatenate %121, %122 in 1 : vector<16x1xf32>, vector<16x35xf32> -> vector<16x36xf32>
    %124 = arith.maximumf %120, %123 : vector<16x36xf32>
    %125 = vector.extract_strided_slice %108 {offsets = [0, 1], sizes = [16, 35], strides = [1, 1]} : vector<16x36xf32> to vector<16x35xf32>
    %126 = vector.extract_strided_slice %108 {offsets = [0, 0], sizes = [16, 1], strides = [1, 1]} : vector<16x36xf32> to vector<16x1xf32>
    %127 = tpu.concatenate %125, %126 in 1 : vector<16x35xf32>, vector<16x1xf32> -> vector<16x36xf32>
    %128 = arith.maximumf %124, %127 : vector<16x36xf32>
    %129 = vector.extract_strided_slice %108 {offsets = [0, 5], sizes = [16, 31], strides = [1, 1]} : vector<16x36xf32> to vector<16x31xf32>
    %130 = vector.extract_strided_slice %108 {offsets = [0, 0], sizes = [16, 5], strides = [1, 1]} : vector<16x36xf32> to vector<16x5xf32>
    %131 = tpu.concatenate %129, %130 in 1 : vector<16x31xf32>, vector<16x5xf32> -> vector<16x36xf32>
    %132 = arith.maximumf %128, %131 : vector<16x36xf32>
    %133 = vector.extract_strided_slice %108 {offsets = [0, 6], sizes = [16, 30], strides = [1, 1]} : vector<16x36xf32> to vector<16x30xf32>
    %134 = vector.extract_strided_slice %108 {offsets = [0, 0], sizes = [16, 6], strides = [1, 1]} : vector<16x36xf32> to vector<16x6xf32>
    %135 = tpu.concatenate %133, %134 in 1 : vector<16x30xf32>, vector<16x6xf32> -> vector<16x36xf32>
    %136 = arith.maximumf %132, %135 : vector<16x36xf32>
    %137 = vector.extract_strided_slice %108 {offsets = [0, 7], sizes = [16, 29], strides = [1, 1]} : vector<16x36xf32> to vector<16x29xf32>
    %138 = vector.extract_strided_slice %108 {offsets = [0, 0], sizes = [16, 7], strides = [1, 1]} : vector<16x36xf32> to vector<16x7xf32>
    %139 = tpu.concatenate %137, %138 in 1 : vector<16x29xf32>, vector<16x7xf32> -> vector<16x36xf32>
    %140 = arith.maximumf %136, %139 : vector<16x36xf32>
    %c0_42 = arith.constant 0 : index
    %c0_43 = arith.constant 0 : index
    %141 = vector.load %arg16[%c0_42, %c0_43] : memref<36x16xf32, #tpu.memory_space<vmem>>, vector<36x16xf32>
    %cst_44 = arith.constant dense<0.000000e+00> : vector<16x16xf32>
    %142 = tpu.matmul %140, %141, %cst_44 {dimension_numbers = #tpu.dot_dimension_numbers<[1], [0], [0], [1], [0, 0, 1, 1], [], []>} : vector<16x36xf32>, vector<36x16xf32>, vector<16x16xf32> -> vector<16x16xf32>
    %c0_45 = arith.constant 0 : index
    %c0_46 = arith.constant 0 : index
    %c0_47 = arith.constant 0 : index
    %143 = vector.load %arg17[%c0_45, %c0_46, %c0_47] : memref<1x16x16xf32, #tpu.memory_space<vmem>>, vector<1x16x16xf32>
    %144 = vector.shape_cast %143 : vector<1x16x16xf32> to vector<16x16xf32>
    %145 = vector.shape_cast %142 : vector<16x16xf32> to vector<1x16x16xf32>
    tpu.vector_store %arg17[%c0_45, %c0_46, %c0_47], %145 {strides = array<i32>} : memref<1x16x16xf32, #tpu.memory_space<vmem>>, vector<1x16x16xf32>,
    return
  }
  func.func @transform_0(%arg0: i32) -> (i32, i32, i32) {
    %c0_i32 = arith.constant 0 : i32
    %c0_i32_0 = arith.constant 0 : i32
    %c0_i32_1 = arith.constant 0 : i32
    return %arg0, %c0_i32, %c0_i32_0 : i32, i32, i32
  }
  func.func @transform_1(%arg0: i32) -> (i32, i32, i32) {
    %c0_i32 = arith.constant 0 : i32
    %c0_i32_0 = arith.constant 0 : i32
    %c0_i32_1 = arith.constant 0 : i32
    return %arg0, %c0_i32, %c0_i32_0 : i32, i32, i32
  }
  func.func @transform_2(%arg0: i32) -> (i32, i32) {
    %c0_i32 = arith.constant 0 : i32
    %c0_i32_0 = arith.constant 0 : i32
    %c0_i32_1 = arith.constant 0 : i32
    return %c0_i32, %c0_i32_0 : i32, i32
  }
  func.func @transform_3(%arg0: i32) -> (i32, i32) {
    %c0_i32 = arith.constant 0 : i32
    %c0_i32_0 = arith.constant 0 : i32
    %c0_i32_1 = arith.constant 0 : i32
    return %c0_i32, %c0_i32_0 : i32, i32
  }
  func.func @transform_4(%arg0: i32) -> (i32, i32) {
    %c0_i32 = arith.constant 0 : i32
    %c0_i32_0 = arith.constant 0 : i32
    %c0_i32_1 = arith.constant 0 : i32
    return %c0_i32, %c0_i32_0 : i32, i32
  }
  func.func @transform_5(%arg0: i32) -> (i32, i32) {
    %c0_i32 = arith.constant 0 : i32
    %c0_i32_0 = arith.constant 0 : i32
    %c0_i32_1 = arith.constant 0 : i32
    return %c0_i32, %c0_i32_0 : i32, i32
  }
  func.func @transform_6(%arg0: i32) -> (i32, i32) {
    %c0_i32 = arith.constant 0 : i32
    %c0_i32_0 = arith.constant 0 : i32
    %c0_i32_1 = arith.constant 0 : i32
    return %c0_i32, %c0_i32_0 : i32, i32
  }
  func.func @transform_7(%arg0: i32) -> (i32, i32) {
    %c0_i32 = arith.constant 0 : i32
    %c0_i32_0 = arith.constant 0 : i32
    %c0_i32_1 = arith.constant 0 : i32
    return %c0_i32, %c0_i32_0 : i32, i32
  }
  func.func @transform_8(%arg0: i32) -> (i32, i32) {
    %c0_i32 = arith.constant 0 : i32
    %c0_i32_0 = arith.constant 0 : i32
    %c0_i32_1 = arith.constant 0 : i32
    return %c0_i32, %c0_i32_0 : i32, i32
  }
  func.func @transform_9(%arg0: i32) -> (i32, i32) {
    %c0_i32 = arith.constant 0 : i32
    %c0_i32_0 = arith.constant 0 : i32
    %c0_i32_1 = arith.constant 0 : i32
    return %c0_i32, %c0_i32_0 : i32, i32
  }
  func.func @transform_10(%arg0: i32) -> (i32, i32) {
    %c0_i32 = arith.constant 0 : i32
    %c0_i32_0 = arith.constant 0 : i32
    %c0_i32_1 = arith.constant 0 : i32
    return %c0_i32, %c0_i32_0 : i32, i32
  }
  func.func @transform_11(%arg0: i32) -> (i32, i32) {
    %c0_i32 = arith.constant 0 : i32
    %c0_i32_0 = arith.constant 0 : i32
    %c0_i32_1 = arith.constant 0 : i32
    return %c0_i32, %c0_i32_0 : i32, i32
  }
  func.func @transform_12(%arg0: i32) -> (i32, i32) {
    %c0_i32 = arith.constant 0 : i32
    %c0_i32_0 = arith.constant 0 : i32
    %c0_i32_1 = arith.constant 0 : i32
    return %c0_i32, %c0_i32_0 : i32, i32
  }
  func.func @transform_13(%arg0: i32) -> (i32, i32) {
    %c0_i32 = arith.constant 0 : i32
    %c0_i32_0 = arith.constant 0 : i32
    %c0_i32_1 = arith.constant 0 : i32
    return %c0_i32, %c0_i32_0 : i32, i32
  }
  func.func @transform_14(%arg0: i32) -> (i32, i32) {
    %c0_i32 = arith.constant 0 : i32
    %c0_i32_0 = arith.constant 0 : i32
    %c0_i32_1 = arith.constant 0 : i32
    return %c0_i32, %c0_i32_0 : i32, i32
  }
  func.func @transform_15(%arg0: i32) -> (i32, i32) {
    %c0_i32 = arith.constant 0 : i32
    %c0_i32_0 = arith.constant 0 : i32
    %c0_i32_1 = arith.constant 0 : i32
    return %c0_i32, %c0_i32_0 : i32, i32
  }
  func.func @transform_16(%arg0: i32) -> (i32, i32, i32) {
    %c0_i32 = arith.constant 0 : i32
    %c0_i32_0 = arith.constant 0 : i32
    %c0_i32_1 = arith.constant 0 : i32
    return %arg0, %c0_i32, %c0_i32_0 : i32, i32, i32
  }
}

</mosaic_0001>

<bundles_post_ra>
// kernel: _forward_impl.4
= control target key start
LH: loop header
LB: loop body
LE: loop exit
PB: predicated region body
PF: predicated region fallthrough
CT: control target
= control target key end

     0   :  { %s1231_s13 = smov 0   ;;  %s1476_s0 = inlined_call_operand.vmem [shape: f32[2,3,100], index: 0, kind: input, shape index: {}]   ;;  %s1477_s1 = inlined_call_operand.vmem [shape: bf16[4,27], index: 1, kind: input, shape index: {}]   ;;  %s1478_s2 = inlined_call_operand.vmem [shape: f32[4,1], index: 2, kind: input, shape index: {}]   ;;  %s1479_s3 = inlined_call_operand.vmem [shape: f32[1,100], index: 3, kind: input, shape index: {}, may-alias: {3,6}]   ;;  %s1480_s4 = inlined_call_operand.vmem [shape: bf16[8,36], index: 4, kind: input, shape index: {}]   ;;  %s1481_s5 = inlined_call_operand.vmem [shape: f32[8,1], index: 5, kind: input, shape index: {}, may-alias: {5,8}]   ;;  %s1482_s6 = inlined_call_operand.vmem [shape: f32[1,100], index: 6, kind: input, shape index: {}, may-alias: {3,6}]   ;;  %s1483_s7 = inlined_call_operand.vmem [shape: bf16[8,72], index: 7, kind: input, shape index: {}]   ;;  %s1484_s8 = inlined_call_operand.vmem [shape: f32[8,1], index: 8, kind: input, shape index: {}, may-alias: {5,8}]   ;;  %s1485_s9 = inlined_call_operand.vmem [shape: f32[100,36], index: 9, kind: input, shape index: {}]   ;;  %s1486_s10 = inlined_call_operand.vmem [shape: bf16[2,8,36], index: 10, kind: output, shape index: {}]  }
   0x1 LB: > { %s1014_s14 = sadd.s32 4294967295, %s1154_s13   ;;  %p1018_p0 = scmp.ge.s32.totalorder %s1154_s13, 1  ;;  %s1154_s13 = sphi %s1231_s13, %s20_s13  }
   0x2   : > { %p311_p1 = scmp.lt.s32.totalorder %s1154_s13, 3 }
   0x4   : > { %p312_p2 = pnand %p1018_p0, %p311_p1 }
   0x5   : > { %p347_p3 = scmp.lt.s32.totalorder (!%p312_p2), %s1014_s14, 1  ;;  %s1156_s19 = smov (!%p312_p2), 118  }
   0x6   : > { %315 = sbr.rel (%p312_p2) target bundleno = 1394 (0x572), region = 60  ;;  %s1157_s20 = smov (!%p312_p2), 127  }
   0x7   : > { %s1158_s21 = smov (!%p312_p2), 90   ;;  %s1159_s22 = smov (!%p312_p2), 99  }
   0x8   : > { %s1160_s23 = smov (!%p312_p2), 10   ;;  %s1497_s24 = smov (!%p312_p2), 38  }
   0x9   : > { %s1162_s25 = smov (!%p312_p2), 91   ;;  %s1163_s26 = smov (!%p312_p2), 119  }
   0xa   : > { %s1492_s27 = smov (!%p312_p2), 1   ;;  %s1166_s28 = smov (!%p312_p2), 29  }
   0xb   : > { %s1519_s14 = smov (!%p347_p3, %s1014_s14), 1  ;;  %v1164_v2 = vmov 0.0   ;;  %s1167_s29 = smov 89   ;;  %vm1169_vm0 = vmmov 0   ;;  %v1172_v3 = vmov 0   ;;  %vm398_vm1 = vcmask 809984  }
   0xc   : > { %s1487_s15 = sshll.u32 %s1519_s14, 2  ;;  %1057 = vmatprep.subr.bf16.mxu0 %v1164_v2  ;;  %1065 = vmatprep.subr.bf16.mxu1 %v1164_v2  ;;  %s1168_s30 = smov 117   ;;  %v358_v4 = vld [vmem:[%s1478_s2] sm:$0xf]  ;;  %vm1490_vm2 = vcmask 736256   ;;  %vm406_vm3 = vcmask 744448  }
   0xd   : > { %s350_s18 = scalar_lea.vmem %s1476_s0, %s1487_s15  ;;  %1061 = vmatprep.mubr.msk.bf16.mxu0 %vm1169_vm0, %v1164_v2  ;;  %1071 = vmatprep.mubr.msk.bf16.mxu1 %vm1169_vm0, %v1164_v2  ;;  %s1170_s11 = smov 9   ;;  %vm1489_vm4 = vcmask 80896   ;;  %vm486_vm5 = vcmask 1040384   ;;  %vm1488_vm6 = vcmask 7168   ;;  %vm468_vm7 = vcmask 1042432  }
   0xe   : > { %v356_v0 = vld [vmem:[%s350_s18] sm:$0x7]  ;;  %s1171_s12 = smov 37   ;;  %1146 = vset.pattern.permute.xlu0 %v1172_v3  ;;  %1147 = vset.pattern.permute.xlu1 %v1172_v3  ;;  %s1494_s16 = smov 11   ;;  %vm473_vm8 = vcmask 1044480   ;;  %vm422_vm10 = vcmask 728064  }
   0xf   : > { %v1247_v1 = vpack.c.bf16 %v356_v0, %v356_v0  ;;  %s1496_s17 = smov 39   ;;  %vm492_vm9 = vsmask.f32 2304  ;;  %vm477_vm11 = vcmask 1045504   ;;  %v1175_v29 = vmov 65535   ;;  %s1498_s15 = smov 11  }
  0x10   : > { %v509_v30 = vsel %vm473_vm8, 4294967295, %v1175_v29  ;;  %vm493_vm12 = vmand %vm468_vm7, %vm492_vm9  ;;  %vm1491_vm13 = vcmask 1043456   ;;  %vm382_vm14 = vcmask 72704   ;;  %vm464_vm15 = vcmask 1041408   ;;  %v357_v0 = vld [vmem:[%s1477_s1] sm:$0x3] }
  0x11   : > { %410 = vrot.lane.b32.xlu1 %v1247_v1, %s1156_s19  ;;  %394 = vrot.lane.b32.xlu0 %v1247_v1, %s1157_s20  ;;  %v510_v41 = vsel %vm477_vm11, %v509_v30, 0  ;;  %vm474_vm9 = vsmask.f32 4352  ;;  %v444_v57 = vrot.slane %v1247_v1, 2  ;;  %s1499_s18 = smov 1  }
  0x15   : > { %412 = vrot.lane.b32.xlu1 %v1247_v1, %s1158_s21  ;;  %396 = vrot.lane.b32.xlu0 %v1247_v1, %s1159_s22 }
  0x19   : > { %372 = vrot.lane.b32.xlu1 %v1247_v1, %s1160_s23  ;;  %370 = vrot.lane.b32.xlu0 %v1247_v1, %s1497_s24 }
  0x1d   : > { %404 = vrot.lane.b32.xlu1 %v1247_v1, %s1162_s25  ;;  %402 = vrot.lane.b32.xlu0 %v1247_v1, %s1163_s26 }
  0x21   : > { %388 = vrot.lane.b32.xlu1 %v1247_v1, %s1492_s27  ;;  %386 = vrot.lane.b32.xlu0 %v1247_v1, %s1166_s28 }
  0x25   : > { %420 = vrot.lane.b32.xlu1 %v1247_v1, %s1167_s29  ;;  %418 = vrot.lane.b32.xlu0 %v1247_v1, %s1168_s30 }
  0x29   : > { %380 = vrot.lane.b32.xlu1 %v1247_v1, %s1170_s11  ;;  %378 = vrot.lane.b32.xlu0 %v1247_v1, %s1171_s12 }
  0x2d   : > { %363 = vrot.lane.b32.xlu1 %v1247_v1, %s1494_s16  ;;  %361 = vrot.lane.b32.xlu0 %v1247_v1, %s1496_s17 }
  0x31   : > { %501 = vperm.xlu0 %1146, %v358_v4  }
  0x83   : > { %v411_v5 = vpop.permute.xlu1 %410  ;;  %v395_v6 = vpop.permute.xlu0 %394 }
  0x87   : > { %v413_v7 = vpop.permute.xlu1 %412  ;;  %v397_v8 = vpop.permute.xlu0 %396 }
  0x88   : > { %v401_v9 = vsel %vm398_vm1, %v395_v6, %v397_v8  ;;  %v417_v12 = vsel %vm1490_vm2, %v411_v5, %v413_v7  ;;  %vm483_vm2 = vsmask.f32 7424  ;;  %v1022_v5 = vld [vmem:[%s1479_s3] ss:$0 sm:$0xff] }
  0x89   : > { %v445_v13 = vshll.u32 %v401_v9, 16  ;;  %v454_v16 = vshrl.u32 %v417_v12, 16  ;;  %v457_v17 = vshll.u32 %v417_v12, 16  ;;  %v448_v20 = vshrl.u32 %v401_v9, 16  ;;  %v563_v12 = vld [vmem:[%s1481_s5] sm:$0xff] }
  0x8b   : > { %v373_v10 = vpop.permute.xlu1 %372  ;;  %v371_v11 = vpop.permute.xlu0 %370  ;;  %v1293_v19 = vrot.slane %v445_v13, 1  ;;  %v456_v24 = vrot.slane %v454_v16, 5  ;;  %v459_v25 = vrot.slane %v457_v17, 6 }
  0x8c   : > { %v377_v26 = vsel %vm1489_vm4, %v371_v11, %v373_v10 }
  0x8d   : > { %v450_v27 = vor.u32 %v448_v20, %v1293_v19  ;;  %v426_v31 = vshrl.u32 %v377_v26, 16  ;;  %v429_v32 = vshll.u32 %v377_v26, 16  ;;  %v460_v36 = vor.u32 %v459_v25, %v456_v24 }
  0x8f   : > { %v405_v14 = vpop.permute.xlu1 %404  ;;  %v403_v15 = vpop.permute.xlu0 %402  ;;  %v428_v43 = vrot.slane %v426_v31, 6  ;;  %v431_v44 = vrot.slane %v429_v32, 7 }
  0x90   : > { %v409_v18 = vsel %vm406_vm3, %v403_v15, %v405_v14 }
  0x91   : > { %v453_v21 = vrot.slane %v409_v18, 7  ;;  %v432_v52 = vor.u32 %v431_v44, %v428_v43 }
  0x93   : > { %v389_v22 = vpop.permute.xlu1 %388  ;;  %v387_v23 = vpop.permute.xlu0 %386  ;;  %v489_v33 = vsel %vm486_vm5, %v450_v27, %v453_v21  ;;  %vm465_vm5 = vsmask.f32 1280 }
  0x94   : > { %v393_v28 = vsel %vm1488_vm6, %v387_v23, %v389_v22  ;;  %v494_v42 = vsel %vm493_vm12, %v489_v33, %v460_v36  ;;  %vm365_vm6 = vcmask 89088   ;;  %vm466_vm4 = vmand %vm464_vm15, %vm465_vm5  ;;  %vm482_vm12 = vcmask 1047552  }
  0x95   : > { %v436_v38 = vshrl.u32 %v393_v28, 16  ;;  %v439_v39 = vshll.u32 %v393_v28, 16  ;;  %vm484_vm5 = vmand %vm482_vm12, %vm483_vm2  ;;  %vm1500_vm2 = vcmask 736256   ;;  %vm655_vm12 = vcmask 293888  }
  0x97   : > { %v421_v34 = vpop.permute.xlu1 %420  ;;  %v419_v35 = vpop.permute.xlu0 %418  ;;  %v438_v49 = vrot.slane %v436_v38, 3  ;;  %v441_v50 = vrot.slane %v439_v39, 4 }
  0x98   : > { %v425_v37 = vsel %vm422_vm10, %v419_v35, %v421_v34 }
  0x99   : > { %v463_v40 = vrot.slane %v425_v37, 4  ;;  %v442_v58 = vor.u32 %v441_v50, %v438_v49  ;;  %v562_v50 = vld [vmem:[%s1480_s4] sm:$0xf] }
  0x9b   : > { %v381_v45 = vpop.permute.xlu1 %380  ;;  %v379_v46 = vpop.permute.xlu0 %378  ;;  %v498_v47 = vsel %vm1491_vm13, %v494_v42, %v463_v40  ;;  %vm475_vm13 = vmand %vm473_vm8, %vm474_vm9  ;;  %vm504_vm8 = vcmask 220160  }
  0x9c   : > { %v511_v48 = vand.u32 %v510_v41, %v498_v47  ;;  %v385_v51 = vsel %vm382_vm14, %v379_v46, %v381_v45 }
  0x9d   : > { %v435_v55 = vrot.slane %v385_v51, 5 }
  0x9e   : > { %1058 = vmatpush3.bf16.msra.mxu0 %v511_v48 }
  0x9f   : > { %v364_v53 = vpop.permute.xlu1 %363  ;;  %v362_v54 = vpop.permute.xlu0 %361  ;;  %1059 = vmatprep.subr.bf16.mxu0 %v1164_v2 }
  0xa0   : > { %v368_v56 = vsel %vm365_vm6, %v362_v54, %v364_v53  ;;  %v1024_v54 = vld [vmem:[%s1482_s6] ss:$0 sm:$0xff] }
  0xa1   : > { %v467_v59 = vsel %vm466_vm4, %v368_v56, %v432_v52  ;;  %vm1501_vm4 = vcmask 1043456  }
  0xa2   : > { %v471_v60 = vsel %vm468_vm7, %v467_v59, %v435_v55  ;;  %vm1502_vm7 = vcmask 80896   ;;  %vm1504_vm9 = vmmov %vm1501_vm4 }
  0xa3   : > { %v476_v61 = vsel %vm475_vm13, %v471_v60, %v442_v58  ;;  %vm1503_vm13 = vcmask 7168  }
  0xa4   : > { %v480_v62 = vsel %vm477_vm11, %v476_v61, %v444_v57  ;;  %v711_v61 = vld [vmem:[%s1484_s8] sm:$0xff] }
  0xa5   : > { %v485_v63 = vsel %vm484_vm5, %v480_v62, %v1293_v19 }
  0xa6   : > { %1060 = vmatpush3.bf16.msra.mxu0 %v485_v63 }
  0xa7   : > { %1075 = vmatprep.subr.bf16.mxu0 %v1164_v2 }
  0xa9   : > { %1062 = vmatmul.mubr.msk.bf16.vlgmr.msra.gmra.mxu0 %vm504_vm8, %v357_v0  ;;  %vm1511_vm8 = vmmov %vm1503_vm13 }
  0xaa   : > { %1085 = vmatprep.mubr.msk.bf16.mxu0 %vm1169_vm0, %v1164_v2 }
  0xac   : > { %v502_v1 = vpop.permute.xlu0 %501 }
 0x169   : > { %v547_v3 = vpop.f32.mrf.mxu0 }
 0x16a   : > { %v548_v4 = vadd.f32 %v547_v3, %v502_v1 }
 0x16b   : > { %v1063_v6 = vpop.f32.mrf.mxu0 }
 0x16c   : > { %v553_v7 = vmax.f32 %v548_v4, 0.0 }
 0x16d   : > { %v550_v8 = vpop.f32.mrf.mxu0 }
 0x16e   : > { %v561_v9 = vmul.f32 %v1022_v5, %v553_v7 }
 0x16f   : > { %v1064_v10 = vpop.f32.mrf.mxu0 }
 0x170   : > { %v564_v11 = vpack.c.bf16 %v561_v9, %v561_v9 }
 0x172   : > { %615 = vrot.lane.b32.xlu0 %v564_v11, %s1168_s30  ;;  %594 = vrot.lane.b32.xlu1 %v564_v11, %s1157_s20 }
 0x176   : > { %601 = vrot.lane.b32.xlu0 %v564_v11, %s1163_s26  ;;  %596 = vrot.lane.b32.xlu1 %v564_v11, %s1159_s22 }
 0x17a   : > { %608 = vrot.lane.b32.xlu0 %v564_v11, %s1156_s19  ;;  %617 = vrot.lane.b32.xlu1 %v564_v11, %s1167_s29 }
 0x17e   : > { %573 = vrot.lane.b32.xlu0 %v564_v11, %s1497_s24  ;;  %603 = vrot.lane.b32.xlu1 %v564_v11, %s1162_s25  ;;  %s1505_s24 = smov 38  }
 0x182   : > { %580 = vrot.lane.b32.xlu0 %v564_v11, %s1171_s12  ;;  %610 = vrot.lane.b32.xlu1 %v564_v11, %s1158_s21 }
 0x186   : > { %566 = vrot.lane.b32.xlu0 %v564_v11, %s1496_s17  ;;  %575 = vrot.lane.b32.xlu1 %v564_v11, %s1160_s23 }
 0x18a   : > { %587 = vrot.lane.b32.xlu0 %v564_v11, %s1166_s28  ;;  %582 = vrot.lane.b32.xlu1 %v564_v11, %s1170_s11 }
 0x18e   : > { %652 = vperm.xlu0 %1146, %v563_v12   ;;  %568 = vrot.lane.b32.xlu1 %v564_v11, %s1498_s15 }
 0x192   : > { %589 = vrot.lane.b32.xlu1 %v564_v11, %s1499_s18 }
 0x1e4   : > { %v616_v13 = vpop.permute.xlu0 %615  ;;  %v595_v14 = vpop.permute.xlu1 %594 }
 0x1e8   : > { %v602_v15 = vpop.permute.xlu0 %601  ;;  %v597_v16 = vpop.permute.xlu1 %596 }
 0x1e9   : > { %v600_v21 = vsel %vm398_vm1, %v595_v14, %v597_v16 }
 0x1ea   : > { %v629_v24 = vrot.slane %v600_v21, 6 }
 0x1ec   : > { %v609_v17 = vpop.permute.xlu0 %608  ;;  %v618_v18 = vpop.permute.xlu1 %617  ;;  %v644_v30 = vsel %vm464_vm15, %v564_v11, %v629_v24 }
 0x1ed   : > { %v621_v19 = vsel %vm422_vm10, %v616_v13, %v618_v18 }
 0x1ee   : > { %v659_v20 = vsel %vm464_vm15, %v621_v19, 0 }
 0x1ef   : > { %1066 = vmatpush3.bf16.msra.mxu1 %v659_v20 }
 0x1f0   : > { %v604_v22 = vpop.permute.xlu1 %603  ;;  %1067 = vmatprep.subr.bf16.mxu1 %v1164_v2  ;;  %v574_v25 = vpop.permute.xlu0 %573 }
 0x1f1   : > { %v607_v23 = vsel %vm406_vm3, %v602_v15, %v604_v22 }
 0x1f2   : > { %v631_v26 = vrot.slane %v607_v23, 4 }
 0x1f4   : > { %v611_v27 = vpop.permute.xlu1 %610  ;;  %v646_v31 = vsel %vm1501_vm4, %v644_v30, %v631_v26  ;;  %v581_v32 = vpop.permute.xlu0 %580 }
 0x1f5   : > { %v614_v28 = vsel %vm1500_vm2, %v609_v17, %v611_v27 }
 0x1f6   : > { %v633_v29 = vrot.slane %v614_v28, 2 }
 0x1f8   : > { %v576_v33 = vpop.permute.xlu1 %575  ;;  %v648_v34 = vsel %vm477_vm11, %v646_v31, %v633_v29  ;;  %v567_v36 = vpop.permute.xlu0 %566 }
 0x1f9   : > { %1068 = vmatpush3.bf16.msra.mxu1 %v648_v34  ;;  %v579_v37 = vsel %vm1502_vm7, %v574_v25, %v576_v33  ;;  %v880_v33 = vld [vmem:[%s1485_s9 + $0x60] sm:$0xf]  ;;  %v879_v34 = vld [vmem:[%s1485_s9 + $0x58] sm:$0xff] }
 0x1fa   : > { %1069 = vmatprep.subr.bf16.mxu1 %v1164_v2  ;;  %v623_v40 = vrot.slane %v579_v37, 6  ;;  %v876_v37 = vld [vmem:[%s1485_s9 + $0x40] sm:$0xff] }
 0x1fc   : > { %v583_v35 = vpop.permute.xlu1 %582  ;;  %v588_v42 = vpop.permute.xlu0 %587 }
 0x1fd   : > { %v586_v41 = vsel %vm382_vm14, %v581_v32, %v583_v35  ;;  %v710_v32 = vld [vmem:[%s1483_s7] sm:$0xf]  ;;  %v878_v35 = vld [vmem:[%s1485_s9 + $0x50] sm:$0xff] }
 0x1fe   : > { %v625_v45 = vrot.slane %v586_v41, 4  ;;  %v872_v41 = vld [vmem:[%s1485_s9 + $0x20] sm:$0xff] }
 0x200   : > { %v569_v38 = vpop.permute.xlu1 %568 }
 0x201   : > { %v572_v39 = vsel %vm365_vm6, %v567_v36, %v569_v38  ;;  %v877_v36 = vld [vmem:[%s1485_s9 + $0x48] sm:$0xff]  ;;  %v875_v38 = vld [vmem:[%s1485_s9 + $0x38] sm:$0xff] }
 0x202   : > { %v636_v43 = vsel %vm464_vm15, %v572_v39, %v623_v40  ;;  %v874_v39 = vld [vmem:[%s1485_s9 + $0x30] sm:$0xff]  ;;  %v873_v40 = vld [vmem:[%s1485_s9 + $0x28] sm:$0xff] }
 0x203   : > { %v638_v48 = vsel %vm1504_vm9, %v636_v43, %v625_v45  ;;  %vm959_vm9 = vcmask 289792  }
 0x204   : > { %v590_v44 = vpop.permute.xlu1 %589 }
 0x205   : > { %v593_v46 = vsel %vm1503_vm13, %v588_v42, %v590_v44  ;;  %v871_v42 = vld [vmem:[%s1485_s9 + $0x18] sm:$0xff]  ;;  %v870_v44 = vld [vmem:[%s1485_s9 + $0x10] sm:$0xff]  ;;  %vm881_vm13 = vcmask 818176  }
 0x206   : > { %v627_v47 = vrot.slane %v593_v46, 2 }
 0x208   : > { %v640_v49 = vsel %vm477_vm11, %v638_v48, %v627_v47  ;;  %vm1508_vm11 = vmmov %vm1500_vm2  ;;  %v869_v47 = vld [vmem:[%s1485_s9 + $0x8] sm:$0xff] }
 0x209   : > { %1070 = vmatpush3.bf16.msra.mxu1 %v640_v49  ;;  %v653_v51 = vpop.permute.xlu0 %652  ;;  %vm1513_vm2 = vmmov %vm1502_vm7 }
 0x20a   : > { %1089 = vmatprep.subr.mxu1 %v1164_v2 }
 0x20c   : > { %1072 = vmatmul.mubr.msk.bf16.vlgmr.msra.gmra.mxu1 %vm655_vm12, %v562_v50  ;;  %v868_v50 = vld [vmem:[%s1485_s9] sm:$0xff] }
 0x20d   : > { %1115 = vmatprep.mubr.msk.f32.mxu1 %vm1169_vm0, %v1164_v2  ;;  %vm1507_vm0 = vmmov %vm1501_vm4 }
 0x20e   : > { %vm1509_vm15 = vmmov %vm1507_vm0 }
 0x20f   : > { %vm1510_vm5 = vmmov %vm1507_vm0 }
 0x210   : > { %vm1514_vm4 = vmmov %vm1507_vm0 }
 0x211   : > { %vm1515_vm7 = vmmov %vm1507_vm0 }
 0x212   : > { %1090 = vmatpush3.msk.msra.mxu1 %vm1515_vm7, %v880_v33 }
 0x213   : > { %1091 = vmatprep.subr.mxu1 %v1164_v2 }
 0x214   : > { %1092 = vmatpush3.msra.mxu1 %v879_v34 }
 0x215   : > { %1093 = vmatprep.subr.mxu1 %v1164_v2 }
 0x216   : > { %1094 = vmatpush3.msra.mxu1 %v878_v35 }
 0x217   : > { %1095 = vmatprep.subr.mxu1 %v1164_v2 }
 0x218   : > { %1096 = vmatpush3.msra.mxu1 %v877_v36 }
 0x219   : > { %1097 = vmatprep.subr.mxu1 %v1164_v2 }
 0x21a   : > { %1098 = vmatpush3.msra.mxu1 %v876_v37 }
 0x21b   : > { %1099 = vmatprep.subr.mxu1 %v1164_v2 }
 0x21c   : > { %1100 = vmatpush3.msra.mxu1 %v875_v38 }
 0x21d   : > { %1101 = vmatprep.subr.mxu1 %v1164_v2 }
 0x21e   : > { %1102 = vmatpush3.msra.mxu1 %v874_v39 }
 0x21f   : > { %1103 = vmatprep.subr.mxu1 %v1164_v2 }
 0x220   : > { %1104 = vmatpush3.msra.mxu1 %v873_v40 }
 0x221   : > { %1105 = vmatprep.subr.mxu1 %v1164_v2 }
 0x222   : > { %1106 = vmatpush3.msra.mxu1 %v872_v41 }
 0x223   : > { %1107 = vmatprep.subr.mxu1 %v1164_v2 }
 0x224   : > { %1108 = vmatpush3.msra.mxu1 %v871_v42 }
 0x225   : > { %1109 = vmatprep.subr.mxu1 %v1164_v2 }
 0x226   : > { %1110 = vmatpush3.msra.mxu1 %v870_v44 }
 0x227   : > { %1111 = vmatprep.subr.mxu1 %v1164_v2 }
 0x228   : > { %1112 = vmatpush3.msra.mxu1 %v869_v47 }
 0x229   : > { %1113 = vmatprep.subr.mxu1 %v1164_v2 }
 0x22a   : > { %1114 = vmatpush3.msra.mxu1 %v868_v50 }
 0x2cc   : > { %v695_v52 = vpop.f32.mrf.mxu1 }
 0x2cd   : > { %v696_v53 = vadd.f32 %v695_v52, %v653_v51 }
 0x2ce   : > { %v1073_v55 = vpop.f32.mrf.mxu1 }
 0x2cf   : > { %v701_v56 = vmax.f32 %v696_v53, 0.0 }
 0x2d0   : > { %v698_v57 = vpop.f32.mrf.mxu1 }
 0x2d1   : > { %v709_v58 = vmul.f32 %v1024_v54, %v701_v56 }
 0x2d2   : > { %v1074_v59 = vpop.f32.mrf.mxu1 }
 0x2d3   : > { %v712_v60 = vpack.c.bf16 %v709_v58, %v709_v58 }
 0x2d5   : > { %765 = vrot.lane.b32.xlu0 %v712_v60, %s1167_s29  ;;  %763 = vrot.lane.b32.xlu1 %v712_v60, %s1168_s30 }
 0x2d9   : > { %758 = vrot.lane.b32.xlu0 %v712_v60, %s1158_s21  ;;  %756 = vrot.lane.b32.xlu1 %v712_v60, %s1156_s19 }
 0x2dd   : > { %751 = vrot.lane.b32.xlu0 %v712_v60, %s1162_s25  ;;  %749 = vrot.lane.b32.xlu1 %v712_v60, %s1163_s26  ;;  %s1506_s25 = smov 39  }
 0x2e1   : > { %744 = vrot.lane.b32.xlu0 %v712_v60, %s1159_s22  ;;  %742 = vrot.lane.b32.xlu1 %v712_v60, %s1157_s20 }
 0x2e5   : > { %737 = vrot.lane.b32.xlu0 %v712_v60, %s1499_s18  ;;  %735 = vrot.lane.b32.xlu1 %v712_v60, %s1166_s28 }
 0x2e9   : > { %730 = vrot.lane.b32.xlu0 %v712_v60, %s1170_s11  ;;  %728 = vrot.lane.b32.xlu1 %v712_v60, %s1171_s12 }
 0x2ed   : > { %723 = vrot.lane.b32.xlu0 %v712_v60, %s1160_s23  ;;  %721 = vrot.lane.b32.xlu1 %v712_v60, %s1505_s24 }
 0x2f1   : > { %716 = vrot.lane.b32.xlu0 %v712_v60, %s1498_s15  ;;  %714 = vrot.lane.b32.xlu1 %v712_v60, %s1506_s25 }
 0x2f5   : > { %793 = vperm.xlu1 %1147, %v711_v61  }
 0x347   : > { %v766_v62 = vpop.permute.xlu0 %765  ;;  %v764_v63 = vpop.permute.xlu1 %763 }
 0x348   : > { %v769_v0 = vsel %vm422_vm10, %v764_v63, %v766_v62 }
 0x349   : > { %v800_v1 = vsel %vm1507_vm0, %v769_v0, 0 }
 0x34a   : > { %1076 = vmatpush3.bf16.msra.mxu0 %v800_v1 }
 0x34b   : > { %v759_v3 = vpop.permute.xlu0 %758  ;;  %v757_v4 = vpop.permute.xlu1 %756  ;;  %1077 = vmatprep.subr.bf16.mxu0 %v1164_v2 }
 0x34c   : > { %v762_v5 = vsel %vm1508_vm11, %v757_v4, %v759_v3 }
 0x34d   : > { %v777_v6 = vrot.slane %v762_v5, 4 }
 0x34f   : > { %v752_v7 = vpop.permute.xlu0 %751  ;;  %v750_v8 = vpop.permute.xlu1 %749 }
 0x350   : > { %v755_v9 = vsel %vm406_vm3, %v750_v8, %v752_v7  ;;  %vm1512_vm3 = vmmov %vm1507_vm0 }
 0x351   : > { %v789_v10 = vsel %vm1509_vm15, %v755_v9, %v777_v6 }
 0x352   : > { %1078 = vmatpush3.bf16.msra.mxu0 %v789_v10 }
 0x353   : > { %v745_v11 = vpop.permute.xlu0 %744  ;;  %v743_v12 = vpop.permute.xlu1 %742  ;;  %1079 = vmatprep.subr.bf16.mxu0 %v1164_v2 }
 0x354   : > { %v748_v13 = vsel %vm398_vm1, %v743_v12, %v745_v11 }
 0x355   : > { %v775_v14 = vrot.slane %v748_v13, 4 }
 0x357   : > { %v738_v15 = vpop.permute.xlu0 %737  ;;  %v736_v16 = vpop.permute.xlu1 %735  ;;  %v786_v17 = vsel %vm1510_vm5, %v712_v60, %v775_v14 }
 0x358   : > { %v741_v18 = vsel %vm1511_vm8, %v736_v16, %v738_v15  ;;  %1080 = vmatpush3.bf16.msra.mxu0 %v786_v17 }
 0x359   : > { %1081 = vmatprep.subr.bf16.mxu0 %v1164_v2  ;;  %v773_v19 = vrot.slane %v741_v18, 4 }
 0x35b   : > { %v731_v20 = vpop.permute.xlu0 %730  ;;  %v729_v21 = vpop.permute.xlu1 %728 }
 0x35c   : > { %v734_v22 = vsel %vm382_vm14, %v729_v21, %v731_v20  ;;  %vm796_vm14 = vcmask 588800  }
 0x35d   : > { %v782_v23 = vsel %vm1512_vm3, %v734_v22, %v773_v19 }
 0x35e   : > { %1082 = vmatpush3.bf16.msra.mxu0 %v782_v23 }
 0x35f   : > { %v724_v24 = vpop.permute.xlu0 %723  ;;  %v722_v25 = vpop.permute.xlu1 %721  ;;  %1083 = vmatprep.subr.bf16.mxu0 %v1164_v2 }
 0x360   : > { %v727_v26 = vsel %vm1513_vm2, %v722_v25, %v724_v24 }
 0x361   : > { %v771_v27 = vrot.slane %v727_v26, 4 }
 0x363   : > { %v717_v28 = vpop.permute.xlu0 %716  ;;  %v715_v29 = vpop.permute.xlu1 %714 }
 0x364   : > { %v720_v30 = vsel %vm365_vm6, %v715_v29, %v717_v28  ;;  %vm1516_vm6 = vmmov %vm1508_vm11 }
 0x365   : > { %v779_v31 = vsel %vm1514_vm4, %v720_v30, %v771_v27 }
 0x366   : > { %1084 = vmatpush3.bf16.msra.mxu0 %v779_v31 }
 0x369   : > { %1086 = vmatmul.mubr.msk.bf16.vlgmr.msra.gmra.mxu0 %vm796_vm14, %v710_v32 }
 0x370   : > { %v794_v43 = vpop.permute.xlu1 %793 }
 0x429   : > { %v836_v45 = vpop.f32.mrf.mxu0 }
 0x42a   : > { %v837_v46 = vadd.f32 %v836_v45, %v794_v43 }
 0x42b   : > { %v1087_v48 = vpop.f32.mrf.mxu0 }
 0x42c   : > { %v842_v49 = vmax.f32 %v837_v46, 0.0 }
 0x42d   : > { %v839_v51 = vpop.f32.mrf.mxu0 }
 0x42e   : > { %847 = vrot.lane.b32.xlu1 %v842_v49, %s1159_s22  ;;  %844 = vrot.lane.b32.xlu0 %v842_v49, %s1157_s20 }
 0x42f   : > { %v1088_v52 = vpop.f32.mrf.mxu0 }
 0x432   : > { %855 = vrot.lane.b32.xlu1 %v842_v49, %s1158_s21  ;;  %852 = vrot.lane.b32.xlu0 %v842_v49, %s1156_s19  ;;  %s1517_s19 = sshll.u32 %s1519_s14, 2 }
 0x433   : > { %s354_s22 = scalar_lea.vmem %s1486_s10, %s1517_s19 }
 0x436   : > { %862 = vrot.lane.b32.xlu1 %v842_v49, %s1167_s29  ;;  %859 = vrot.lane.b32.xlu0 %v842_v49, %s1168_s30 }
 0x4a0   : > { %v848_v2 = vpop.permute.xlu1 %847  ;;  %v845_v53 = vpop.permute.xlu0 %844 }
 0x4a1   : > { %v850_v56 = vsel %vm398_vm1, %v845_v53, %v848_v2 }
 0x4a2   : > { %v851_v61 = vmax.f32 %v842_v49, %v850_v56 }
 0x4a4   : > { %v856_v54 = vpop.permute.xlu1 %855  ;;  %v853_v55 = vpop.permute.xlu0 %852 }
 0x4a5   : > { %v858_v59 = vsel %vm1516_vm6, %v853_v55, %v856_v54 }
 0x4a8   : > { %v863_v57 = vpop.permute.xlu1 %862  ;;  %v860_v58 = vpop.permute.xlu0 %859 }
 0x4a9   : > { %v865_v60 = vsel %vm422_vm10, %v860_v58, %v863_v57 }
 0x4aa   : > { %v866_v62 = vmax.f32 %v858_v59, %v865_v60 }
 0x4ac   : > { %v867_v63 = vmax.f32 %v851_v61, %v866_v62 }
 0x4ae   : > { %1116 = vmatmul.mubr.msk.f32.vlgmr.msra.gmra.mxu1 %vm881_vm13, %v867_v63 }
 0x56e   : > { %v954_v0 = vpop.f32.mrf.mxu1 }
 0x56f   : > { %v958_v1 = vpack.c.bf16 %v954_v0, %v954_v0 }
 0x570   : > { %v1117_v3 = vpop.f32.mrf.mxu1 }
 0x571   : > { %960 = vst.msk [vmem:[%s354_s22] sm:$0xf] %vm959_vm9, %v958_v1 }
 0x572 PF: > { %s20_s13 = sadd.s32 1, %s1154_s13  }
 0x573   : > { %p17_p4 = scmp.ge.s32.totalorder %s20_s13, 4  }
 0x575   :  { %19 = sbr.rel (!%p17_p4) target bundleno = 1 (0x1), region = 90 }

// kernel: _forward_impl.5
= control target key start
LH: loop header
LB: loop body
LE: loop exit
PB: predicated region body
PF: predicated region fallthrough
CT: control target
= control target key end

     0   :  { %s1959_s21 = smov 0   ;;  %s2320_s0 = inlined_call_operand.vmem [shape: bf16[2,8,36], index: 0, kind: input, shape index: {}]   ;;  %s2321_s1 = inlined_call_operand.vmem [shape: bf16[2,8,36], index: 1, kind: input, shape index: {}]   ;;  %s2322_s2 = inlined_call_operand.vmem [shape: bf16[8,8], index: 2, kind: input, shape index: {}]   ;;  %s2323_s3 = inlined_call_operand.vmem [shape: bf16[8,8], index: 3, kind: input, shape index: {}]   ;;  %s2324_s4 = inlined_call_operand.vmem [shape: f32[8,1], index: 4, kind: input, shape index: {}, may-alias: {4,7}]   ;;  %s2325_s5 = inlined_call_operand.vmem [shape: f32[36,64], index: 5, kind: input, shape index: {}]   ;;  %s2326_s6 = inlined_call_operand.vmem [shape: bf16[8,8], index: 6, kind: input, shape index: {}]   ;;  %s2327_s7 = inlined_call_operand.vmem [shape: f32[8,1], index: 7, kind: input, shape index: {}, may-alias: {4,7}]   ;;  %s2328_s8 = inlined_call_operand.vmem [shape: f32[64,100], index: 8, kind: input, shape index: {}]   ;;  %s2329_s9 = inlined_call_operand.vmem [shape: bf16[16,72], index: 9, kind: input, shape index: {}]   ;;  %s2330_s10 = inlined_call_operand.vmem [shape: f32[16,1], index: 10, kind: input, shape index: {}, may-alias: {10,13}]   ;;  %s2331_s11 = inlined_call_operand.vmem [shape: f32[1,100], index: 11, kind: input, shape index: {}]   ;;  %s2332_s12 = inlined_call_operand.vmem [shape: bf16[16,144], index: 12, kind: input, shape index: {}]   ;;  %s2333_s13 = inlined_call_operand.vmem [shape: f32[16,1], index: 13, kind: input, shape index: {}, may-alias: {10,13}]   ;;  %s2334_s14 = inlined_call_operand.vmem [shape: f32[100,36], index: 14, kind: input, shape index: {}]   ;;  %s2335_s15 = inlined_call_operand.vmem [shape: f32[36,16], index: 15, kind: input, shape index: {}]   ;;  %s2336_s16 = inlined_call_operand.vmem [shape: f32[2,16,16], index: 16, kind: output, shape index: {}]  }
   0x1   :  { %2357 = sst [smem:[#allocation2_spill]] %s2320_s0 }
   0x2   :  { %2358 = sst [smem:[#allocation3_spill]] %s2321_s1 }
   0x3   :  { %2359 = sst [smem:[#allocation4_spill]] %s2322_s2 }
   0x4   :  { %2360 = sst [smem:[#allocation5_spill]] %s2323_s3 }
   0x5 LB: > { %s1605_s22 = sadd.s32 4294967295, %s1841_s21   ;;  %p1609_p0 = scmp.ge.s32.totalorder %s1841_s21, 1  ;;  %s1841_s21 = sphi %s1959_s21, %s26_s21  }
   0x6   : > { %p470_p1 = scmp.lt.s32.totalorder %s1841_s21, 3 }
   0x8   : > { %p471_p2 = pnand %p1609_p0, %p470_p1 }
   0x9   : > { %p523_p3 = scmp.lt.s32.totalorder (!%p471_p2), %s1605_s22, 1  ;;  %s2361_s1 = sld [smem:[#allocation3_spill]] (!%p471_p2) }
   0xa   : > { %474 = sbr.rel (%p471_p2) target bundleno = 2226 (0x8b2), region = 84  ;;  %s2362_s0 = sld [smem:[#allocation2_spill]] (!%p471_p2) }
   0xb   : > { %s2363_s3 = sld [smem:[#allocation5_spill]] (!%p471_p2)  ;;  %s2337_s29 = smov (!%p471_p2), 117  }
   0xc   : > { %s2364_s2 = sld [smem:[#allocation4_spill]] (!%p471_p2)  ;;  %s1848_s30 = smov (!%p471_p2), 119  }
   0xd   : > { %s2349_s18 = smov (!%p471_p2), 90   ;;  %s2342_s19 = smov (!%p471_p2), 29  }
   0xe   : > { %s1853_s20 = smov (!%p471_p2), 91   ;;  %s2341_s23 = smov (!%p471_p2), 37  }
   0xf   : > { %v1843_v0 = vmov 0.0   ;;  %v541_v1 = vld [vmem:[%s2324_s4] sm:$0xff]  ;;  %s2378_s22 = smov (!%p523_p3, %s1605_s22), 1  ;;  %vm1844_vm0 = vmmov 0   ;;  %v1845_v2 = vmov 0   ;;  %vm546_vm1 = vcmask 1043456  }
  0x10   : > { %1684 = vmatprep.subr.bf16.mxu0 %v1843_v0  ;;  %1690 = vmatprep.subr.bf16.mxu1 %v1843_v0  ;;  %s1610_s25 = sshll.u32 %s2378_s22, 2  ;;  %v726_v5 = vld [vmem:[%s2327_s7] sm:$0xff]  ;;  %vm542_vm2 = vcmask 64512   ;;  %v646_v11 = vld [vmem:[%s2325_s5 + $0x18] sm:$0xff]  ;;  %v645_v12 = vld [vmem:[%s2325_s5 + $0x10] sm:$0xff]  ;;  %vm648_vm3 = vcmask 293888  }
  0x11   : > { %1686 = vmatprep.mubr.msk.bf16.mxu0 %vm1844_vm0, %v1843_v0  ;;  %1692 = vmatprep.mubr.msk.bf16.mxu1 %vm1844_vm0, %v1843_v0  ;;  %s530_s28 = scalar_lea.vmem %s2361_s1, %s1610_s25  ;;  %s526_s17 = scalar_lea.vmem %s2362_s0, %s1610_s25  ;;  %v540_v8 = vld [vmem:[%s2363_s3] sm:$0xf]  ;;  %v644_v13 = vld [vmem:[%s2325_s5 + $0x8] sm:$0xff]  ;;  %v787_v32 = vld [vmem:[%s2328_s8 + $0x38] sm:$0xff]  ;;  %vm788_vm4 = vcmask 523264   ;;  %vm928_vm5 = vcmask 728064  }
  0x12   : > { %1829 = vset.pattern.permute.xlu0 %v1845_v2  ;;  %1830 = vset.pattern.permute.xlu1 %v1845_v2  ;;  %v538_v3 = vld [vmem:[%s530_s28] sm:$0xf]  ;;  %v786_v33 = vld [vmem:[%s2328_s8 + $0x30] sm:$0xff]  ;;  %v785_v34 = vld [vmem:[%s2328_s8 + $0x28] sm:$0xff]  ;;  %s2351_s28 = smov 118   ;;  %s2339_s0 = smov 89  }
  0x13   : > { %638 = vperm.xlu0 %1829, %v541_v1   ;;  %v537_v4 = vld [vmem:[%s526_s17] sm:$0xf]  ;;  %v548_v6 = vsel %vm546_vm1, %v538_v3, 0  ;;  %v783_v36 = vld [vmem:[%s2328_s8 + $0x18] sm:$0xff]  ;;  %v782_v37 = vld [vmem:[%s2328_s8 + $0x10] sm:$0xff]  ;;  %s2347_s17 = smov 127  }
  0x14   : > { %v594_v7 = vsel %vm546_vm1, %v537_v4, 0  ;;  %1685 = vmatpush3.bf16.msra.mxu0 %v548_v6  ;;  %v539_v9 = vld [vmem:[%s2364_s2] sm:$0xf]  ;;  %v781_v38 = vld [vmem:[%s2328_s8 + $0x8] sm:$0xff]  ;;  %s2353_s24 = smov 99   ;;  %s2344_s26 = smov 38  }
  0x15   : > { %1691 = vmatpush3.bf16.msra.mxu1 %v594_v7  ;;  %1696 = vmatprep.subr.mxu0 %v1843_v0  ;;  %v647_v10 = vld [vmem:[%s2325_s5 + $0x20] sm:$0xf]  ;;  %s2345_s25 = smov 1   ;;  %s1858_s27 = smov 39   ;;  %v865_v51 = vld [vmem:[%s2330_s10 + $0x8] sm:$0xff]  ;;  %vm920_vm6 = vcmask 736256  }
  0x16   : > { %1709 = vmatprep.subr.bf16.mxu1 %v1843_v0  ;;  %v643_v14 = vld [vmem:[%s2325_s5] sm:$0xff]  ;;  %vm912_vm7 = vcmask 744448   ;;  %vm904_vm8 = vcmask 809984   ;;  %vm896_vm9 = vcmask 7168   ;;  %vm888_vm10 = vcmask 72704   ;;  %s1862_s1 = smov 7  }
  0x17   : > { %730 = vperm.xlu0 %1829, %v726_v5   ;;  %1687 = vmatmul.mubr.msk.bf16.vlgmr.msra.gmra.mxu0 %vm542_vm2, %v540_v8  ;;  %v725_v31 = vld [vmem:[%s2326_s6] sm:$0xf]  ;;  %vm880_vm11 = vcmask 80896   ;;  %vm872_vm12 = vcmask 89088   ;;  %vm968_vm13 = vcmask 588800   ;;  %vm1115_vm14 = vcmask 130048  }
  0x18   : > { %1693 = vmatmul.mubr.msk.bf16.vlgmr.msra.gmra.mxu1 %vm542_vm2, %v539_v9  ;;  %1697 = vmatpush3.msk.msra.mxu0 %vm546_vm1, %v647_v10  ;;  %v784_v35 = vld [vmem:[%s2328_s8 + $0x20] sm:$0xff]  ;;  %vm1225_vm15 = vcmask 818176   ;;  %s2356_s2 = smov 122  }
  0x19   : > { %1706 = vmatprep.mubr.msk.f32.mxu0 %vm1844_vm0, %v1843_v0  ;;  %1698 = vmatprep.subr.mxu0 %v1843_v0  ;;  %v780_v39 = vld [vmem:[%s2328_s8] sm:$0xff] }
  0x1a   : > { %1711 = vmatprep.mubr.msk.bf16.mxu1 %vm1844_vm0, %v1843_v0  ;;  %1699 = vmatpush3.msra.mxu0 %v646_v11  ;;  %v864_v50 = vld [vmem:[%s2330_s10] sm:$0xff] }
  0x1b   : > { %1700 = vmatprep.subr.mxu0 %v1843_v0 }
  0x1c   : > { %1701 = vmatpush3.msra.mxu0 %v645_v12 }
  0x1d   : > { %1702 = vmatprep.subr.mxu0 %v1843_v0 }
  0x1e   : > { %1703 = vmatpush3.msra.mxu0 %v644_v13 }
  0x1f   : > { %1704 = vmatprep.subr.mxu0 %v1843_v0 }
  0x20   : > { %1705 = vmatpush3.msra.mxu0 %v643_v14 }
  0x21   : > { %1734 = vmatprep.subr.bf16.mxu0 %v1843_v0 }
  0x8e   : > { %v639_v17 = vpop.permute.xlu0 %638 }
  0x92   : > { %v731_v40 = vpop.permute.xlu0 %730 }
  0xd7   : > { %v584_v15 = vpop.f32.mrf.mxu0 }
  0xd8   : > { %v630_v16 = vpop.f32.mrf.mxu1 }
  0xd9   : > { %v631_v18 = vadd.f32 %v630_v16, %v584_v15  ;;  %v1688_v19 = vpop.f32.mrf.mxu0 }
  0xda   : > { %v1694_v20 = vpop.f32.mrf.mxu1 }
  0xdb   : > { %v641_v21 = vadd.f32 %v639_v17, %v631_v18  ;;  %v587_v22 = vpop.f32.mrf.mxu0 }
  0xdc   : > { %v633_v23 = vpop.f32.mrf.mxu1 }
  0xdd   : > { %v642_v24 = vmax.f32 %v641_v21, 0.0  ;;  %v1689_v25 = vpop.f32.mrf.mxu0  ;;  %v1831_v23 = vld [vmem:[%s2329_s9] sm:$0xff]  }
  0xde   : > { %v1695_v26 = vpop.f32.mrf.mxu1 }
  0xdf   : > { %1707 = vmatmul.mubr.msk.f32.vlgmr.msra.gmra.mxu0 %vm648_vm3, %v642_v24 }
  0xe0   : > { %1744 = vmatprep.mubr.msk.bf16.mxu0 %vm1844_vm0, %v1843_v0 }
 0x19f   : > { %v721_v27 = vpop.f32.mrf.mxu0 }
 0x1a0   : > { %v727_v28 = vpack.c.bf16 %v721_v27, %v721_v27 }
 0x1a1   : > { %v1708_v29 = vpop.f32.mrf.mxu0 }
 0x1a2   : > { %v737_v30 = vsel %vm546_vm1, %v727_v28, 0 }
 0x1a3   : > { %1710 = vmatpush3.bf16.msra.mxu1 %v737_v30 }
 0x1a4   : > { %1715 = vmatprep.subr.mxu1 %v1843_v0 }
 0x1a6   : > { %1712 = vmatmul.mubr.msk.bf16.vlgmr.msra.gmra.mxu1 %vm542_vm2, %v725_v31  ;;  %v1622_v31 = vld [vmem:[%s2331_s11] ss:$0 sm:$0xff]  ;;  %vm1358_vm2 = vcmask 39936  }
 0x1a7   : > { %1716 = vmatpush3.msra.mxu1 %v787_v32  ;;  %1731 = vmatprep.mubr.msk.f32.mxu1 %vm1844_vm0, %v1843_v0  ;;  %vm1324_vm0 = vcmask 56320  }
 0x1a8   : > { %1717 = vmatprep.subr.mxu1 %v1843_v0 }
 0x1a9   : > { %1718 = vmatpush3.msra.mxu1 %v786_v33 }
 0x1aa   : > { %1719 = vmatprep.subr.mxu1 %v1843_v0 }
 0x1ab   : > { %1720 = vmatpush3.msra.mxu1 %v785_v34 }
 0x1ac   : > { %1721 = vmatprep.subr.mxu1 %v1843_v0 }
 0x1ad   : > { %1722 = vmatpush3.msra.mxu1 %v784_v35 }
 0x1ae   : > { %1723 = vmatprep.subr.mxu1 %v1843_v0 }
 0x1af   : > { %1724 = vmatpush3.msra.mxu1 %v783_v36 }
 0x1b0   : > { %1725 = vmatprep.subr.mxu1 %v1843_v0 }
 0x1b1   : > { %1726 = vmatpush3.msra.mxu1 %v782_v37  ;;  %v1832_v37 = vld [vmem:[%s2332_s12 + $0x4] ss:$8 sps:$4 sm:$0xff]  }
 0x1b2   : > { %1727 = vmatprep.subr.mxu1 %v1843_v0 }
 0x1b3   : > { %1728 = vmatpush3.msra.mxu1 %v781_v38  ;;  %v1029_v38 = vld [vmem:[%s2333_s13 + $0x8] sm:$0xff] }
 0x1b4   : > { %1729 = vmatprep.subr.mxu1 %v1843_v0 }
 0x1b5   : > { %1730 = vmatpush3.msra.mxu1 %v780_v39  ;;  %v1028_v39 = vld [vmem:[%s2333_s13] sm:$0xff] }
 0x1b6   : > { %1119 = vmatprep.subr.bf16.mxu1 %v1845_v2 }
 0x266   : > { %v773_v41 = vpop.f32.mrf.mxu1 }
 0x267   : > { %v774_v42 = vadd.f32 %v773_v41, %v731_v40 }
 0x268   : > { %v1713_v43 = vpop.f32.mrf.mxu1 }
 0x269   : > { %v779_v44 = vmax.f32 %v774_v42, 0.0 }
 0x26a   : > { %v776_v45 = vpop.f32.mrf.mxu1 }
 0x26b   : > { %1732 = vmatmul.mubr.msk.f32.vlgmr.msra.gmra.mxu1 %vm788_vm4, %v779_v44  ;;  %vm1391_vm4 = vcmask 285696  }
 0x26c   : > { %v1714_v46 = vpop.f32.mrf.mxu1  ;;  %1625 = vmatprep.mubr.msk.bf16.mxu1 %vm1115_vm14, %v1832_v37 }
 0x32b   : > { %v858_v47 = vpop.f32.mrf.mxu1 }
 0x32c   : > { %v2070_v48 = vpack.c.bf16 %v858_v47, %v858_v47 }
 0x32d   : > { %v1733_v49 = vpop.f32.mrf.mxu1 }
 0x32e   : > { %916 = vrot.lane.b32.xlu0 %v2070_v48, %s2351_s28  ;;  %924 = vrot.lane.b32.xlu1 %v2070_v48, %s2337_s29  ;;  %s1859_s29 = smov 9  }
 0x332   : > { %908 = vrot.lane.b32.xlu0 %v2070_v48, %s1848_s30  ;;  %926 = vrot.lane.b32.xlu1 %v2070_v48, %s2339_s0  ;;  %s2365_s0 = smov 127  }
 0x336   : > { %900 = vrot.lane.b32.xlu0 %v2070_v48, %s2347_s17  ;;  %918 = vrot.lane.b32.xlu1 %v2070_v48, %s2349_s18  ;;  %s2366_s17 = smov 1  }
 0x33a   : > { %892 = vrot.lane.b32.xlu0 %v2070_v48, %s2342_s19  ;;  %910 = vrot.lane.b32.xlu1 %v2070_v48, %s1853_s20  ;;  %s1860_s19 = smov 10  }
 0x33e   : > { %884 = vrot.lane.b32.xlu0 %v2070_v48, %s2341_s23  ;;  %902 = vrot.lane.b32.xlu1 %v2070_v48, %s2353_s24  ;;  %s2367_s23 = smov 29  }
 0x342   : > { %876 = vrot.lane.b32.xlu0 %v2070_v48, %s2344_s26  ;;  %894 = vrot.lane.b32.xlu1 %v2070_v48, %s2345_s25  ;;  %s1861_s26 = smov 11   ;;  %s2368_s25 = smov 37  }
 0x346   : > { %868 = vrot.lane.b32.xlu0 %v2070_v48, %s1858_s27  ;;  %886 = vrot.lane.b32.xlu1 %v2070_v48, %s1859_s29 }
 0x34a   : > { %955 = vperm.xlu0 %1829, %v864_v50   ;;  %878 = vrot.lane.b32.xlu1 %v2070_v48, %s1860_s19 }
 0x34e   : > { %870 = vrot.lane.b32.xlu1 %v2070_v48, %s1861_s26 }
 0x352   : > { %960 = vperm.xlu1 %1830, %v865_v51  }
 0x3a0   : > { %v917_v52 = vpop.permute.xlu0 %916  ;;  %v925_v53 = vpop.permute.xlu1 %924 }
 0x3a4   : > { %v909_v54 = vpop.permute.xlu0 %908  ;;  %v927_v55 = vpop.permute.xlu1 %926 }
 0x3a5   : > { %v931_v56 = vsel %vm928_vm5, %v925_v53, %v927_v55 }
 0x3a6   : > { %v972_v57 = vsel %vm546_vm1, %v931_v56, 0 }
 0x3a7   : > { %1735 = vmatpush3.bf16.msra.mxu0 %v972_v57 }
 0x3a8   : > { %v901_v58 = vpop.permute.xlu0 %900  ;;  %v919_v59 = vpop.permute.xlu1 %918  ;;  %1736 = vmatprep.subr.bf16.mxu0 %v1843_v0 }
 0x3a9   : > { %v923_v60 = vsel %vm920_vm6, %v917_v52, %v919_v59 }
 0x3aa   : > { %v939_v61 = vrot.slane %v923_v60, 4 }
 0x3ac   : > { %v911_v62 = vpop.permute.xlu1 %910  ;;  %v893_v1 = vpop.permute.xlu0 %892 }
 0x3ad   : > { %v915_v63 = vsel %vm912_vm7, %v909_v54, %v911_v62 }
 0x3ae   : > { %v951_v3 = vsel %vm546_vm1, %v915_v63, %v939_v61 }
 0x3af   : > { %1737 = vmatpush3.bf16.msra.mxu0 %v951_v3  ;;  %v1224_v3 = vld [vmem:[%s2334_s14 + $0x60] sm:$0xf] }
 0x3b0   : > { %v903_v4 = vpop.permute.xlu1 %902  ;;  %1738 = vmatprep.subr.bf16.mxu0 %v1843_v0  ;;  %v885_v7 = vpop.permute.xlu0 %884 }
 0x3b1   : > { %v907_v5 = vsel %vm904_vm8, %v901_v58, %v903_v4  ;;  %v1222_v4 = vld [vmem:[%s2334_s14 + $0x50] sm:$0xff] }
 0x3b2   : > { %v937_v6 = vrot.slane %v907_v5, 4  ;;  %v1221_v5 = vld [vmem:[%s2334_s14 + $0x48] sm:$0xff] }
 0x3b4   : > { %v895_v8 = vpop.permute.xlu1 %894  ;;  %v948_v9 = vsel %vm546_vm1, %v2070_v48, %v937_v6  ;;  %v877_v14 = vpop.permute.xlu0 %876  ;;  %v1220_v6 = vld [vmem:[%s2334_s14 + $0x40] sm:$0xff] }
 0x3b5   : > { %v899_v10 = vsel %vm896_vm9, %v893_v1, %v895_v8  ;;  %1739 = vmatpush3.bf16.msra.mxu0 %v948_v9  ;;  %v1834_v1 = vld [vmem:[%s2332_s12] ss:$8 sps:$4 sm:$0xff]   ;;  %v1219_v9 = vld [vmem:[%s2334_s14 + $0x38] sm:$0xff] }
 0x3b6   : > { %1740 = vmatprep.subr.bf16.mxu0 %v1843_v0  ;;  %v935_v11 = vrot.slane %v899_v10, 4 }
 0x3b8   : > { %v887_v12 = vpop.permute.xlu1 %886  ;;  %v869_v18 = vpop.permute.xlu0 %868 }
 0x3b9   : > { %v891_v13 = vsel %vm888_vm10, %v885_v7, %v887_v12  ;;  %v1218_v12 = vld [vmem:[%s2334_s14 + $0x30] sm:$0xff] }
 0x3ba   : > { %v944_v15 = vsel %vm546_vm1, %v891_v13, %v935_v11 }
 0x3bb   : > { %1741 = vmatpush3.bf16.msra.mxu0 %v944_v15  ;;  %v1217_v15 = vld [vmem:[%s2334_s14 + $0x28] sm:$0xff] }
 0x3bc   : > { %v879_v16 = vpop.permute.xlu1 %878  ;;  %1742 = vmatprep.subr.bf16.mxu0 %v1843_v0 }
 0x3bd   : > { %v883_v17 = vsel %vm880_vm11, %v877_v14, %v879_v16  ;;  %v1216_v16 = vld [vmem:[%s2334_s14 + $0x20] sm:$0xff] }
 0x3be   : > { %v933_v19 = vrot.slane %v883_v17, 4 }
 0x3c0   : > { %v871_v20 = vpop.permute.xlu1 %870 }
 0x3c1   : > { %v875_v21 = vsel %vm872_vm12, %v869_v18, %v871_v20  ;;  %v1215_v18 = vld [vmem:[%s2334_s14 + $0x18] sm:$0xff] }
 0x3c2   : > { %v941_v22 = vsel %vm546_vm1, %v875_v21, %v933_v19  ;;  %v1214_v21 = vld [vmem:[%s2334_s14 + $0x10] sm:$0xff] }
 0x3c3   : > { %1743 = vmatpush3.bf16.msra.mxu0 %v941_v22  ;;  %v1213_v22 = vld [vmem:[%s2334_s14 + $0x8] sm:$0xff] }
 0x3c4   : > { %1748 = vmatprep.subr.msk.mxu0 %vm546_vm1, %v1224_v3 }
 0x3c5   : > { %v956_v24 = vpop.permute.xlu0 %955 }
 0x3c6   : > { %1745 = vmatmul.mubr.msk.bf16.vlgmr.msra.gmra.mxu0 %vm968_vm13, %v1831_v23 }
 0x3c7   : > { %1749 = vmatpush3.msk.msra.mxu0 %vm546_vm1, %v1224_v3 }
 0x3cd   : > { %v961_v27 = vpop.permute.xlu1 %960 }
 0x486   : > { %v1008_v25 = vpop.f32.mrf.mxu0 }
 0x487   : > { %v1009_v0 = vadd.f32 %v1008_v25, %v956_v24  ;;  %v1212_v24 = vld [vmem:[%s2334_s14] sm:$0xff] }
 0x488   : > { %v1746_v26 = vpop.f32.mrf.mxu0 }
 0x489   : > { %v1015_v29 = vmax.f32 %v1009_v0, 0.0 }
 0x48a   : > { %v1011_v28 = vpop.f32.mrf.mxu0 }
 0x48b   : > { %v1012_v30 = vadd.f32 %v1011_v28, %v961_v27  ;;  %v1024_v34 = vmul.f32 %v1622_v31, %v1015_v29 }
 0x48c   : > { %v1747_v32 = vpop.f32.mrf.mxu0 }
 0x48d   : > { %v1016_v33 = vmax.f32 %v1012_v30, 0.0 }
 0x48f   : > { %v1025_v35 = vmul.f32 %v1622_v31, %v1016_v33 }
 0x491   : > { %v1030_v36 = vpack.c.bf16 %v1025_v35, %v1024_v34 }
 0x493   : > { %1082 = vrot.lane.b32.xlu1 %v1030_v36, %s2349_s18  ;;  %1080 = vrot.lane.b32.xlu0 %v1030_v36, %s2351_s28  ;;  %s2369_s18 = smov 38   ;;  %s2374_s28 = smov 118  }
 0x497   : > { %1074 = vrot.lane.b32.xlu1 %v1030_v36, %s1853_s20  ;;  %1072 = vrot.lane.b32.xlu0 %v1030_v36, %s1848_s30  ;;  %s2370_s30 = smov 89   ;;  %s1869_s20 = smov 31  }
 0x49b   : > { %1066 = vrot.lane.b32.xlu1 %v1030_v36, %s2353_s24  ;;  %1064 = vrot.lane.b32.xlu0 %v1030_v36, %s2365_s0  ;;  %s1867_s24 = smov 93  }
 0x49f   : > { %1058 = vrot.lane.b32.xlu1 %v1030_v36, %s2366_s17  ;;  %1056 = vrot.lane.b32.xlu0 %v1030_v36, %s2367_s23 }
 0x4a3   : > { %1050 = vrot.lane.b32.xlu1 %v1030_v36, %s1859_s29  ;;  %1048 = vrot.lane.b32.xlu0 %v1030_v36, %s2368_s25  ;;  %s2371_s29 = smov 117   ;;  %s1870_s25 = smov 123  }
 0x4a7   : > { %1042 = vrot.lane.b32.xlu1 %v1030_v36, %s1860_s19  ;;  %1040 = vrot.lane.b32.xlu0 %v1030_v36, %s2369_s18  ;;  %s2373_s19 = smov 90   ;;  %s2355_s18 = smov 30  }
 0x4ab   : > { %1034 = vrot.lane.b32.xlu1 %v1030_v36, %s1861_s26  ;;  %1032 = vrot.lane.b32.xlu0 %v1030_v36, %s1858_s27  ;;  %s2372_s26 = smov 99   ;;  %s1868_s27 = smov 35  }
 0x4af   : > { %1090 = vrot.lane.b32.xlu1 %v1030_v36, %s2370_s30  ;;  %1088 = vrot.lane.b32.xlu0 %v1030_v36, %s2371_s29 }
 0x4b3   : > { %1103 = vperm.xlu1 %1830, %v1029_v38   ;;  %1098 = vperm.xlu0 %1829, %v1028_v39  }
 0x505   : > { %v1083_v40 = vpop.permute.xlu1 %1082  ;;  %v1081_v41 = vpop.permute.xlu0 %1080 }
 0x506   : > { %v1086_v42 = vsel %vm920_vm6, %v1081_v41, %v1083_v40 }
 0x507   : > { %1120 = vmatpush1.bf16.msra.mxu1 %v1086_v42 }
 0x508   : > { %1121 = vmatprep.subr.bf16.mxu1 %v1845_v2 }
 0x509   : > { %v1075_v43 = vpop.permute.xlu1 %1074  ;;  %v1073_v44 = vpop.permute.xlu0 %1072 }
 0x50a   : > { %v1078_v45 = vsel %vm912_vm7, %v1073_v44, %v1075_v43  ;;  %vm1442_vm7 = vcmask 236544  }
 0x50b   : > { %1122 = vmatpush1.bf16.msra.mxu1 %v1078_v45 }
 0x50c   : > { %1123 = vmatprep.subr.bf16.mxu1 %v1845_v2 }
 0x50d   : > { %v1067_v46 = vpop.permute.xlu1 %1066  ;;  %v1065_v47 = vpop.permute.xlu0 %1064 }
 0x50e   : > { %v1070_v48 = vsel %vm904_vm8, %v1065_v47, %v1067_v46 }
 0x50f   : > { %1124 = vmatpush1.bf16.msra.mxu1 %v1070_v48 }
 0x510   : > { %1125 = vmatprep.subr.bf16.mxu1 %v1845_v2 }
 0x511   : > { %v1059_v49 = vpop.permute.xlu1 %1058  ;;  %v1057_v50 = vpop.permute.xlu0 %1056 }
 0x512   : > { %v1062_v53 = vsel %vm896_vm9, %v1057_v50, %v1059_v49  ;;  %v1451_v50 = vld [vmem:[%s2335_s15 + $0x20] sm:$0xf] }
 0x513   : > { %1126 = vmatpush1.bf16.msra.mxu1 %v1030_v36 }
 0x514   : > { %1127 = vmatprep.subr.bf16.mxu1 %v1845_v2 }
 0x515   : > { %v1051_v51 = vpop.permute.xlu1 %1050  ;;  %v1049_v52 = vpop.permute.xlu0 %1048 }
 0x516   : > { %v1054_v56 = vsel %vm888_vm10, %v1049_v52, %v1051_v51  ;;  %v1450_v51 = vld [vmem:[%s2335_s15 + $0x18] sm:$0xff]  ;;  %v1449_v52 = vld [vmem:[%s2335_s15 + $0x10] sm:$0xff] }
 0x517   : > { %1128 = vmatpush1.bf16.msra.mxu1 %v1062_v53  ;;  %v1448_v53 = vld [vmem:[%s2335_s15 + $0x8] sm:$0xff] }
 0x518   : > { %1129 = vmatprep.subr.bf16.mxu1 %v1845_v2 }
 0x519   : > { %v1043_v54 = vpop.permute.xlu1 %1042  ;;  %v1041_v55 = vpop.permute.xlu0 %1040 }
 0x51a   : > { %v1046_v59 = vsel %vm880_vm11, %v1041_v55, %v1043_v54  ;;  %v1447_v54 = vld [vmem:[%s2335_s15] sm:$0xff] }
 0x51b   : > { %1130 = vmatpush1.bf16.msra.mxu1 %v1054_v56 }
 0x51c   : > { %1131 = vmatprep.subr.bf16.mxu1 %v1845_v2 }
 0x51d   : > { %v1035_v57 = vpop.permute.xlu1 %1034  ;;  %v1033_v58 = vpop.permute.xlu0 %1032 }
 0x51e   : > { %v1038_v60 = vsel %vm872_vm12, %v1033_v58, %v1035_v57 }
 0x51f   : > { %1132 = vmatpush1.bf16.msra.mxu1 %v1046_v59 }
 0x520   : > { %1133 = vmatprep.subr.bf16.mxu1 %v1845_v2 }
 0x521   : > { %v1091_v61 = vpop.permute.xlu1 %1090  ;;  %v1089_v62 = vpop.permute.xlu0 %1088 }
 0x522   : > { %v1094_v63 = vsel %vm928_vm5, %v1089_v62, %v1091_v61 }
 0x523   : > { %1134 = vmatpush1.bf16.msra.mxu1 %v1038_v60 }
 0x524   : > { %1149 = vmatprep.subr.bf16.mxu1 %v1845_v2  ;;  %v1223_v2 = vld [vmem:[%s2334_s14 + $0x58] sm:$0xff] }
 0x525   : > { %1750 = vmatprep.subr.mxu0 %v1223_v2 }
 0x526   : > { %1751 = vmatpush3.msra.mxu0 %v1223_v2 }
 0x527   : > { %1150 = vmatpush2.bf16.msra.mxu1 %v1094_v63  ;;  %1752 = vmatprep.subr.mxu0 %v1222_v4 }
 0x528   : > { %1753 = vmatpush3.msra.mxu0 %v1222_v4 }
 0x529   : > { %1754 = vmatprep.subr.mxu0 %v1221_v5 }
 0x52a   : > { %1152 = vmatmul.mubr.bf16.vlgmr.msra.gmra.mxu1 %v1834_v1  ;;  %1755 = vmatpush3.msra.mxu0 %v1221_v5 }
 0x52b   : > { %1756 = vmatprep.subr.mxu0 %v1220_v6 }
 0x52c   : > { %1757 = vmatpush3.msra.mxu0 %v1220_v6 }
 0x52d   : > { %1758 = vmatprep.subr.mxu0 %v1219_v9 }
 0x52e   : > { %v1099_v7 = vpop.permute.xlu0 %1098  ;;  %1759 = vmatpush3.msra.mxu0 %v1219_v9  ;;  %v1104_v19 = vpop.permute.xlu1 %1103 }
 0x52f   : > { %1760 = vmatprep.subr.mxu0 %v1218_v12 }
 0x530   : > { %1761 = vmatpush3.msra.mxu0 %v1218_v12 }
 0x531   : > { %1762 = vmatprep.subr.mxu0 %v1217_v15 }
 0x532   : > { %1763 = vmatpush3.msra.mxu0 %v1217_v15 }
 0x533   : > { %1764 = vmatprep.subr.mxu0 %v1216_v16 }
 0x534   : > { %1765 = vmatpush3.msra.mxu0 %v1216_v16 }
 0x535   : > { %1766 = vmatprep.subr.mxu0 %v1215_v18 }
 0x536   : > { %1767 = vmatpush3.msra.mxu0 %v1215_v18 }
 0x537   : > { %1768 = vmatprep.subr.mxu0 %v1214_v21 }
 0x538   : > { %1769 = vmatpush3.msra.mxu0 %v1214_v21 }
 0x539   : > { %1770 = vmatprep.subr.mxu0 %v1213_v22 }
 0x53a   : > { %1771 = vmatpush3.msra.mxu0 %v1213_v22 }
 0x53b   : > { %1772 = vmatprep.subr.mxu0 %v1212_v24 }
 0x53c   : > { %1773 = vmatpush3.msra.mxu0 %v1212_v24 }
 0x53d   : > { %1777 = vmatprep.subr.msk.mxu0 %vm546_vm1, %v1451_v50 }
 0x5ea   : > { %v1153_v8 = vpop.f32.mrf.mxu1 }
 0x5eb   : > { %v1154_v10 = vadd.f32 %v1153_v8, %v1099_v7 }
 0x5ec   : > { %v1155_v11 = vpop.f32.mrf.mxu1 }
 0x5ed   : > { %v1160_v13 = vmax.f32 %v1154_v10, 0.0 }
 0x5ee   : > { %v1156_v14 = vpop.f32.mrf.mxu1 }
 0x5ef   : > { %1170 = vrot.lane.b32.xlu1 %v1160_v13, %s2372_s26  ;;  %1164 = vrot.lane.b32.xlu0 %v1160_v13, %s2365_s0  ;;  %v1157_v20 = vadd.f32 %v1156_v14, %v1104_v19 }
 0x5f0   : > { %v1158_v17 = vpop.f32.mrf.mxu1 }
 0x5f1   : > { %v1161_v23 = vmax.f32 %v1157_v20, 0.0 }
 0x5f3   : > { %1186 = vrot.lane.b32.xlu1 %v1160_v13, %s2373_s19  ;;  %1180 = vrot.lane.b32.xlu0 %v1160_v13, %s2374_s28 }
 0x5f7   : > { %1200 = vrot.lane.b32.xlu1 %v1160_v13, %s2370_s30  ;;  %1194 = vrot.lane.b32.xlu0 %v1160_v13, %s2371_s29 }
 0x5fb   : > { %1172 = vrot.lane.b32.xlu1 %v1161_v23, %s2372_s26  ;;  %1166 = vrot.lane.b32.xlu0 %v1161_v23, %s2365_s0 }
 0x5ff   : > { %1188 = vrot.lane.b32.xlu1 %v1161_v23, %s2373_s19  ;;  %1182 = vrot.lane.b32.xlu0 %v1161_v23, %s2374_s28  ;;  %s1865_s19 = smov 5   ;;  %s1866_s28 = smov 97  }
 0x603   : > { %1202 = vrot.lane.b32.xlu1 %v1161_v23, %s2370_s30  ;;  %1196 = vrot.lane.b32.xlu0 %v1161_v23, %s2371_s29  ;;  %s1863_s30 = smov 6   ;;  %s1864_s29 = smov 98  }
 0x661   : > { %v1171_v25 = vpop.permute.xlu1 %1170  ;;  %v1165_v0 = vpop.permute.xlu0 %1164 }
 0x662   : > { %v1176_v28 = vsel %vm904_vm8, %v1165_v0, %v1171_v25 }
 0x663   : > { %v1178_v33 = vmax.f32 %v1160_v13, %v1176_v28 }
 0x665   : > { %v1187_v26 = vpop.permute.xlu1 %1186  ;;  %v1181_v27 = vpop.permute.xlu0 %1180 }
 0x666   : > { %v1192_v31 = vsel %vm920_vm6, %v1181_v27, %v1187_v26 }
 0x669   : > { %v1201_v29 = vpop.permute.xlu1 %1200  ;;  %v1195_v30 = vpop.permute.xlu0 %1194 }
 0x66a   : > { %v1206_v32 = vsel %vm928_vm5, %v1195_v30, %v1201_v29 }
 0x66b   : > { %v1208_v34 = vmax.f32 %v1192_v31, %v1206_v32 }
 0x66d   : > { %v1210_v35 = vmax.f32 %v1178_v33, %v1208_v34  ;;  %v1173_v36 = vpop.permute.xlu1 %1172  ;;  %v1167_v37 = vpop.permute.xlu0 %1166 }
 0x66e   : > { %v1177_v40 = vsel %vm904_vm8, %v1167_v37, %v1173_v36 }
 0x66f   : > { %1774 = vmatprep.mubr.msk.f32.mxu0 %vm1225_vm15, %v1210_v35  ;;  %v1179_v45 = vmax.f32 %v1161_v23, %v1177_v40 }
 0x671   : > { %v1189_v38 = vpop.permute.xlu1 %1188  ;;  %v1183_v39 = vpop.permute.xlu0 %1182 }
 0x672   : > { %v1193_v43 = vsel %vm920_vm6, %v1183_v39, %v1189_v38  ;;  %vm1425_vm6 = vcmask 244736  }
 0x675   : > { %v1203_v41 = vpop.permute.xlu1 %1202  ;;  %v1197_v42 = vpop.permute.xlu0 %1196 }
 0x676   : > { %v1207_v44 = vsel %vm928_vm5, %v1197_v42, %v1203_v41  ;;  %vm1408_vm5 = vcmask 252928  }
 0x677   : > { %v1209_v46 = vmax.f32 %v1193_v43, %v1207_v44 }
 0x679   : > { %v1211_v47 = vmax.f32 %v1179_v45, %v1209_v46 }
 0x67b   : > { %1775 = vmatmul.mubr.msk.f32.vlgmr.msra.gmra.mxu0 %vm1225_vm15, %v1211_v47 }
 0x67c   : > { %1778 = vmatpush3.msk.msra.mxu0 %vm546_vm1, %v1451_v50  ;;  %vm1341_vm1 = vcmask 48128  }
 0x67d   : > { %1779 = vmatprep.subr.mxu0 %v1450_v51 }
 0x67e   : > { %1780 = vmatpush3.msra.mxu0 %v1450_v51 }
 0x67f   : > { %1781 = vmatprep.subr.mxu0 %v1449_v52 }
 0x680   : > { %1782 = vmatpush3.msra.mxu0 %v1449_v52 }
 0x681   : > { %1783 = vmatprep.subr.mxu0 %v1448_v53 }
 0x682   : > { %1784 = vmatpush3.msra.mxu0 %v1448_v53 }
 0x683   : > { %1785 = vmatprep.subr.mxu0 %v1447_v54 }
 0x684   : > { %1786 = vmatpush3.msra.mxu0 %v1447_v54 }
 0x73b   : > { %v2238_v48 = vpop.f32.mrf.mxu0 }
 0x73c   : > { %1320 = vrot.lane.b32.xlu1 %v2238_v48, %s1862_s1  ;;  %1314 = vrot.lane.b32.xlu0 %v2238_v48, %s2372_s26 }
 0x73d   : > { %v2259_v49 = vpop.f32.mrf.mxu0 }
 0x740   : > { %1337 = vrot.lane.b32.xlu1 %v2238_v48, %s1863_s30  ;;  %1331 = vrot.lane.b32.xlu0 %v2238_v48, %s1864_s29 }
 0x744   : > { %1354 = vrot.lane.b32.xlu1 %v2238_v48, %s1865_s19  ;;  %1348 = vrot.lane.b32.xlu0 %v2238_v48, %s1866_s28 }
 0x748   : > { %1371 = vrot.lane.b32.xlu1 %v2238_v48, %s2366_s17  ;;  %1365 = vrot.lane.b32.xlu0 %v2238_v48, %s1867_s24 }
 0x74c   : > { %1387 = vrot.lane.b32.xlu1 %v2238_v48, %s1868_s27  ;;  %1381 = vrot.lane.b32.xlu0 %v2238_v48, %s2365_s0 }
 0x750   : > { %1404 = vrot.lane.b32.xlu1 %v2238_v48, %s1869_s20  ;;  %1398 = vrot.lane.b32.xlu0 %v2238_v48, %s1870_s25 }
 0x754   : > { %1421 = vrot.lane.b32.xlu1 %v2238_v48, %s2355_s18  ;;  %1415 = vrot.lane.b32.xlu0 %v2238_v48, %s2356_s2 }
 0x758   : > { %1318 = vrot.lane.b32.xlu1 %v2259_v49, %s1862_s1  ;;  %1312 = vrot.lane.b32.xlu0 %v2259_v49, %s2372_s26 }
 0x75c   : > { %1335 = vrot.lane.b32.xlu1 %v2259_v49, %s1863_s30  ;;  %1329 = vrot.lane.b32.xlu0 %v2259_v49, %s1864_s29 }
 0x760   : > { %1352 = vrot.lane.b32.xlu1 %v2259_v49, %s1865_s19  ;;  %1346 = vrot.lane.b32.xlu0 %v2259_v49, %s1866_s28  ;;  %s2375_s19 = smov 30   ;;  %s1873_s28 = smov 121  }
 0x764   : > { %1369 = vrot.lane.b32.xlu1 %v2259_v49, %s2366_s17  ;;  %1363 = vrot.lane.b32.xlu0 %v2259_v49, %s1867_s24 }
 0x768   : > { %1385 = vrot.lane.b32.xlu1 %v2259_v49, %s1868_s27  ;;  %1379 = vrot.lane.b32.xlu0 %v2259_v49, %s2365_s0  ;;  %s2376_s0 = smov 122  }
 0x76c   : > { %1402 = vrot.lane.b32.xlu1 %v2259_v49, %s1869_s20  ;;  %1396 = vrot.lane.b32.xlu0 %v2259_v49, %s1870_s25 }
 0x770   : > { %1419 = vrot.lane.b32.xlu1 %v2259_v49, %s2375_s19  ;;  %1413 = vrot.lane.b32.xlu0 %v2259_v49, %s2376_s0 }
 0x774   : > { %1436 = vrot.lane.b32.xlu1 %v2259_v49, %s2367_s23  ;;  %1430 = vrot.lane.b32.xlu0 %v2259_v49, %s1873_s28 }
 0x778   : > { %1438 = vrot.lane.b32.xlu1 %v2238_v48, %s2367_s23  ;;  %1432 = vrot.lane.b32.xlu0 %v2238_v48, %s1873_s28  ;;  %s1634_s23 = sshll.u32 %s2378_s22, 4 }
 0x779   : > { %s535_s20 = scalar_lea.vmem %s2336_s16, %s1634_s23 }
 0x7ae   : > { %v1321_v55 = vpop.permute.xlu1 %1320  ;;  %v1315_v56 = vpop.permute.xlu0 %1314 }
 0x7af   : > { %v1326_v19 = vsel %vm1324_vm0, %v1315_v56, %v1321_v55 }
 0x7b0   : > { %v1328_v24 = vmax.f32 %v2238_v48, %v1326_v19 }
 0x7b2   : > { %v1338_v57 = vpop.permute.xlu1 %1337  ;;  %v1332_v58 = vpop.permute.xlu0 %1331 }
 0x7b3   : > { %v1343_v22 = vsel %vm1341_vm1, %v1332_v58, %v1338_v57 }
 0x7b4   : > { %v1345_v29 = vmax.f32 %v1328_v24, %v1343_v22 }
 0x7b6   : > { %v1355_v59 = vpop.permute.xlu1 %1354  ;;  %v1349_v60 = vpop.permute.xlu0 %1348 }
 0x7b7   : > { %v1360_v27 = vsel %vm1358_vm2, %v1349_v60, %v1355_v59 }
 0x7b8   : > { %v1362_v33 = vmax.f32 %v1345_v29, %v1360_v27 }
 0x7ba   : > { %v1372_v61 = vpop.permute.xlu1 %1371  ;;  %v1366_v62 = vpop.permute.xlu0 %1365 }
 0x7bb   : > { %v1376_v31 = vsel %vm896_vm9, %v1366_v62, %v1372_v61 }
 0x7bc   : > { %v1378_v39 = vmax.f32 %v1362_v33, %v1376_v31 }
 0x7be   : > { %v1388_v63 = vpop.permute.xlu1 %1387  ;;  %v1382_v1 = vpop.permute.xlu0 %1381 }
 0x7bf   : > { %v1393_v37 = vsel %vm1391_vm4, %v1382_v1, %v1388_v63 }
 0x7c0   : > { %v1395_v42 = vmax.f32 %v1378_v39, %v1393_v37 }
 0x7c2   : > { %v1405_v3 = vpop.permute.xlu1 %1404  ;;  %v1399_v2 = vpop.permute.xlu0 %1398 }
 0x7c3   : > { %v1410_v41 = vsel %vm1408_vm5, %v1399_v2, %v1405_v3 }
 0x7c4   : > { %v1412_v48 = vmax.f32 %v1395_v42, %v1410_v41 }
 0x7c6   : > { %v1422_v4 = vpop.permute.xlu1 %1421  ;;  %v1416_v5 = vpop.permute.xlu0 %1415 }
 0x7c7   : > { %v1427_v46 = vsel %vm1425_vm6, %v1416_v5, %v1422_v4 }
 0x7c8   : > { %v1429_v50 = vmax.f32 %v1412_v48, %v1427_v46 }
 0x7ca   : > { %v1319_v6 = vpop.permute.xlu1 %1318  ;;  %v1313_v7 = vpop.permute.xlu0 %1312 }
 0x7cb   : > { %v1325_v14 = vsel %vm1324_vm0, %v1313_v7, %v1319_v6 }
 0x7cc   : > { %v1327_v16 = vmax.f32 %v2259_v49, %v1325_v14 }
 0x7ce   : > { %v1336_v8 = vpop.permute.xlu1 %1335  ;;  %v1330_v9 = vpop.permute.xlu0 %1329 }
 0x7cf   : > { %v1342_v15 = vsel %vm1341_vm1, %v1330_v9, %v1336_v8 }
 0x7d0   : > { %v1344_v21 = vmax.f32 %v1327_v16, %v1342_v15 }
 0x7d2   : > { %v1353_v10 = vpop.permute.xlu1 %1352  ;;  %v1347_v11 = vpop.permute.xlu0 %1346 }
 0x7d3   : > { %v1359_v20 = vsel %vm1358_vm2, %v1347_v11, %v1353_v10 }
 0x7d4   : > { %v1361_v25 = vmax.f32 %v1344_v21, %v1359_v20 }
 0x7d6   : > { %v1370_v12 = vpop.permute.xlu1 %1369  ;;  %v1364_v13 = vpop.permute.xlu0 %1363 }
 0x7d7   : > { %v1375_v23 = vsel %vm896_vm9, %v1364_v13, %v1370_v12 }
 0x7d8   : > { %v1377_v30 = vmax.f32 %v1361_v25, %v1375_v23 }
 0x7da   : > { %v1386_v17 = vpop.permute.xlu1 %1385  ;;  %v1380_v18 = vpop.permute.xlu0 %1379 }
 0x7db   : > { %v1392_v28 = vsel %vm1391_vm4, %v1380_v18, %v1386_v17 }
 0x7dc   : > { %v1394_v34 = vmax.f32 %v1377_v30, %v1392_v28 }
 0x7de   : > { %v1403_v0 = vpop.permute.xlu1 %1402  ;;  %v1397_v26 = vpop.permute.xlu0 %1396 }
 0x7df   : > { %v1409_v32 = vsel %vm1408_vm5, %v1397_v26, %v1403_v0 }
 0x7e0   : > { %v1411_v40 = vmax.f32 %v1394_v34, %v1409_v32 }
 0x7e2   : > { %v1420_v35 = vpop.permute.xlu1 %1419  ;;  %v1414_v36 = vpop.permute.xlu0 %1413 }
 0x7e3   : > { %v1426_v38 = vsel %vm1425_vm6, %v1414_v36, %v1420_v35 }
 0x7e4   : > { %v1428_v43 = vmax.f32 %v1411_v40, %v1426_v38 }
 0x7e6   : > { %v1437_v44 = vpop.permute.xlu1 %1436  ;;  %v1431_v45 = vpop.permute.xlu0 %1430 }
 0x7e7   : > { %v1443_v47 = vsel %vm1442_vm7, %v1431_v45, %v1437_v44 }
 0x7e8   : > { %v1445_v49 = vmax.f32 %v1428_v43, %v1443_v47 }
 0x7ea   : > { %v1439_v51 = vpop.permute.xlu1 %1438  ;;  %1787 = vmatprep.mubr.msk.f32.mxu0 %vm648_vm3, %v1445_v49  ;;  %v1433_v52 = vpop.permute.xlu0 %1432 }
 0x7eb   : > { %v1444_v53 = vsel %vm1442_vm7, %v1433_v52, %v1439_v51 }
 0x7ec   : > { %v1446_v54 = vmax.f32 %v1429_v50, %v1444_v53 }
 0x7ee   : > { %1788 = vmatmul.mubr.msk.f32.vlgmr.msra.gmra.mxu0 %vm648_vm3, %v1446_v54 }
 0x8ae   : > { %v1789_v55 = vpop.f32.mrf.mxu0 }
 0x8af   : > { %1537 = vst.msk [vmem:[%s535_s20 + $0x8] sm:$0xff] %vm1115_vm14, %v1789_v55 }
 0x8b0   : > { %v1527_v56 = vpop.f32.mrf.mxu0 }
 0x8b1   : > { %1536 = vst.msk [vmem:[%s535_s20] sm:$0xff] %vm1115_vm14, %v1527_v56 }
 0x8b2 PF: > { %s26_s21 = sadd.s32 1, %s1841_s21  }
 0x8b3   : > { %p23_p4 = scmp.ge.s32.totalorder %s26_s21, 4  }
 0x8b5   :  { %25 = sbr.rel (!%p23_p4) target bundleno = 5 (0x5), region = 117 }

// kernel: _forward_impl.3
= control target key start
LH: loop header
LB: loop body
LE: loop exit
PB: predicated region body
PF: predicated region fallthrough
CT: control target
= control target key end

     0   :  { %s2656_s21 = smov 0   ;;  %s3546_s0 = inlined_call_operand.vmem [shape: f32[2,3,324], index: 0, kind: input, shape index: {}]   ;;  %s3547_s1 = inlined_call_operand.vmem [shape: bf16[2,27], index: 1, kind: input, shape index: {}]   ;;  %s3548_s2 = inlined_call_operand.vmem [shape: f32[2,1], index: 2, kind: input, shape index: {}]   ;;  %s3549_s3 = inlined_call_operand.vmem [shape: f32[1,324], index: 3, kind: input, shape index: {}, may-alias: {3,6}]   ;;  %s3550_s4 = inlined_call_operand.vmem [shape: bf16[4,18], index: 4, kind: input, shape index: {}]   ;;  %s3551_s5 = inlined_call_operand.vmem [shape: f32[4,1], index: 5, kind: input, shape index: {}, may-alias: {5,8}]   ;;  %s3552_s6 = inlined_call_operand.vmem [shape: f32[1,324], index: 6, kind: input, shape index: {}, may-alias: {3,6}]   ;;  %s3553_s7 = inlined_call_operand.vmem [shape: bf16[4,36], index: 7, kind: input, shape index: {}]   ;;  %s3554_s8 = inlined_call_operand.vmem [shape: f32[4,1], index: 8, kind: input, shape index: {}, may-alias: {5,8}]   ;;  %s3555_s9 = inlined_call_operand.vmem [shape: f32[324,100], index: 9, kind: input, shape index: {}]   ;;  %s3556_s10 = inlined_call_operand.vmem [shape: bf16[8,36], index: 10, kind: input, shape index: {}]   ;;  %s3557_s11 = inlined_call_operand.vmem [shape: f32[8,1], index: 11, kind: input, shape index: {}, may-alias: {11,14}]   ;;  %s3558_s12 = inlined_call_operand.vmem [shape: f32[1,100], index: 12, kind: input, shape index: {}]   ;;  %s3559_s13 = inlined_call_operand.vmem [shape: bf16[8,72], index: 13, kind: input, shape index: {}]   ;;  %s3560_s14 = inlined_call_operand.vmem [shape: f32[8,1], index: 14, kind: input, shape index: {}, may-alias: {11,14}]   ;;  %s3561_s15 = inlined_call_operand.vmem [shape: f32[100,36], index: 15, kind: input, shape index: {}]   ;;  %s3562_s16 = inlined_call_operand.vmem [shape: bf16[2,8,36], index: 16, kind: output, shape index: {}]  }
   0x1   :  { %3604 = sst [smem:[#allocation2_spill]] %s3546_s0 }
   0x2   :  { %3605 = sst [smem:[#allocation3_spill]] %s3547_s1 }
   0x3   :  { %3606 = sst [smem:[#allocation4_spill]] %s3548_s2 }
   0x4   :  { %3607 = sst [smem:[#allocation5_spill]] %s3549_s3 }
   0x5 LB: > { %s2265_s22 = sadd.s32 4294967295, %s2535_s21   ;;  %p2269_p0 = scmp.ge.s32.totalorder %s2535_s21, 1  ;;  %s2535_s21 = sphi %s2656_s21, %s26_s21  }
   0x6   : > { %p462_p1 = scmp.lt.s32.totalorder %s2535_s21, 3 }
   0x8   : > { %p463_p2 = pnand %p2269_p0, %p462_p1 }
   0x9   : > { %p511_p3 = scmp.lt.s32.totalorder (!%p463_p2), %s2265_s22, 1  ;;  %s3608_s26 = sld [smem:[#allocation2_spill]] (!%p463_p2) }
   0xa   : > { %466 = sbr.rel (%p463_p2) target bundleno = 2529 (0x9e1), region = 84  ;;  %s3597_s28 = smov (!%p463_p2), 127  }
   0xb   : > { %s3569_s29 = smov (!%p463_p2), 110   ;;  %s3591_s30 = smov (!%p463_p2), 18  }
   0xc   : > { %s2540_s0 = smov (!%p463_p2), 111   ;;  %s3567_s17 = smov (!%p463_p2), 67  }
   0xd   : > { %s2542_s18 = smov (!%p463_p2), 78   ;;  %s3563_s19 = smov (!%p463_p2), 50  }
   0xe   : > { %s3595_s20 = smov (!%p463_p2), 1   ;;  %s2546_s24 = smov (!%p463_p2), 61  }
   0xf   : > { %s3698_s22 = smov (!%p511_p3, %s2265_s22), 1  ;;  %s3565_s25 = smov 51   ;;  %v2550_v6 = vmov 0.0   ;;  %v2551_v7 = vmov 0   ;;  %vm3578_vm0 = vmmov 0   ;;  %vm3575_vm1 = vcmask 1039360  }
  0x10   : > { %s2468_s23 = smul.u32 12, %s3698_s22  ;;  %2368 = vmatprep.subr.bf16.mxu1 %v2550_v6  ;;  %896 = vmatprep.mubr.bf16.mxu0 %v2551_v7  ;;  %s3609_s2 = sld [smem:[#allocation4_spill]]  ;;  %vm3573_vm2 = vcmask 900096   ;;  %vm3574_vm3 = vcmask 908288   ;;  %vm3581_vm4 = vcmask 1040384   ;;  %vm779_vm5 = vcmask 1042432  }
  0x11   : > { %2511 = vset.pattern.permute.xlu0 %v2551_v7  ;;  %2512 = vset.pattern.permute.xlu1 %v2551_v7  ;;  %vm792_vm6 = vcmask 1044480   ;;  %vm831_vm7 = vsmask.f32 2304  ;;  %vm3576_vm8 = vcmask 891904   ;;  %vm798_vm9 = vcmask 1045504   ;;  %s3620_s1 = sld [smem:[#allocation3_spill]] }
  0x12   : > { %s515_s27 = scalar_lea.vmem %s3608_s26, %s2468_s23  ;;  %s3571_s23 = smov 109   ;;  %2372 = vmatprep.mubr.msk.bf16.mxu1 %vm3578_vm0, %v2550_v6  ;;  %v2556_v44 = vmov 65535   ;;  %vm2789_vm10 = vmand %vm779_vm5, %vm831_vm7  ;;  %vm3580_vm11 = vcmask 1043456   ;;  %vm560_vm12 = vcmask 146432   ;;  %vm3577_vm13 = vcmask 547840  }
  0x13   : > { %v522_v0 = vld [vmem:[%s515_s27 + $0x8] sm:$0x7]  ;;  %v521_v1 = vld [vmem:[%s515_s27] sm:$0x77]  ;;  %s3585_s26 = smov 17   ;;  %s3587_s27 = smov 19  }
  0x14   : > { %v2670_v2 = vpack.c.bf16 %v522_v0, %v522_v0  ;;  %v2672_v3 = vpack.c.bf16 %v521_v1, %v521_v1  ;;  %v526_v4 = vcombine.high %v521_v1, %v521_v1  ;;  %v856_v45 = vsel %vm792_vm6, 4294967295, %v2556_v44  ;;  %s3622_s3 = sld [smem:[#allocation5_spill]] }
  0x15   : > { %v2797_v58 = vsel %vm798_vm9, %v856_v45, 0  ;;  %vm590_vm14 = vcmask 7168   ;;  %vm3582_vm15 = vcmask 408576   ;;  %vm3583_vm7 = vcmask 416768  }
  0x16   : > { %601 = vrot.lane.b32.xlu0 %v2670_v2, %s3597_s28  ;;  %597 = vrot.lane.b32.xlu1 %v2672_v3, %s3597_s28  ;;  %v2682_v5 = vpack.c.bf16 %v526_v4, %v526_v4  ;;  %v524_v8 = vld [vmem:[%s3609_s2] sm:$0x3]  ;;  %vm811_vm0 = vcmask 1047552   ;;  %s3676_s2 = smov 127  }
  0x1a   : > { %631 = vrot.lane.b32.xlu0 %v2670_v2, %s3569_s29  ;;  %627 = vrot.lane.b32.xlu1 %v2672_v3, %s3569_s29 }
  0x1e   : > { %554 = vrot.lane.b32.xlu0 %v2672_v3, %s3591_s30  ;;  %629 = vrot.lane.b32.xlu1 %v2682_v5, %s3569_s29  ;;  %s3623_s29 = smov 109  }
  0x22   : > { %556 = vrot.lane.b32.xlu1 %v2682_v5, %s3591_s30  ;;  %599 = vrot.lane.b32.xlu0 %v2682_v5, %s3597_s28 }
  0x26   : > { %614 = vrot.lane.b32.xlu1 %v2682_v5, %s2540_s0  ;;  %606 = vrot.lane.b32.xlu0 %v2672_v3, %s3567_s17  ;;  %s3589_s17 = smov 49  }
  0x2a   : > { %552 = vrot.lane.b32.xlu1 %v2670_v2, %s2542_s18  ;;  %616 = vrot.lane.b32.xlu0 %v2670_v2, %s2540_s0 }
  0x2e   : > { %636 = vrot.lane.b32.xlu1 %v2672_v3, %s3563_s19  ;;  %612 = vrot.lane.b32.xlu0 %v2672_v3, %s2540_s0  ;;  %s3584_s19 = smov 77  }
  0x32   : > { %586 = vrot.lane.b32.xlu1 %v2682_v5, %s3595_s20  ;;  %584 = vrot.lane.b32.xlu0 %v2672_v3, %s3595_s20 }
  0x36   : > { %646 = vrot.lane.b32.xlu1 %v2670_v2, %s3571_s23  ;;  %644 = vrot.lane.b32.xlu0 %v2682_v5, %s3571_s23 }
  0x3a   : > { %642 = vrot.lane.b32.xlu1 %v2672_v3, %s3571_s23  ;;  %582 = vrot.lane.b32.xlu0 %v2670_v2, %s2546_s24  ;;  %s3624_s23 = smov 110  }
  0x3e   : > { %621 = vrot.lane.b32.xlu1 %v2672_v3, %s3565_s25  ;;  %558 = vrot.lane.b32.xlu0 %v2670_v2, %s3591_s30  ;;  %s2554_s25 = smov 79  }
  0x42   : > { %571 = vrot.lane.b32.xlu1 %v2682_v5, %s3585_s26  ;;  %569 = vrot.lane.b32.xlu0 %v2672_v3, %s3585_s26 }
  0x46   : > { %538 = vrot.lane.b32.xlu1 %v2682_v5, %s3587_s27  ;;  %536 = vrot.lane.b32.xlu0 %v2672_v3, %s3587_s27 }
  0x4a   : > { %588 = vrot.lane.b32.xlu1 %v2670_v2, %s3595_s20  ;;  %567 = vrot.lane.b32.xlu0 %v2670_v2, %s3584_s19 }
  0x4e   : > { %532 = vrot.lane.b32.xlu1 %v2670_v2, %s2554_s25  ;;  %651 = vrot.lane.b32.xlu0 %v2672_v3, %s3589_s17 }
  0x52   : > { %540 = vrot.lane.b32.xlu1 %v2670_v2, %s3587_s27  ;;  %573 = vrot.lane.b32.xlu0 %v2670_v2, %s3585_s26 }
  0x56   : > { %848 = vperm.xlu0 %2511, %v524_v8  }
  0x88   : > { %v2749_v9 = vpop.permute.xlu0 %601  ;;  %v598_v10 = vpop.permute.xlu1 %597 }
  0x8c   : > { %v2751_v11 = vpop.permute.xlu0 %631  ;;  %v628_v12 = vpop.permute.xlu1 %627 }
  0x90   : > { %v2753_v13 = vpop.permute.xlu0 %554  ;;  %v630_v14 = vpop.permute.xlu1 %629 }
  0x91   : > { %v635_v22 = vsel %vm3573_vm2, %v630_v14, %v2751_v11  ;;  %v634_v27 = vsel %vm3573_vm2, %v628_v12, %v630_v14  ;;  %vm3593_vm2 = vcmask 138240  }
  0x92   : > { %v752_v28 = vshrl.u32 %v635_v22, 16  ;;  %v755_v29 = vshll.u32 %v635_v22, 16  ;;  %v744_v33 = vshrl.u32 %v634_v27, 16  ;;  %v747_v38 = vshll.u32 %v634_v27, 16 }
  0x94   : > { %v2755_v15 = vpop.permute.xlu1 %556  ;;  %v600_v16 = vpop.permute.xlu0 %599  ;;  %v754_v39 = vrot.slane %v752_v28, 5  ;;  %v757_v40 = vrot.slane %v755_v29, 6  ;;  %v746_v52 = vrot.slane %v744_v33, 5  ;;  %v749_v53 = vrot.slane %v747_v38, 6 }
  0x95   : > { %v605_v19 = vsel %vm3575_vm1, %v600_v16, %v2749_v9  ;;  %v604_v24 = vsel %vm3575_vm1, %v598_v10, %v600_v16  ;;  %v561_v1 = vsel %vm560_vm12, %v2753_v13, %v2755_v15  ;;  %vm773_vm1 = vcmask 1041408  }
  0x96   : > { %v721_v23 = vshll.u32 %v605_v19, 16  ;;  %v717_v31 = vshll.u32 %v604_v24, 16  ;;  %v730_v34 = vshrl.u32 %v605_v19, 16  ;;  %v727_v46 = vshrl.u32 %v604_v24, 16 }
  0x97   : > { %v758_v54 = vor.u32 %v757_v40, %v754_v39  ;;  %v750_v0 = vor.u32 %v749_v53, %v746_v52  ;;  %v665_v16 = vshrl.u32 %v561_v1, 16 }
  0x98   : > { %v615_v17 = vpop.permute.xlu1 %614  ;;  %v2757_v18 = vpop.permute.xlu0 %606  ;;  %v2773_v32 = vrot.slane %v721_v23, 1  ;;  %v2780_v42 = vrot.slane %v717_v31, 1 }
  0x99   : > { %v611_v19 = vsel %vm3577_vm13, %v2749_v9, %v2757_v18  ;;  %vm793_vm13 = vsmask.f32 4352 }
  0x9a   : > { %v732_v43 = vor.u32 %v730_v34, %v2773_v32  ;;  %v729_v56 = vor.u32 %v727_v46, %v2780_v42  ;;  %v724_v29 = vshll.u32 %v611_v19, 16 }
  0x9c   : > { %v2761_v20 = vpop.permute.xlu1 %552  ;;  %v2763_v21 = vpop.permute.xlu0 %616 }
  0x9d   : > { %v620_v30 = vsel %vm3574_vm3, %v615_v17, %v2763_v21  ;;  %v566_v9 = vsel %vm560_vm12, %v2761_v20, %v2753_v13 }
  0x9e   : > { %v741_v35 = vrot.slane %v620_v30, 7  ;;  %v667_v30 = vrot.slane %v665_v16, 6  ;;  %v657_v13 = vshrl.u32 %v566_v9, 16  ;;  %v660_v20 = vshll.u32 %v566_v9, 16 }
  0xa0   : > { %v2768_v25 = vpop.permute.xlu1 %636  ;;  %v613_v26 = vpop.permute.xlu0 %612  ;;  %v824_v50 = vsel %vm3581_vm4, %v732_v43, %v741_v35  ;;  %v714_v35 = vrot.slane %v2682_v5, 2 }
  0xa1   : > { %v619_v41 = vsel %vm3574_vm3, %v613_v26, %v615_v17  ;;  %v834_v59 = vsel %vm2789_vm10, %v824_v50, %v758_v54  ;;  %v668_v17 = vshll.u32 %v561_v1, 16  ;;  %vm3594_vm3 = vcmask 154624  }
  0xa2   : > { %v740_v47 = vrot.slane %v619_v41, 7  ;;  %v641_v34 = vsel %vm3582_vm15, %v2751_v11, %v2768_v25  ;;  %v2829_v41 = vrot.slane %v724_v29, 1  ;;  %v733_v25 = vshrl.u32 %v611_v19, 16 }
  0xa3   : > { %v670_v31 = vrot.slane %v668_v17, 7  ;;  %v759_v44 = vshrl.u32 %v641_v34, 16  ;;  %v762_v45 = vshll.u32 %v641_v34, 16 }
  0xa4   : > { %v2775_v36 = vpop.permute.xlu1 %586  ;;  %v2777_v37 = vpop.permute.xlu0 %584  ;;  %v820_v60 = vsel %vm3581_vm4, %v729_v56, %v740_v47  ;;  %vm653_vm4 = vcmask 400384  }
  0xa5   : > { %v591_v12 = vsel %vm590_vm14, %v2777_v37, %v2775_v36  ;;  %v833_v14 = vsel %vm2789_vm10, %v820_v60, %v750_v0  ;;  %v671_v5 = vor.u32 %v670_v31, %v667_v30  ;;  %v662_v60 = vrot.slane %v660_v20, 7 }
  0xa6   : > { %v695_v27 = vshrl.u32 %v591_v12, 16  ;;  %v698_v28 = vshll.u32 %v591_v12, 16  ;;  %v764_v12 = vrot.slane %v762_v45, 6 }
  0xa8   : > { %v2784_v48 = vpop.permute.xlu1 %646  ;;  %v645_v49 = vpop.permute.xlu0 %644  ;;  %v697_v38 = vrot.slane %v695_v27, 3  ;;  %v700_v39 = vrot.slane %v698_v28, 4  ;;  %v713_v27 = vrot.slane %v2672_v3, 2 }
  0xa9   : > { %v650_v55 = vsel %vm3576_vm8, %v645_v49, %v2784_v48 }
  0xaa   : > { %v771_v57 = vrot.slane %v650_v55, 4  ;;  %v701_v54 = vor.u32 %v700_v39, %v697_v38 }
  0xac   : > { %v643_v61 = vpop.permute.xlu1 %642  ;;  %v583_v62 = vpop.permute.xlu0 %582  ;;  %v842_v63 = vsel %vm3580_vm11, %v834_v59, %v771_v57  ;;  %v659_v59 = vrot.slane %v657_v13, 6 }
  0xad   : > { %v649_v4 = vsel %vm3576_vm8, %v643_v61, %v645_v49  ;;  %v860_v8 = vand.u32 %v2797_v58, %v842_v63  ;;  %vm774_vm8 = vsmask.f32 1280  ;;  %v596_v43 = vsel %vm590_vm14, %v583_v62, %v2777_v37 }
  0xae   : > { %v770_v10 = vrot.slane %v649_v4, 4  ;;  %vm2835_vm15 = vmand %vm773_vm1, %vm774_vm8  ;;  %v687_v55 = vshrl.u32 %v596_v43, 16  ;;  %v690_v56 = vshll.u32 %v596_v43, 16  ;;  %v663_v28 = vor.u32 %v662_v60, %v659_v59 }
  0xaf   : > { %876 = vmatprep.subr.bf16.mxu0 %v860_v8  ;;  %vm2846_vm8 = vmand %vm792_vm6, %vm793_vm13  ;;  %vm3621_vm13 = vmmov 0  }
  0xb0   : > { %v622_v22 = vpop.permute.xlu1 %621  ;;  %v559_v23 = vpop.permute.xlu0 %558  ;;  %v839_v24 = vsel %vm3580_vm11, %v833_v14, %v770_v10  ;;  %vm812_vm11 = vsmask.f32 7424  ;;  %v761_v10 = vrot.slane %v759_v44, 5  ;;  %v689_v17 = vrot.slane %v687_v55, 3 }
  0xb1   : > { %v858_v26 = vand.u32 %v2797_v58, %v839_v24  ;;  %v626_v49 = vsel %vm3583_vm7, %v2763_v21, %v622_v22  ;;  %v562_v50 = vsel %vm560_vm12, %v2755_v15, %v559_v23  ;;  %v735_v21 = vor.u32 %v733_v25, %v2829_v41  ;;  %vm2856_vm7 = vmand %vm811_vm0, %vm812_vm11 }
  0xb2   : > { %v742_v62 = vrot.slane %v626_v49, 7  ;;  %v673_v63 = vshrl.u32 %v562_v50, 16  ;;  %v676_v0 = vshll.u32 %v562_v50, 16  ;;  %v692_v19 = vrot.slane %v690_v56, 4 }
  0xb3   : > { %877 = vmatpush1.bf16.msra.mxu0 %v858_v26  ;;  %vm3618_vm0 = vcmask 1040384   ;;  %v765_v34 = vor.u32 %v764_v12, %v761_v10  ;;  %vm3619_vm11 = vcmask 1043456   ;;  %v715_v55 = vrot.slane %v2670_v2, 2 }
  0xb4   : > { %v2821_v18 = vpop.permute.xlu1 %571  ;;  %v570_v33 = vpop.permute.xlu0 %569  ;;  %v828_v29 = vsel %vm3618_vm0, %v735_v21, %v742_v62  ;;  %v675_v30 = vrot.slane %v673_v63, 6 }
  0xb5   : > { %v576_v40 = vsel %vm3593_vm2, %v570_v33, %v2821_v18  ;;  %v835_v43 = vsel %vm2789_vm10, %v828_v29, %v765_v34  ;;  %vm851_vm10 = vcmask 220160  }
  0xb6   : > { %v685_v52 = vrot.slane %v576_v40, 5 }
  0xb8   : > { %v539_v46 = vpop.permute.xlu1 %538  ;;  %v537_v47 = vpop.permute.xlu0 %536 }
  0xb9   : > { %v543_v37 = vsel %vm3594_vm3, %v537_v47, %v539_v46 }
  0xba   : > { %v777_v57 = vsel %vm2835_vm15, %v543_v37, %v671_v5 }
  0xbb   : > { %v786_v15 = vsel %vm779_vm5, %v777_v57, %v685_v52 }
  0xbc   : > { %v589_v1 = vpop.permute.xlu1 %588  ;;  %v568_v4 = vpop.permute.xlu0 %567  ;;  %v796_v8 = vsel %vm2846_vm8, %v786_v15, %v701_v54 }
  0xbd   : > { %v592_v14 = vsel %vm590_vm14, %v2775_v36, %v589_v1  ;;  %v805_v16 = vsel %vm798_vm9, %v796_v8, %v714_v35  ;;  %v581_v22 = vsel %vm3593_vm2, %v568_v4, %v570_v33  ;;  %v678_v36 = vrot.slane %v676_v0, 7 }
  0xbe   : > { %v815_v23 = vsel %vm2856_vm7, %v805_v16, %v2773_v32  ;;  %v703_v24 = vshrl.u32 %v592_v14, 16  ;;  %v706_v26 = vshll.u32 %v592_v14, 16  ;;  %v684_v35 = vrot.slane %v581_v22, 5 }
  0xbf   : > { %878 = vmatprep.subr.bf16.mxu0 %v815_v23  ;;  %v693_v32 = vor.u32 %v692_v19, %v689_v17  ;;  %v679_v5 = vor.u32 %v678_v36, %v675_v30 }
  0xc0   : > { %v533_v31 = vpop.permute.xlu1 %532  ;;  %v652_v9 = vpop.permute.xlu0 %651  ;;  %v705_v3 = vrot.slane %v703_v24, 3  ;;  %v708_v13 = vrot.slane %v706_v26, 4 }
  0xc1   : > { %v550_v33 = vsel %vm3594_vm3, %v533_v31, %v537_v47  ;;  %v656_v38 = vsel %vm653_vm4, %v2784_v48, %v652_v9  ;;  %v969_v31 = vld [vmem:[%s3551_s5] sm:$0xf] }
  0xc2   : > { %v776_v39 = vsel %vm2835_vm15, %v550_v33, %v663_v28  ;;  %v772_v40 = vrot.slane %v656_v38, 4  ;;  %v709_v56 = vor.u32 %v708_v13, %v705_v3 }
  0xc3   : > { %v782_v20 = vsel %vm779_vm5, %v776_v39, %v684_v35 }
  0xc4   : > { %v541_v25 = vpop.permute.xlu1 %540  ;;  %v574_v44 = vpop.permute.xlu0 %573  ;;  %v795_v45 = vsel %vm2846_vm8, %v782_v20, %v693_v32  ;;  %v845_v48 = vsel %vm3619_vm11, %v835_v43, %v772_v40 }
  0xc5   : > { %v544_v47 = vsel %vm3594_vm3, %v539_v46, %v541_v25  ;;  %v577_v49 = vsel %vm3593_vm2, %v2821_v18, %v574_v44  ;;  %v801_v50 = vsel %vm798_vm9, %v795_v45, %v713_v27  ;;  %v862_v52 = vand.u32 %v2797_v58, %v845_v48  ;;  %v523_v18 = vld [vmem:[%s3620_s1] sm:$0x1]  ;;  %s2563_s1 = smov 118  }
  0xc6   : > { %v778_v51 = vsel %vm2835_vm15, %v544_v47, %v679_v5  ;;  %v686_v37 = vrot.slane %v577_v49, 5  ;;  %v814_v54 = vsel %vm2856_vm7, %v801_v50, %v2780_v42  ;;  %v950_v42 = vlaneseq  ;;  %vm3628_vm15 = vmmov %vm3618_vm0 }
  0xc7   : > { %879 = vmatpush1.bf16.msra.mxu0 %v814_v54  ;;  %2369 = vmatpush3.bf16.msra.mxu1 %v862_v52 }
  0xc8   : > { %v790_v58 = vsel %vm779_vm5, %v778_v51, %v686_v37  ;;  %2370 = vmatprep.subr.bf16.mxu1 %v2550_v6  ;;  %v2908_v57 = vshrl.u32 %v950_v42, 7 }
  0xc9   : > { %v797_v11 = vsel %vm2846_vm8, %v790_v58, %v709_v56  ;;  %vm3630_vm8 = vmmov %vm3618_vm0 }
  0xca   : > { %v809_v46 = vsel %vm798_vm9, %v797_v11, %v715_v55  ;;  %2272 = vmatmul.mubr.msk.bf16.vlgmr.msra.gmra.mxu0 %vm851_vm10, %v523_v18  ;;  %v960_v59 = vsub.s32 2, %v2908_v57  ;;  %v952_v17 = vsub.s32 0, %v2908_v57  ;;  %v956_v27 = vsub.s32 1, %v2908_v57  ;;  %v1277_v57 = vld [vmem:[%s3554_s8] sm:$0xf] }
  0xcb   : > { %v816_v2 = vsel %vm2856_vm7, %v809_v46, %v2829_v41  ;;  %1204 = vmatprep.mubr.bf16.mxu0 %v2551_v7  ;;  %v948_v41 = vld [vmem:[%s3622_s3] sm:$0x7]  ;;  %vm3629_vm7 = vmmov %vm3618_vm0  ;;  %vm3631_vm0 = vcmask 891904   ;;  %s2565_s3 = smov 38  }
  0xcc   : > { %2371 = vmatpush3.bf16.msra.mxu1 %v816_v2  ;;  %v961_v63 = vrot.slane %v948_v41, %v960_v59  ;;  %v953_v22 = vrot.slane %v948_v41, %v952_v17  ;;  %v957_v29 = vrot.slane %v948_v41, %v956_v27  ;;  %vm3632_vm11 = vmmov %vm3631_vm0 }
  0xcd   : > { %2376 = vmatprep.subr.bf16.mxu1 %v2550_v6 }
  0xcf   : > { %2373 = vmatmul.mubr.msk.bf16.vlgmr.msra.gmra.mxu1 %vm851_vm10, %v523_v18  ;;  %vm3633_vm10 = vmmov %vm3629_vm7 }
  0xd0   : > { %2380 = vmatprep.mubr.msk.bf16.mxu1 %vm3621_vm13, %v2550_v6 }
  0xd1   : > { %v849_v60 = vpop.permute.xlu0 %848 }
 0x18a   : > { %v898_v53 = vpop.f32.mrf.mxu0 }
 0x18b   : > { %v899_v16 = vadd.f32 %v898_v53, %v849_v60 }
 0x18c   : > { %v900_v21 = vpop.f32.mrf.mxu0 }
 0x18d   : > { %v945_v19 = vmax.f32 %v899_v16, 0.0  ;;  %v901_v26 = vadd.f32 %v900_v21, %v849_v60 }
 0x18e   : > { %v902_v15 = vpop.f32.mrf.mxu0 }
 0x18f   : > { %v939_v61 = vpop.f32.mrf.mxu1  ;;  %v965_v23 = vmul.f32 %v953_v22, %v945_v19  ;;  %v946_v28 = vmax.f32 %v901_v26, 0.0 }
 0x190   : > { %v940_v62 = vadd.f32 %v939_v61, %v849_v60  ;;  %v903_v0 = vpop.f32.mrf.mxu0 }
 0x191   : > { %v2374_v1 = vpop.f32.mrf.mxu1  ;;  %v2945_v24 = vpack.c.bf16 %v965_v23, %v965_v23  ;;  %v966_v30 = vmul.f32 %v957_v29, %v946_v28 }
 0x192   : > { %v947_v4 = vmax.f32 %v940_v62, 0.0 }
 0x193   : > { %v942_v8 = vpop.f32.mrf.mxu1  ;;  %v2966_v36 = vpack.c.bf16 %v966_v30, %v966_v30 }
 0x194   : > { %v967_v10 = vmul.f32 %v961_v63, %v947_v4 }
 0x195   : > { %v2375_v12 = vpop.f32.mrf.mxu1 }
 0x196   : > { %v2916_v14 = vpack.c.bf16 %v967_v10, %v967_v10 }
 0x198   : > { %1002 = vrot.lane.b32.xlu1 %v2916_v14, %s3584_s19  ;;  %989 = vrot.lane.b32.xlu0 %v2916_v14, %s2542_s18  ;;  %s3625_s19 = smov 67  }
 0x19c   : > { %995 = vrot.lane.b32.xlu1 %v2916_v14, %s3591_s30  ;;  %974 = vrot.lane.b32.xlu0 %v2916_v14, %s2554_s25 }
 0x1a0   : > { %1008 = vrot.lane.b32.xlu1 %v2916_v14, %s3585_s26  ;;  %1015 = vrot.lane.b32.xlu0 %v2916_v14, %s2546_s24 }
 0x1a4   : > { %1032 = vrot.lane.b32.xlu1 %v2916_v14, %s3597_s28  ;;  %982 = vrot.lane.b32.xlu0 %v2916_v14, %s3587_s27 }
 0x1a8   : > { %1021 = vrot.lane.b32.xlu1 %v2916_v14, %s3595_s20  ;;  %1045 = vrot.lane.b32.xlu0 %v2916_v14, %s2540_s0 }
 0x1ac   : > { %1071 = vrot.lane.b32.xlu1 %v2916_v14, %s3623_s29  ;;  %1058 = vrot.lane.b32.xlu0 %v2916_v14, %s3624_s23 }
 0x1b0   : > { %1017 = vrot.lane.b32.xlu0 %v2945_v24, %s3595_s20  ;;  %991 = vrot.lane.b32.xlu1 %v2945_v24, %s3591_s30 }
 0x1b4   : > { %1028 = vrot.lane.b32.xlu0 %v2945_v24, %s3597_s28  ;;  %1004 = vrot.lane.b32.xlu1 %v2945_v24, %s3585_s26 }
 0x1b8   : > { %1041 = vrot.lane.b32.xlu0 %v2945_v24, %s2540_s0  ;;  %978 = vrot.lane.b32.xlu1 %v2945_v24, %s3587_s27 }
 0x1bc   : > { %1054 = vrot.lane.b32.xlu0 %v2945_v24, %s3624_s23  ;;  %1067 = vrot.lane.b32.xlu1 %v2945_v24, %s3623_s29 }
 0x1c0   : > { %1006 = vrot.lane.b32.xlu0 %v2966_v36, %s3585_s26  ;;  %1036 = vrot.lane.b32.xlu1 %v2945_v24, %s3625_s19  ;;  %s3626_s26 = smov 51  }
 0x1c4   : > { %980 = vrot.lane.b32.xlu0 %v2966_v36, %s3587_s27  ;;  %1075 = vrot.lane.b32.xlu1 %v2945_v24, %s3589_s17  ;;  %s3647_s17 = smov 77   ;;  %s3648_s27 = smov 18  }
 0x1c8   : > { %1030 = vrot.lane.b32.xlu0 %v2966_v36, %s3597_s28  ;;  %993 = vrot.lane.b32.xlu1 %v2966_v36, %s3591_s30  ;;  %s3627_s30 = smov 50  }
 0x1cc   : > { %1069 = vrot.lane.b32.xlu0 %v2966_v36, %s3623_s29  ;;  %1019 = vrot.lane.b32.xlu1 %v2966_v36, %s3595_s20  ;;  %s3649_s20 = smov 17  }
 0x1d0   : > { %1049 = vrot.lane.b32.xlu0 %v2945_v24, %s3626_s26  ;;  %1043 = vrot.lane.b32.xlu1 %v2966_v36, %s2540_s0 }
 0x1d4   : > { %1158 = vperm.xlu0 %2511, %v969_v31   ;;  %1056 = vrot.lane.b32.xlu1 %v2966_v36, %s3624_s23 }
 0x1d8   : > { %1062 = vrot.lane.b32.xlu1 %v2945_v24, %s3627_s30 }
 0x20a   : > { %v1003_v9 = vpop.permute.xlu1 %1002  ;;  %v990_v34 = vpop.permute.xlu0 %989 }
 0x20e   : > { %v996_v35 = vpop.permute.xlu1 %995  ;;  %v975_v33 = vpop.permute.xlu0 %974 }
 0x212   : > { %v1009_v38 = vpop.permute.xlu1 %1008  ;;  %v1016_v32 = vpop.permute.xlu0 %1015 }
 0x216   : > { %v2995_v39 = vpop.permute.xlu1 %1032  ;;  %v983_v40 = vpop.permute.xlu0 %982 }
 0x21a   : > { %v1022_v3 = vpop.permute.xlu1 %1021  ;;  %v2997_v13 = vpop.permute.xlu0 %1045 }
 0x21e   : > { %v1072_v20 = vpop.permute.xlu1 %1071  ;;  %v2999_v43 = vpop.permute.xlu0 %1058 }
 0x222   : > { %v1018_v5 = vpop.permute.xlu0 %1017  ;;  %v992_v25 = vpop.permute.xlu1 %991 }
 0x223   : > { %v1001_v37 = vsel %vm560_vm12, %v990_v34, %v992_v25  ;;  %v1027_v2 = vsel %vm590_vm14, %v1016_v32, %v1018_v5  ;;  %v1092_v32 = vrot.slane %v2945_v24, 4 }
 0x224   : > { %v1081_v58 = vrot.slane %v1001_v37, 7  ;;  %v1089_v1 = vrot.slane %v1027_v2, 5 }
 0x226   : > { %v1029_v44 = vpop.permute.xlu0 %1028  ;;  %v1005_v45 = vpop.permute.xlu1 %1004 }
 0x227   : > { %v1014_v46 = vsel %vm3593_vm2, %v1003_v9, %v1005_v45 }
 0x228   : > { %v1085_v62 = vrot.slane %v1014_v46, 6 }
 0x22a   : > { %v1042_v48 = vpop.permute.xlu0 %1041  ;;  %v979_v47 = vpop.permute.xlu1 %978 }
 0x22b   : > { %v988_v56 = vsel %vm3594_vm3, %v975_v33, %v979_v47 }
 0x22c   : > { %v1108_v42 = vsel %vm3629_vm7, %v988_v56, %v1081_v58 }
 0x22d   : > { %v1117_v4 = vsel %vm773_vm1, %v1108_v42, %v1085_v62 }
 0x22e   : > { %v3001_v49 = vpop.permute.xlu0 %1054  ;;  %v1068_v50 = vpop.permute.xlu1 %1067 }
 0x232   : > { %v1007_v52 = vpop.permute.xlu0 %1006  ;;  %v1037_v51 = vpop.permute.xlu1 %1036 }
 0x233   : > { %v1010_v60 = vsel %vm3593_vm2, %v1005_v45, %v1007_v52  ;;  %v1011_v41 = vsel %vm3593_vm2, %v1007_v52, %v1009_v38  ;;  %vm3635_vm2 = vcmask 1039360  }
 0x234   : > { %v1086_v8 = vrot.slane %v1010_v60, 6  ;;  %v1087_v10 = vrot.slane %v1011_v41, 6 }
 0x236   : > { %v981_v54 = vpop.permute.xlu0 %980  ;;  %v1076_v55 = vpop.permute.xlu1 %1075 }
 0x237   : > { %v1079_v18 = vsel %vm653_vm4, %v1072_v20, %v1076_v55  ;;  %v984_v12 = vsel %vm3594_vm3, %v979_v47, %v981_v54  ;;  %v985_v22 = vsel %vm3594_vm3, %v981_v54, %v983_v40  ;;  %vm3636_vm3 = vmmov %vm3635_vm2  ;;  %v1094_v40 = vrot.slane %v2916_v14, 4 }
 0x238   : > { %v1170_v11 = vsel %vm3628_vm15, %v1079_v18, 0  ;;  %vm3634_vm15 = vmmov %vm3629_vm7 }
 0x239   : > { %2377 = vmatpush3.bf16.msra.mxu1 %v1170_v11 }
 0x23a   : > { %v1031_v53 = vpop.permute.xlu0 %1030  ;;  %v994_v21 = vpop.permute.xlu1 %993  ;;  %2378 = vmatprep.subr.bf16.mxu1 %v2550_v6 }
 0x23b   : > { %v997_v15 = vsel %vm560_vm12, %v992_v25, %v994_v21  ;;  %v998_v61 = vsel %vm560_vm12, %v994_v21, %v996_v35  ;;  %v1034_v34 = vsel %vm3635_vm2, %v1029_v44, %v1031_v53  ;;  %v1035_v35 = vsel %vm3636_vm3, %v1031_v53, %v2995_v39 }
 0x23c   : > { %v1082_v63 = vrot.slane %v997_v15, 7  ;;  %v1083_v0 = vrot.slane %v998_v61, 7  ;;  %vm3637_vm2 = vcmask 908288   ;;  %v1096_v52 = vrot.slane %v1034_v34, 3 }
 0x23d   : > { %v1097_v37 = vrot.slane %v1035_v35, 3  ;;  %vm3638_vm3 = vmmov %vm3637_vm2 }
 0x23e   : > { %v1070_v16 = vpop.permute.xlu0 %1069  ;;  %v1020_v19 = vpop.permute.xlu1 %1019  ;;  %v1111_v23 = vsel %vm3630_vm8, %v984_v12, %v1082_v63  ;;  %v1114_v29 = vsel %vm3633_vm10, %v985_v22, %v1083_v0  ;;  %vm3639_vm8 = vcmask 547840   ;;  %vm1146_vm10 = vcmask 1046528  }
 0x23f   : > { %v1073_v26 = vsel %vm3631_vm0, %v1068_v50, %v1070_v16  ;;  %v1074_v28 = vsel %vm3632_vm11, %v1070_v16, %v1072_v20  ;;  %v1023_v31 = vsel %vm590_vm14, %v1018_v5, %v1020_v19  ;;  %v1024_v9 = vsel %vm590_vm14, %v1020_v19, %v1022_v3  ;;  %v1256_v16 = vld [vmem:[%s3552_s6] sm:$0x7] }
 0x240   : > { %v1165_v30 = vsel %vm3634_vm15, %v1073_v26, 0  ;;  %2274 = vmatprep.subr.msk.bf16.mxu0 %vm3629_vm7, %v1074_v28  ;;  %v1090_v33 = vrot.slane %v1023_v31, 5  ;;  %v1091_v38 = vrot.slane %v1024_v9, 5  ;;  %v1119_v20 = vsel %vm773_vm1, %v1111_v23, %v1086_v8 }
 0x241   : > { %1185 = vmatpush1.bf16.msra.mxu0 %v1165_v30  ;;  %v1093_v5 = vrot.slane %v2966_v36, 4  ;;  %v1123_v3 = vsel %vm779_vm5, %v1117_v4, %v1089_v1  ;;  %v1121_v45 = vsel %vm773_vm1, %v1114_v29, %v1087_v10  ;;  %v1040_v54 = vsel %vm3639_vm8, %v2995_v39, %v1037_v51  ;;  %v968_v1 = vld [vmem:[%s3550_s4] sm:$0x3] }
 0x242   : > { %v1044_v25 = vpop.permute.xlu1 %1043  ;;  %v1125_v44 = vsel %vm779_vm5, %v1119_v20, %v1090_v33  ;;  %v1050_v47 = vpop.permute.xlu0 %1049  ;;  %v1127_v24 = vsel %vm779_vm5, %v1121_v45, %v1091_v38  ;;  %vm3640_vm0 = vcmask 1043456   ;;  %vm3641_vm11 = vcmask 416768  }
 0x243   : > { %v1047_v50 = vsel %vm3637_vm2, %v1042_v48, %v1044_v25  ;;  %v1048_v14 = vsel %vm3638_vm3, %v1044_v25, %v2997_v13  ;;  %v1131_v56 = vsel %vm3640_vm0, %v1125_v44, %v1093_v5  ;;  %v1053_v18 = vsel %vm3641_vm11, %v2997_v13, %v1050_v47  ;;  %vm3642_vm15 = vmmov %vm3640_vm0 }
 0x244   : > { %v1100_v36 = vrot.slane %v1047_v50, 2  ;;  %v1101_v55 = vrot.slane %v1048_v14, 2  ;;  %v1137_v48 = vsel %vm792_vm6, %v1131_v56, %v1097_v37  ;;  %v1129_v11 = vsel %vm3642_vm15, %v1123_v3, %v1092_v32  ;;  %vm3643_vm5 = vmmov %vm3640_vm0 }
 0x245   : > { %v1133_v46 = vsel %vm3643_vm5, %v1127_v24, %v1094_v40  ;;  %vm3644_vm7 = vcmask 900096   ;;  %v1098_v51 = vrot.slane %v1040_v54, 3  ;;  %v1135_v42 = vsel %vm792_vm6, %v1129_v11, %v1096_v52 }
 0x246   : > { %v1057_v58 = vpop.permute.xlu1 %1056  ;;  %vm3645_vm2 = vmmov %vm3644_vm7  ;;  %v1102_v13 = vrot.slane %v1053_v18, 2  ;;  %v1143_v60 = vsel %vm798_vm9, %v1137_v48, %v1101_v55  ;;  %v1141_v41 = vsel %vm798_vm9, %v1135_v42, %v1100_v36  ;;  %vm3646_vm3 = vcmask 408576  }
 0x247   : > { %v1060_v2 = vsel %vm3644_vm7, %v3001_v49, %v1057_v58  ;;  %v1061_v39 = vsel %vm3645_vm2, %v1057_v58, %v2999_v43  ;;  %v1139_v49 = vsel %vm792_vm6, %v1133_v46, %v1098_v51  ;;  %v1269_v23 = vrot.slane %v1256_v16, %v960_v59  ;;  %vm3653_vm6 = vmmov %vm3639_vm8 }
 0x248   : > { %v1104_v53 = vrot.slane %v1060_v2, 1  ;;  %v1105_v21 = vrot.slane %v1061_v39, 1  ;;  %v1145_v4 = vsel %vm798_vm9, %v1139_v49, %v1102_v13  ;;  %v1261_v33 = vrot.slane %v1256_v16, %v952_v17  ;;  %vm3654_vm8 = vmmov %vm3641_vm11 }
 0x249   : > { %v1265_v20 = vrot.slane %v1256_v16, %v956_v27  ;;  %vm3655_vm0 = vmmov %vm3646_vm3 }
 0x24a   : > { %v1063_v15 = vpop.permute.xlu1 %1062  ;;  %v1151_v61 = vsel %vm1146_vm10, %v1143_v60, %v1105_v21  ;;  %v1148_v62 = vsel %vm1146_vm10, %v1141_v41, %v1104_v53  ;;  %vm3656_vm11 = vmmov %vm3643_vm5  ;;  %vm3659_vm5 = vcmask 1039360  }
 0x24b   : > { %v1066_v63 = vsel %vm3646_vm3, %v2999_v43, %v1063_v15  ;;  %1186 = vmatprep.subr.bf16.mxu0 %v1151_v61  ;;  %vm3660_vm7 = vmmov %vm3659_vm5  ;;  %vm3661_vm3 = vcmask 154624  }
 0x24c   : > { %v1106_v0 = vrot.slane %v1066_v63, 1  ;;  %1187 = vmatpush1.bf16.msra.mxu0 %v1148_v62 }
 0x24e   : > { %v1154_v8 = vsel %vm1146_vm10, %v1145_v4, %v1106_v0  ;;  %vm3657_vm10 = vcmask 908288  }
 0x24f   : > { %2275 = vmatmul.mubr.msk.bf16.vlgmr.msra.gmra.mxu0 %vm560_vm12, %v968_v1  ;;  %2379 = vmatpush3.bf16.msra.mxu1 %v1154_v8  ;;  %v1159_v12 = vpop.permute.xlu0 %1158  ;;  %vm3658_vm15 = vmmov %vm3657_vm10 }
 0x250   : > { %2384 = vmatprep.subr.bf16.mxu1 %v2550_v6  ;;  %1508 = vmatprep.mubr.bf16.mxu0 %v2551_v7 }
 0x252   : > { %2381 = vmatmul.mubr.msk.bf16.vlgmr.msra.gmra.mxu1 %vm560_vm12, %v968_v1 }
 0x253   : > { %2390 = vmatprep.mubr.msk.bf16.mxu1 %vm3621_vm13, %v2550_v6 }
 0x30f   : > { %v1206_v43 = vpop.f32.mrf.mxu0 }
 0x310   : > { %v1207_v35 = vadd.f32 %v1206_v43, %v1159_v12 }
 0x311   : > { %v1208_v10 = vpop.f32.mrf.mxu0 }
 0x312   : > { %v1247_v19 = vpop.f32.mrf.mxu1  ;;  %v1253_v59 = vmax.f32 %v1207_v35, 0.0  ;;  %v1209_v17 = vadd.f32 %v1208_v10, %v1159_v12 }
 0x313   : > { %v1248_v22 = vadd.f32 %v1247_v19, %v1159_v12  ;;  %v1210_v26 = vpop.f32.mrf.mxu0 }
 0x314   : > { %v2382_v28 = vpop.f32.mrf.mxu1  ;;  %v1273_v38 = vmul.f32 %v1261_v33, %v1253_v59  ;;  %v1254_v40 = vmax.f32 %v1209_v17, 0.0 }
 0x315   : > { %v1255_v7 = vmax.f32 %v1248_v22, 0.0  ;;  %v1211_v29 = vpop.f32.mrf.mxu0 }
 0x316   : > { %v1250_v30 = vpop.f32.mrf.mxu1  ;;  %v3096_v32 = vpack.c.bf16 %v1273_v38, %v1273_v38  ;;  %v1274_v25 = vmul.f32 %v1265_v20, %v1254_v40 }
 0x317   : > { %v1275_v31 = vmul.f32 %v1269_v23, %v1255_v7 }
 0x318   : > { %v2383_v9 = vpop.f32.mrf.mxu1  ;;  %v3124_v5 = vpack.c.bf16 %v1274_v25, %v1274_v25 }
 0x319   : > { %v3076_v34 = vpack.c.bf16 %v1275_v31, %v1275_v31 }
 0x31b   : > { %1353 = vrot.lane.b32.xlu1 %v3076_v34, %s2540_s0  ;;  %1340 = vrot.lane.b32.xlu0 %v3076_v34, %s3597_s28 }
 0x31f   : > { %1366 = vrot.lane.b32.xlu1 %v3076_v34, %s3624_s23  ;;  %1379 = vrot.lane.b32.xlu0 %v3076_v34, %s3623_s29 }
 0x323   : > { %1282 = vrot.lane.b32.xlu1 %v3076_v34, %s2554_s25  ;;  %1297 = vrot.lane.b32.xlu0 %v3076_v34, %s2542_s18  ;;  %s3650_s18 = smov 49   ;;  %s3652_s25 = smov 1  }
 0x327   : > { %1323 = vrot.lane.b32.xlu1 %v3076_v34, %s2546_s24  ;;  %1310 = vrot.lane.b32.xlu0 %v3076_v34, %s3647_s17  ;;  %s3651_s24 = smov 19   ;;  %s2562_s17 = smov 90  }
 0x32b   : > { %1303 = vrot.lane.b32.xlu0 %v3076_v34, %s3648_s27  ;;  %1336 = vrot.lane.b32.xlu1 %v3096_v32, %s3597_s28 }
 0x32f   : > { %1316 = vrot.lane.b32.xlu0 %v3076_v34, %s3649_s20  ;;  %1349 = vrot.lane.b32.xlu1 %v3096_v32, %s2540_s0 }
 0x333   : > { %1375 = vrot.lane.b32.xlu0 %v3096_v32, %s3623_s29  ;;  %1362 = vrot.lane.b32.xlu1 %v3096_v32, %s3624_s23 }
 0x337   : > { %1344 = vrot.lane.b32.xlu0 %v3096_v32, %s3625_s19  ;;  %1299 = vrot.lane.b32.xlu1 %v3096_v32, %s3648_s27 }
 0x33b   : > { %1383 = vrot.lane.b32.xlu0 %v3096_v32, %s3650_s18  ;;  %1357 = vrot.lane.b32.xlu1 %v3096_v32, %s3626_s26  ;;  %s2570_s26 = smov 29  }
 0x33f   : > { %1286 = vrot.lane.b32.xlu0 %v3096_v32, %s3651_s24  ;;  %1312 = vrot.lane.b32.xlu1 %v3096_v32, %s3649_s20 }
 0x343   : > { %1351 = vrot.lane.b32.xlu0 %v3124_v5, %s2540_s0  ;;  %1370 = vrot.lane.b32.xlu1 %v3096_v32, %s3627_s30  ;;  %s3603_s0 = smov 11  }
 0x347   : > { %1364 = vrot.lane.b32.xlu0 %v3124_v5, %s3624_s23  ;;  %1325 = vrot.lane.b32.xlu1 %v3096_v32, %s3652_s25 }
 0x34b   : > { %1301 = vrot.lane.b32.xlu0 %v3124_v5, %s3648_s27  ;;  %1338 = vrot.lane.b32.xlu1 %v3124_v5, %s3597_s28  ;;  %s3599_s28 = smov 10   ;;  %s2566_s27 = smov 9  }
 0x34f   : > { %1314 = vrot.lane.b32.xlu0 %v3124_v5, %s3649_s20  ;;  %1377 = vrot.lane.b32.xlu1 %v3124_v5, %s3623_s29  ;;  %s2561_s20 = smov 119  }
 0x353   : > { %1327 = vrot.lane.b32.xlu0 %v3124_v5, %s3652_s25  ;;  %1288 = vrot.lane.b32.xlu1 %v3124_v5, %s3651_s24 }
 0x357   : > { %1329 = vrot.lane.b32.xlu0 %v3076_v34, %s3652_s25  ;;  %1290 = vrot.lane.b32.xlu1 %v3076_v34, %s3651_s24  ;;  %s2567_s24 = smov 37  }
 0x35b   : > { %1461 = vperm.xlu1 %2512, %v1277_v57  }
 0x38d   : > { %v1354_v27 = vpop.permute.xlu1 %1353  ;;  %v1341_v3 = vpop.permute.xlu0 %1340 }
 0x391   : > { %v1367_v45 = vpop.permute.xlu1 %1366  ;;  %v1380_v44 = vpop.permute.xlu0 %1379 }
 0x395   : > { %v1283_v47 = vpop.permute.xlu1 %1282  ;;  %v1298_v50 = vpop.permute.xlu0 %1297 }
 0x399   : > { %v1324_v52 = vpop.permute.xlu1 %1323  ;;  %v1311_v37 = vpop.permute.xlu0 %1310 }
 0x39d   : > { %v3153_v24 = vpop.permute.xlu0 %1303  ;;  %v1337_v14 = vpop.permute.xlu1 %1336 }
 0x3a1   : > { %v3155_v54 = vpop.permute.xlu0 %1316  ;;  %v1350_v36 = vpop.permute.xlu1 %1349 }
 0x3a5   : > { %v1376_v55 = vpop.permute.xlu0 %1375  ;;  %v1363_v56 = vpop.permute.xlu1 %1362 }
 0x3a9   : > { %v1345_v18 = vpop.permute.xlu0 %1344  ;;  %v1300_v58 = vpop.permute.xlu1 %1299 }
 0x3aa   : > { %v1348_v39 = vsel %vm3653_vm6, %v1341_v3, %v1345_v18  ;;  %v1309_v4 = vsel %vm560_vm12, %v1298_v50, %v1300_v58  ;;  %vm3662_vm6 = vcmask 138240  }
 0x3ab   : > { %v1403_v21 = vrot.slane %v1348_v39, 6  ;;  %v1389_v22 = vrot.slane %v1309_v4, 6  ;;  %v1634_v4 = vld [vmem:[%s3555_s9 + $0x70] sm:$0xff] }
 0x3ad   : > { %v1384_v48 = vpop.permute.xlu0 %1383  ;;  %v1358_v11 = vpop.permute.xlu1 %1357  ;;  %v1443_v61 = vsel %vm773_vm1, %v3076_v34, %v1403_v21 }
 0x3ae   : > { %v1387_v46 = vsel %vm653_vm4, %v1380_v44, %v1384_v48  ;;  %v1361_v51 = vsel %vm3654_vm8, %v1354_v27, %v1358_v11  ;;  %vm3663_vm8 = vmmov %vm3645_vm2 }
 0x3af   : > { %v1474_v2 = vsel %vm773_vm1, %v1387_v46, 0  ;;  %v1407_v13 = vrot.slane %v1361_v51, 4 }
 0x3b0   : > { %2385 = vmatpush3.bf16.msra.mxu1 %v1474_v2 }
 0x3b1   : > { %v1287_v42 = vpop.permute.xlu0 %1286  ;;  %v1313_v53 = vpop.permute.xlu1 %1312  ;;  %2386 = vmatprep.subr.bf16.mxu1 %v2550_v6  ;;  %v1449_v49 = vsel %vm3656_vm11, %v1443_v61, %v1407_v13 }
 0x3b2   : > { %v1296_v7 = vsel %vm3661_vm3, %v1283_v47, %v1287_v42  ;;  %v1322_v29 = vsel %vm3662_vm6, %v1311_v37, %v1313_v53 }
 0x3b3   : > { %v1393_v47 = vrot.slane %v1322_v29, 4  ;;  %v1628_v29 = vld [vmem:[%s3555_s9 + $0x40] sm:$0xff] }
 0x3b5   : > { %v1352_v60 = vpop.permute.xlu0 %1351  ;;  %v1371_v41 = vpop.permute.xlu1 %1370 }
 0x3b6   : > { %v1374_v15 = vsel %vm3655_vm0, %v1367_v45, %v1371_v41  ;;  %v1355_v8 = vsel %vm3657_vm10, %v1350_v36, %v1352_v60  ;;  %v1356_v43 = vsel %vm3658_vm15, %v1352_v60, %v1354_v27  ;;  %vm3664_vm0 = vcmask 891904   ;;  %vm3666_vm10 = vmmov %vm3662_vm6 }
 0x3b7   : > { %v1411_v62 = vrot.slane %v1374_v15, 2  ;;  %v1405_v30 = vrot.slane %v1355_v8, 4  ;;  %v1406_v31 = vrot.slane %v1356_v43, 4  ;;  %vm3665_vm11 = vmmov %vm3664_vm0  ;;  %vm3667_vm15 = vcmask 1043456   ;;  %v1649_v8 = vld [vmem:[%s3555_s9 + $0xe8] sm:$0xff] }
 0x3b8   : > { %v1633_v43 = vld [vmem:[%s3555_s9 + $0x68] sm:$0xff] }
 0x3b9   : > { %v1365_v63 = vpop.permute.xlu0 %1364  ;;  %v1326_v0 = vpop.permute.xlu1 %1325  ;;  %v1457_v1 = vsel %vm798_vm9, %v1449_v49, %v1411_v62  ;;  %v1276_v62 = vld [vmem:[%s3553_s7] sm:$0x3] }
 0x3ba   : > { %2387 = vmatpush3.bf16.msra.mxu1 %v1457_v1  ;;  %v1369_v23 = vsel %vm3645_vm2, %v1365_v63, %v1367_v45  ;;  %v1368_v9 = vsel %vm3663_vm8, %v1363_v56, %v1365_v63  ;;  %v1335_v34 = vsel %vm590_vm14, %v1324_v52, %v1326_v0  ;;  %vm3670_vm2 = vmmov %vm3662_vm6  ;;  %v1651_v63 = vld [vmem:[%s3555_s9 + $0xf8] sm:$0xff]  ;;  %v1650_v1 = vld [vmem:[%s3555_s9 + $0xf0] sm:$0xff] }
 0x3bb   : > { %2388 = vmatprep.subr.bf16.mxu1 %v2550_v6  ;;  %v1410_v17 = vrot.slane %v1369_v23, 2  ;;  %v1409_v50 = vrot.slane %v1368_v9, 2  ;;  %v1397_v52 = vrot.slane %v1335_v34, 2  ;;  %v1630_v23 = vld [vmem:[%s3555_s9 + $0x50] sm:$0xff]  ;;  %v1627_v9 = vld [vmem:[%s3555_s9 + $0x38] sm:$0xff] }
 0x3bc   : > { %v1642_v34 = vld [vmem:[%s3555_s9 + $0xb0] sm:$0xff] }
 0x3bd   : > { %v1302_v10 = vpop.permute.xlu0 %1301  ;;  %v1339_v12 = vpop.permute.xlu1 %1338 }
 0x3be   : > { %v1342_v16 = vsel %vm3659_vm5, %v1337_v14, %v1339_v12  ;;  %v1343_v19 = vsel %vm3660_vm7, %v1339_v12, %v1341_v3  ;;  %v1305_v40 = vsel %vm560_vm12, %v1300_v58, %v1302_v10  ;;  %v1413_v3 = vsel %vm773_vm1, %v1296_v7, %v1389_v22  ;;  %vm3668_vm5 = vmmov %vm3667_vm15  ;;  %v1632_v12 = vld [vmem:[%s3555_s9 + $0x60] sm:$0xff]  ;;  %v1646_v22 = vld [vmem:[%s3555_s9 + $0xd0] sm:$0xff] }
 0x3bf   : > { %v1401_v26 = vrot.slane %v1342_v16, 6  ;;  %v1402_v28 = vrot.slane %v1343_v19, 6  ;;  %v1390_v37 = vrot.slane %v1305_v40, 6  ;;  %v1306_v36 = vsel %vm560_vm12, %v1302_v10, %v3153_v24  ;;  %vm3669_vm7 = vmmov %vm3661_vm3  ;;  %v1648_v10 = vld [vmem:[%s3555_s9 + $0xe0] sm:$0xff]  ;;  %v1647_v16 = vld [vmem:[%s3555_s9 + $0xd8] sm:$0xff] }
 0x3c0   : > { %vm3671_vm3 = vmmov %vm3668_vm5  ;;  %v1391_v39 = vrot.slane %v1306_v36, 6  ;;  %v1631_v19 = vld [vmem:[%s3555_s9 + $0x58] sm:$0xff]  ;;  %v1644_v7 = vld [vmem:[%s3555_s9 + $0xc0] sm:$0xff] }
 0x3c1   : > { %v1437_v35 = vsel %vm773_vm1, %v3096_v32, %v1401_v26  ;;  %v1315_v59 = vpop.permute.xlu0 %1314  ;;  %v1378_v33 = vpop.permute.xlu1 %1377  ;;  %v1440_v38 = vsel %vm773_vm1, %v3124_v5, %v1402_v28  ;;  %vm3672_vm12 = vmmov %vm3669_vm7  ;;  %v1645_v26 = vld [vmem:[%s3555_s9 + $0xc8] sm:$0xff] }
 0x3c2   : > { %v1381_v20 = vsel %vm3664_vm0, %v1376_v55, %v1378_v33  ;;  %v1382_v25 = vsel %vm3665_vm11, %v1378_v33, %v1380_v44  ;;  %v1318_v57 = vsel %vm3666_vm10, %v1313_v53, %v1315_v59  ;;  %v1447_v32 = vsel %vm3667_vm15, %v1440_v38, %v1406_v31  ;;  %vm3673_vm6 = vmmov %vm3671_vm3  ;;  %v1629_v28 = vld [vmem:[%s3555_s9 + $0x48] sm:$0xff] }
 0x3c3   : > { %v1469_v27 = vsel %vm773_vm1, %v1381_v20, 0  ;;  %2277 = vmatprep.subr.msk.bf16.mxu0 %vm773_vm1, %v1382_v25  ;;  %v1454_v5 = vsel %vm798_vm9, %v1447_v32, %v1410_v17  ;;  %v1445_v45 = vsel %vm3668_vm5, %v1437_v35, %v1405_v30  ;;  %v1394_v55 = vrot.slane %v1318_v57, 4  ;;  %vm3674_vm8 = vmmov %vm3671_vm3  ;;  %v1643_v30 = vld [vmem:[%s3555_s9 + $0xb8] sm:$0xff]  ;;  %v1626_v35 = vld [vmem:[%s3555_s9 + $0x30] sm:$0xff] }
 0x3c4   : > { %1487 = vmatpush1.bf16.msra.mxu0 %v1469_v27  ;;  %v1319_v58 = vsel %vm3670_vm2, %v1315_v59, %v3155_v54  ;;  %v1451_v46 = vsel %vm798_vm9, %v1445_v45, %v1409_v50  ;;  %v1421_v54 = vsel %vm3673_vm6, %v1413_v3, %v1393_v47  ;;  %vm1464_vm0 = vcmask 293888   ;;  %v1641_v38 = vld [vmem:[%s3555_s9 + $0xa8] sm:$0xff]  ;;  %v1660_v17 = vld [vmem:[%s3555_s9 + $0x140] sm:$0xf]  ;;  %vm3675_vm11 = vmmov %vm3671_vm3 }
 0x3c5   : > { %v1328_v44 = vpop.permute.xlu0 %1327  ;;  %1488 = vmatprep.subr.bf16.mxu0 %v1454_v5  ;;  %v1289_v14 = vpop.permute.xlu1 %1288  ;;  %v1395_v21 = vrot.slane %v1319_v58, 4  ;;  %v1427_v15 = vsel %vm798_vm9, %v1421_v54, %v1397_v52  ;;  %v1625_v25 = vld [vmem:[%s3555_s9 + $0x28] sm:$0xff]  ;;  %v1640_v57 = vld [vmem:[%s3555_s9 + $0xa0] sm:$0xff]  ;;  %v1659_v27 = vld [vmem:[%s3555_s9 + $0x138] sm:$0xff]  ;;  %vm3677_vm10 = vcmask 1039360   ;;  %vm3679_vm5 = vcmask 900096  }
 0x3c6   : > { %v1331_v56 = vsel %vm590_vm14, %v1326_v0, %v1328_v44  ;;  %v1292_v18 = vsel %vm3669_vm7, %v1287_v42, %v1289_v14  ;;  %v1635_v0 = vld [vmem:[%s3555_s9 + $0x78] sm:$0xff]  ;;  %v1624_v5 = vld [vmem:[%s3555_s9 + $0x20] sm:$0xff]  ;;  %v1638_v58 = vld [vmem:[%s3555_s9 + $0x90] sm:$0xff]  ;;  %vm3681_vm2 = vcmask 891904   ;;  %vm3684_vm6 = vcmask 408576  }
 0x3c7   : > { %v1398_v48 = vrot.slane %v1331_v56, 2  ;;  %v1416_v11 = vsel %vm773_vm1, %v1292_v18, %v1390_v37  ;;  %v1623_v56 = vld [vmem:[%s3555_s9 + $0x18] sm:$0xff]  ;;  %v1652_v54 = vld [vmem:[%s3555_s9 + $0x100] sm:$0xff]  ;;  %vm3678_vm15 = vmmov %vm3677_vm10 }
 0x3c8   : > { %1489 = vmatpush1.bf16.msra.mxu0 %v1451_v46  ;;  %v1423_v2 = vsel %vm3671_vm3, %v1416_v11, %v1394_v55  ;;  %v1622_v11 = vld [vmem:[%s3555_s9 + $0x10] sm:$0xff]  ;;  %vm3680_vm7 = vmmov %vm3679_vm5 }
 0x3c9   : > { %v1330_v51 = vpop.permute.xlu0 %1329  ;;  %v1291_v53 = vpop.permute.xlu1 %1290  ;;  %v1430_v24 = vsel %vm798_vm9, %v1423_v2, %v1398_v48  ;;  %v1657_v48 = vld [vmem:[%s3555_s9 + $0x128] sm:$0xff]  ;;  %vm3682_vm3 = vmmov %vm3681_vm2 }
 0x3ca   : > { %v1332_v13 = vsel %vm590_vm14, %v1328_v44, %v1330_v51  ;;  %v1293_v42 = vsel %vm3672_vm12, %v1289_v14, %v1291_v53  ;;  %1490 = vmatprep.subr.bf16.mxu0 %v1430_v24  ;;  %v1639_v44 = vld [vmem:[%s3555_s9 + $0x98] sm:$0xff]  ;;  %v1658_v14 = vld [vmem:[%s3555_s9 + $0x130] sm:$0xff]  ;;  %v1637_v2 = vld [vmem:[%s3555_s9 + $0x88] sm:$0xff]  ;;  %vm3683_vm12 = vcmask 547840  }
 0x3cb   : > { %v1399_v60 = vrot.slane %v1332_v13, 2  ;;  %v1419_v41 = vsel %vm773_vm1, %v1293_v42, %v1391_v39  ;;  %v1656_v39 = vld [vmem:[%s3555_s9 + $0x120] sm:$0xff]  ;;  %v1621_v51 = vld [vmem:[%s3555_s9 + $0x8] sm:$0xff]  ;;  %v1655_v24 = vld [vmem:[%s3555_s9 + $0x118] sm:$0xff] }
 0x3cc   : > { %1491 = vmatpush1.bf16.msra.mxu0 %v1427_v15  ;;  %v1425_v61 = vsel %vm3674_vm8, %v1419_v41, %v1395_v21  ;;  %v1636_v53 = vld [vmem:[%s3555_s9 + $0x80] sm:$0xff]  ;;  %v1654_v13 = vld [vmem:[%s3555_s9 + $0x110] sm:$0xff]  ;;  %v1653_v42 = vld [vmem:[%s3555_s9 + $0x108] sm:$0xff]  ;;  %vm1661_vm8 = vcmask 556032  }
 0x3cd   : > { %v1433_v49 = vsel %vm798_vm9, %v1425_v61, %v1399_v60  ;;  %2299 = vmatprep.subr.mxu0 %v1651_v63  ;;  %v1620_v21 = vld [vmem:[%s3555_s9] sm:$0xff] }
 0x3ce   : > { %2389 = vmatpush3.bf16.msra.mxu1 %v1433_v49 }
 0x3cf   : > { %2278 = vmatmul.mubr.msk.bf16.vlgmr.msra.gmra.mxu0 %vm1464_vm0, %v1276_v62  ;;  %2394 = vmatprep.subr.mxu1 %v2550_v6 }
 0x3d0   : > { %2300 = vmatpush3.msra.mxu0 %v1635_v0 }
 0x3d1   : > { %2391 = vmatmul.mubr.msk.bf16.vlgmr.msra.gmra.mxu1 %vm1464_vm0, %v1276_v62  ;;  %2301 = vmatprep.subr.mxu0 %v1650_v1 }
 0x3d2   : > { %2412 = vmatprep.mubr.msk.f32.mxu1 %vm3621_vm13, %v2550_v6  ;;  %2302 = vmatpush3.msra.mxu0 %v1634_v4 }
 0x3d3   : > { %2303 = vmatprep.subr.mxu0 %v1649_v8  ;;  %2395 = vmatpush3.msk.msra.mxu1 %vm3675_vm11, %v1660_v17  ;;  %vm1847_vm11 = vcmask 809984  }
 0x3d4   : > { %2304 = vmatpush3.msra.mxu0 %v1633_v43  ;;  %2396 = vmatprep.subr.mxu1 %v2550_v6 }
 0x3d5   : > { %2305 = vmatprep.subr.mxu0 %v1648_v10  ;;  %2397 = vmatpush3.msra.mxu1 %v1659_v27 }
 0x3d6   : > { %2306 = vmatpush3.msra.mxu0 %v1632_v12  ;;  %v1462_v31 = vpop.permute.xlu1 %1461  ;;  %2398 = vmatprep.subr.mxu1 %v2550_v6 }
 0x3d7   : > { %2307 = vmatprep.subr.mxu0 %v1647_v16  ;;  %2399 = vmatpush3.msra.mxu1 %v1658_v14 }
 0x3d8   : > { %2308 = vmatpush3.msra.mxu0 %v1631_v19  ;;  %2400 = vmatprep.subr.mxu1 %v2550_v6 }
 0x3d9   : > { %2309 = vmatprep.subr.mxu0 %v1646_v22  ;;  %2401 = vmatpush3.msra.mxu1 %v1657_v48 }
 0x3da   : > { %2310 = vmatpush3.msra.mxu0 %v1630_v23  ;;  %2402 = vmatprep.subr.mxu1 %v2550_v6 }
 0x3db   : > { %2311 = vmatprep.subr.mxu0 %v1645_v26  ;;  %2403 = vmatpush3.msra.mxu1 %v1656_v39 }
 0x3dc   : > { %2312 = vmatpush3.msra.mxu0 %v1629_v28  ;;  %2404 = vmatprep.subr.mxu1 %v2550_v6 }
 0x3dd   : > { %2313 = vmatprep.subr.mxu0 %v1644_v7  ;;  %2405 = vmatpush3.msra.mxu1 %v1655_v24 }
 0x3de   : > { %2314 = vmatpush3.msra.mxu0 %v1628_v29  ;;  %2406 = vmatprep.subr.mxu1 %v2550_v6 }
 0x3df   : > { %2315 = vmatprep.subr.mxu0 %v1643_v30  ;;  %2407 = vmatpush3.msra.mxu1 %v1654_v13 }
 0x3e0   : > { %2316 = vmatpush3.msra.mxu0 %v1627_v9  ;;  %2408 = vmatprep.subr.mxu1 %v2550_v6 }
 0x3e1   : > { %2317 = vmatprep.subr.mxu0 %v1642_v34  ;;  %2409 = vmatpush3.msra.mxu1 %v1653_v42 }
 0x3e2   : > { %2318 = vmatpush3.msra.mxu0 %v1626_v35  ;;  %2410 = vmatprep.subr.mxu1 %v2550_v6 }
 0x3e3   : > { %2319 = vmatprep.subr.mxu0 %v1641_v38  ;;  %2411 = vmatpush3.msra.mxu1 %v1652_v54 }
 0x3e4   : > { %2320 = vmatpush3.msra.mxu0 %v1625_v25  ;;  %2415 = vmatprep.subr.bf16.mxu1 %v2550_v6 }
 0x3e5   : > { %2321 = vmatprep.subr.mxu0 %v1640_v57 }
 0x3e6   : > { %2322 = vmatpush3.msra.mxu0 %v1624_v5 }
 0x3e7   : > { %2323 = vmatprep.subr.mxu0 %v1639_v44 }
 0x3e8   : > { %2324 = vmatpush3.msra.mxu0 %v1623_v56 }
 0x3e9   : > { %2325 = vmatprep.subr.mxu0 %v1638_v58 }
 0x3ea   : > { %2326 = vmatpush3.msra.mxu0 %v1622_v11 }
 0x3eb   : > { %2327 = vmatprep.subr.mxu0 %v1637_v2 }
 0x3ec   : > { %2328 = vmatpush3.msra.mxu0 %v1621_v51 }
 0x3ed   : > { %2329 = vmatprep.subr.mxu0 %v1636_v53 }
 0x3ee   : > { %2330 = vmatpush3.msra.mxu0 %v1620_v21 }
 0x3ef   : > { %2439 = vmatprep.subr.mxu0 %v2550_v6 }
 0x48f   : > { %v1510_v59 = vpop.f32.mrf.mxu0 }
 0x490   : > { %v1511_v33 = vadd.f32 %v1510_v59, %v1462_v31 }
 0x491   : > { %v1512_v40 = vpop.f32.mrf.mxu0  ;;  %v1551_v20 = vpop.f32.mrf.mxu1 }
 0x492   : > { %v3293_v32 = vadd.f32 %v1512_v40, %v1462_v31  ;;  %v1552_v3 = vadd.f32 %v1551_v20, %v1462_v31  ;;  %v3299_v50 = vmax.f32 %v1511_v33, 0.0 }
 0x493   : > { %v1514_v45 = vpop.f32.mrf.mxu0  ;;  %v2392_v47 = vpop.f32.mrf.mxu1 }
 0x494   : > { %v1558_v52 = vmax.f32 %v3293_v32, 0.0  ;;  %v3302_v37 = vmax.f32 %v1552_v3, 0.0  ;;  %v1809_v47 = vld [vmem:[%s3557_s11] sm:$0xff] }
 0x495   : > { %v1515_v36 = vpop.f32.mrf.mxu0  ;;  %v1554_v55 = vpop.f32.mrf.mxu1 }
 0x496   : > { %1567 = vrot.lane.b32.xlu1 %v3302_v37, %s3676_s2  ;;  %v2513_v18 = vpack.i.bf16 %v3299_v50, %v1558_v52 }
 0x497   : > { %v2393_v46 = vpop.f32.mrf.mxu1 }
 0x498   : > { %2514 = vrot.lane.b32.xlu0 %v2513_v18, %s3676_s2 }
 0x49a   : > { %1586 = vrot.lane.b32.xlu1 %v3302_v37, %s3624_s23 }
 0x49c   : > { %2519 = vrot.lane.b32.xlu0 %v2513_v18, %s3624_s23  ;;  %s3602_s23 = smov 39  }
 0x49e   : > { %1602 = vrot.lane.b32.xlu1 %v3302_v37, %s3623_s29 }
 0x4a0   : > { %2524 = vrot.lane.b32.xlu0 %v2513_v18, %s3623_s29  ;;  %s2559_s29 = smov 117  }
 0x4a2   : > { %1594 = vrot.lane.b32.xlu1 %v3299_v50, %s3627_s30  ;;  %s3600_s30 = smov 99  }
 0x4a4   : > { %1575 = vrot.lane.b32.xlu0 %v3299_v50, %s3625_s19  ;;  %s2558_s19 = smov 89  }
 0x4a8   : > { %1610 = vrot.lane.b32.xlu0 %v3299_v50, %s3650_s18  ;;  %s2560_s18 = smov 91  }
 0x508   : > { %v1568_v60 = vpop.permute.xlu1 %1567 }
 0x50a   : > { %v2515_v41 = vpop.permute.xlu0 %2514 }
 0x50b   : > { %v2517_v62 = vunpack.i.h.bf16 %v2515_v41  ;;  %v2516_v49 = vunpack.i.l.bf16 %v2515_v41 }
 0x50c   : > { %v1587_v15 = vpop.permute.xlu1 %1586 }
 0x50d   : > { %v1570_v8 = vsel %vm3677_vm10, %v2517_v62, %v2516_v49  ;;  %v1571_v43 = vsel %vm3678_vm15, %v2516_v49, %v1568_v60  ;;  %vm1855_vm10 = vcmask 744448   ;;  %vm1863_vm15 = vcmask 736256  }
 0x50e   : > { %v2520_v61 = vpop.permute.xlu0 %2519  ;;  %v1579_v26 = vmax.f32 %v3299_v50, %v1570_v8  ;;  %v1580_v29 = vmax.f32 %v1558_v52, %v1571_v43 }
 0x50f   : > { %v2522_v63 = vunpack.i.h.bf16 %v2520_v61  ;;  %v2521_v0 = vunpack.i.l.bf16 %v2520_v61 }
 0x510   : > { %v1603_v1 = vpop.permute.xlu1 %1602 }
 0x511   : > { %v1589_v16 = vsel %vm3679_vm5, %v2522_v63, %v2521_v0  ;;  %v1590_v19 = vsel %vm3680_vm7, %v2521_v0, %v1587_v15  ;;  %vm3685_vm5 = vcmask 1043456   ;;  %vm1824_vm7 = vcmask 80896  }
 0x512   : > { %v2525_v4 = vpop.permute.xlu0 %2524 }
 0x513   : > { %v2527_v10 = vunpack.i.h.bf16 %v2525_v4  ;;  %v2526_v12 = vunpack.i.l.bf16 %v2525_v4 }
 0x514   : > { %v1595_v31 = vpop.permute.xlu1 %1594 }
 0x515   : > { %v1605_v22 = vsel %vm3681_vm2, %v2527_v10, %v2526_v12  ;;  %v1606_v23 = vsel %vm3682_vm3, %v2526_v12, %v1603_v1  ;;  %v1597_v33 = vsel %vm3684_vm6, %v1587_v15, %v1595_v31  ;;  %vm1816_vm2 = vcmask 89088  }
 0x516   : > { %v1614_v28 = vmax.f32 %v1589_v16, %v1605_v22  ;;  %v1576_v7 = vpop.permute.xlu0 %1575  ;;  %v1615_v30 = vmax.f32 %v1590_v19, %v1606_v23  ;;  %vm1832_vm3 = vcmask 72704   ;;  %v1808_v19 = vld [vmem:[%s3556_s10] sm:$0xf]  ;;  %vm2047_vm6 = vcmask 588800  }
 0x517   : > { %v1578_v35 = vsel %vm3683_vm12, %v1568_v60, %v1576_v7  ;;  %vm3686_vm12 = vmmov %vm3685_vm5 }
 0x518   : > { %v1618_v9 = vmax.f32 %v1580_v29, %v1615_v30  ;;  %v1617_v34 = vmax.f32 %v1579_v26, %v1614_v28  ;;  %v1581_v17 = vmax.f32 %v3302_v37, %v1578_v35  ;;  %v2283_v28 = vld [vmem:[%s3558_s12] ss:$0 sm:$0xff] }
 0x519   : > { %v1962_v35 = vld [vmem:[%s3560_s14] sm:$0xff] }
 0x51a   : > { %v1611_v59 = vpop.permute.xlu0 %1610  ;;  %1732 = vmatprep.mubr.f32.mxu0 %v1618_v9 }
 0x51b   : > { %v1613_v38 = vsel %vm653_vm4, %v1603_v1, %v1611_v59  ;;  %1733 = vmatmul.mubr.f32.vlgmr.msra.gmra.mxu0 %v1617_v34  ;;  %vm1871_vm4 = vcmask 728064  }
 0x51c   : > { %v1616_v40 = vmax.f32 %v1597_v33, %v1613_v38  ;;  %2465 = vmatprep.mubr.msk.f32.mxu0 %vm3621_vm13, %v2550_v6 }
 0x51e   : > { %v1619_v20 = vmax.f32 %v1581_v17, %v1616_v40 }
 0x520   : > { %2413 = vmatmul.mubr.msk.f32.vlgmr.msra.gmra.mxu1 %vm1661_vm8, %v1619_v20 }
 0x521   : > { %2421 = vmatprep.mubr.msk.bf16.mxu1 %vm3621_vm13, %v2550_v6 }
 0x5db   : > { %v2331_v25 = vpop.f32.mrf.mxu0 }
 0x5dd   : > { %v2332_v57 = vpop.f32.mrf.mxu0 }
 0x5de   : > { %v2333_v27 = vadd.f32 %v2332_v57, %v2331_v25 }
 0x5e0   : > { %v1804_v32 = vpop.f32.mrf.mxu1 }
 0x5e1   : > { %v1805_v3 = vadd.f32 %v2333_v27, %v1804_v32 }
 0x5e2   : > { %v2414_v5 = vpop.f32.mrf.mxu1 }
 0x5e3   : > { %v1810_v45 = vpack.c.bf16 %v1805_v3, %v1805_v3 }
 0x5e5   : > { %1845 = vrot.lane.b32.xlu0 %v1810_v45, %s3600_s30  ;;  %1843 = vrot.lane.b32.xlu1 %v1810_v45, %s3676_s2  ;;  %s3689_s30 = smov 11  }
 0x5e9   : > { %1869 = vrot.lane.b32.xlu0 %v1810_v45, %s2558_s19  ;;  %1867 = vrot.lane.b32.xlu1 %v1810_v45, %s2559_s29 }
 0x5ed   : > { %1853 = vrot.lane.b32.xlu0 %v1810_v45, %s2560_s18  ;;  %1851 = vrot.lane.b32.xlu1 %v1810_v45, %s2561_s20 }
 0x5f1   : > { %1861 = vrot.lane.b32.xlu0 %v1810_v45, %s2562_s17  ;;  %1859 = vrot.lane.b32.xlu1 %v1810_v45, %s2563_s1 }
 0x5f5   : > { %1822 = vrot.lane.b32.xlu0 %v1810_v45, %s3599_s28  ;;  %1820 = vrot.lane.b32.xlu1 %v1810_v45, %s2565_s3 }
 0x5f9   : > { %1830 = vrot.lane.b32.xlu0 %v1810_v45, %s2566_s27  ;;  %1828 = vrot.lane.b32.xlu1 %v1810_v45, %s2567_s24 }
 0x5fd   : > { %1814 = vrot.lane.b32.xlu0 %v1810_v45, %s3603_s0  ;;  %1812 = vrot.lane.b32.xlu1 %v1810_v45, %s3602_s23  ;;  %s3687_s0 = smov 99   ;;  %s3688_s23 = smov 10  }
 0x601   : > { %1838 = vrot.lane.b32.xlu0 %v1810_v45, %s3652_s25  ;;  %1836 = vrot.lane.b32.xlu1 %v1810_v45, %s2570_s26 }
 0x605   : > { %1904 = vperm.xlu1 %2512, %v1809_v47  }
 0x657   : > { %v1846_v50 = vpop.permute.xlu0 %1845  ;;  %v1844_v52 = vpop.permute.xlu1 %1843 }
 0x658   : > { %v1850_v55 = vsel %vm1847_vm11, %v1844_v52, %v1846_v50 }
 0x659   : > { %v1882_v48 = vrot.slane %v1850_v55, 6 }
 0x65b   : > { %v1870_v37 = vpop.permute.xlu0 %1869  ;;  %v1868_v44 = vpop.permute.xlu1 %1867  ;;  %v1896_v51 = vsel %vm773_vm1, %v1810_v45, %v1882_v48 }
 0x65c   : > { %v1874_v14 = vsel %vm1871_vm4, %v1868_v44, %v1870_v37 }
 0x65d   : > { %v1910_v36 = vsel %vm773_vm1, %v1874_v14, 0 }
 0x65e   : > { %2416 = vmatpush3.bf16.msra.mxu1 %v1910_v36 }
 0x65f   : > { %v1854_v56 = vpop.permute.xlu0 %1853  ;;  %v1852_v18 = vpop.permute.xlu1 %1851  ;;  %2417 = vmatprep.subr.bf16.mxu1 %v2550_v6 }
 0x660   : > { %v1858_v58 = vsel %vm1855_vm10, %v1852_v18, %v1854_v56 }
 0x661   : > { %v1884_v11 = vrot.slane %v1858_v58, 4 }
 0x663   : > { %v1862_v46 = vpop.permute.xlu0 %1861  ;;  %v1860_v2 = vpop.permute.xlu1 %1859  ;;  %v1898_v24 = vsel %vm3685_vm5, %v1896_v51, %v1884_v11 }
 0x664   : > { %v1866_v39 = vsel %vm1863_vm15, %v1860_v2, %v1862_v46 }
 0x665   : > { %v1886_v53 = vrot.slane %v1866_v39, 2 }
 0x667   : > { %v1823_v21 = vpop.permute.xlu0 %1822  ;;  %v1821_v13 = vpop.permute.xlu1 %1820  ;;  %v1900_v42 = vsel %vm798_vm9, %v1898_v24, %v1886_v53 }
 0x668   : > { %2418 = vmatpush3.bf16.msra.mxu1 %v1900_v42  ;;  %v1827_v41 = vsel %vm1824_vm7, %v1821_v13, %v1823_v21  ;;  %v1961_v13 = vld [vmem:[%s3559_s13] sm:$0xf] }
 0x669   : > { %2419 = vmatprep.subr.bf16.mxu1 %v2550_v6  ;;  %v1876_v49 = vrot.slane %v1827_v41, 6  ;;  %v2131_v42 = vld [vmem:[%s3561_s15 + $0x60] sm:$0xf]  ;;  %v2128_v41 = vld [vmem:[%s3561_s15 + $0x48] sm:$0xff] }
 0x66b   : > { %v1831_v54 = vpop.permute.xlu0 %1830  ;;  %v1829_v60 = vpop.permute.xlu1 %1828 }
 0x66c   : > { %v1835_v63 = vsel %vm1832_vm3, %v1829_v60, %v1831_v54  ;;  %v2130_v54 = vld [vmem:[%s3561_s15 + $0x58] sm:$0xff]  ;;  %v2129_v60 = vld [vmem:[%s3561_s15 + $0x50] sm:$0xff] }
 0x66d   : > { %v1878_v8 = vrot.slane %v1835_v63, 4  ;;  %v2123_v63 = vld [vmem:[%s3561_s15 + $0x20] sm:$0xff] }
 0x66f   : > { %v1815_v15 = vpop.permute.xlu0 %1814  ;;  %v1813_v61 = vpop.permute.xlu1 %1812 }
 0x670   : > { %v1819_v62 = vsel %vm1816_vm2, %v1813_v61, %v1815_v15  ;;  %v2127_v15 = vld [vmem:[%s3561_s15 + $0x40] sm:$0xff]  ;;  %v2126_v61 = vld [vmem:[%s3561_s15 + $0x38] sm:$0xff] }
 0x671   : > { %v1888_v0 = vsel %vm773_vm1, %v1819_v62, %v1876_v49  ;;  %vm3691_vm1 = vmmov %vm3685_vm5  ;;  %v2125_v62 = vld [vmem:[%s3561_s15 + $0x30] sm:$0xff]  ;;  %v2124_v49 = vld [vmem:[%s3561_s15 + $0x28] sm:$0xff]  ;;  %vm2210_vm5 = vcmask 289792  }
 0x672   : > { %v1890_v12 = vsel %vm3686_vm12, %v1888_v0, %v1878_v8  ;;  %v2122_v0 = vld [vmem:[%s3561_s15 + $0x18] sm:$0xff] }
 0x673   : > { %v1839_v1 = vpop.permute.xlu0 %1838  ;;  %v1837_v4 = vpop.permute.xlu1 %1836 }
 0x674   : > { %v1842_v43 = vsel %vm590_vm14, %v1837_v4, %v1839_v1 }
 0x675   : > { %v1880_v10 = vrot.slane %v1842_v43, 2  ;;  %v2121_v43 = vld [vmem:[%s3561_s15 + $0x10] sm:$0xff] }
 0x677   : > { %v1892_v16 = vsel %vm798_vm9, %v1890_v12, %v1880_v10  ;;  %vm3692_vm9 = vmmov %vm3691_vm1 }
 0x678   : > { %2420 = vmatpush3.bf16.msra.mxu1 %v1892_v16  ;;  %v2120_v16 = vld [vmem:[%s3561_s15 + $0x8] sm:$0xff] }
 0x679   : > { %2425 = vmatprep.subr.bf16.mxu1 %v2550_v6 }
 0x67b   : > { %2422 = vmatmul.mubr.msk.bf16.vlgmr.msra.gmra.mxu1 %vm1464_vm0, %v1808_v19  ;;  %vm3694_vm0 = vmmov %vm3691_vm1 }
 0x67c   : > { %2435 = vmatprep.mubr.msk.bf16.mxu1 %vm3621_vm13, %v2550_v6  ;;  %vm3693_vm13 = vmmov %vm3691_vm1 }
 0x67d   : > { %vm3696_vm8 = vmmov %vm3694_vm0 }
 0x67e   : > { %2440 = vmatpush3.msk.msra.mxu0 %vm3696_vm8, %v2131_v42 }
 0x67f   : > { %2441 = vmatprep.subr.mxu0 %v2550_v6 }
 0x680   : > { %v1905_v22 = vpop.permute.xlu1 %1904  ;;  %2442 = vmatpush3.msra.mxu0 %v2130_v54 }
 0x681   : > { %2443 = vmatprep.subr.mxu0 %v2550_v6 }
 0x682   : > { %2444 = vmatpush3.msra.mxu0 %v2129_v60 }
 0x683   : > { %2445 = vmatprep.subr.mxu0 %v2550_v6 }
 0x684   : > { %2446 = vmatpush3.msra.mxu0 %v2128_v41 }
 0x685   : > { %2447 = vmatprep.subr.mxu0 %v2550_v6 }
 0x686   : > { %2448 = vmatpush3.msra.mxu0 %v2127_v15 }
 0x687   : > { %2449 = vmatprep.subr.mxu0 %v2550_v6 }
 0x688   : > { %2450 = vmatpush3.msra.mxu0 %v2126_v61 }
 0x689   : > { %2451 = vmatprep.subr.mxu0 %v2550_v6 }
 0x68a   : > { %2452 = vmatpush3.msra.mxu0 %v2125_v62 }
 0x68b   : > { %2453 = vmatprep.subr.mxu0 %v2550_v6 }
 0x68c   : > { %2454 = vmatpush3.msra.mxu0 %v2124_v49 }
 0x68d   : > { %2455 = vmatprep.subr.mxu0 %v2550_v6 }
 0x68e   : > { %2456 = vmatpush3.msra.mxu0 %v2123_v63 }
 0x68f   : > { %2457 = vmatprep.subr.mxu0 %v2550_v6 }
 0x690   : > { %2458 = vmatpush3.msra.mxu0 %v2122_v0 }
 0x691   : > { %2459 = vmatprep.subr.mxu0 %v2550_v6 }
 0x692   : > { %2460 = vmatpush3.msra.mxu0 %v2121_v43 }
 0x693   : > { %2461 = vmatprep.subr.mxu0 %v2550_v6 }
 0x694   : > { %2462 = vmatpush3.msra.mxu0 %v2120_v16 }
 0x695   : > { %2463 = vmatprep.subr.mxu0 %v2550_v6 }
 0x73b   : > { %v1946_v23 = vpop.f32.mrf.mxu1 }
 0x73c   : > { %v1947_v26 = vadd.f32 %v1946_v23, %v1905_v22  ;;  %v2119_v22 = vld [vmem:[%s3561_s15] sm:$0xff] }
 0x73d   : > { %v2423_v7 = vpop.f32.mrf.mxu1  ;;  %2464 = vmatpush3.msra.mxu0 %v2119_v22 }
 0x73e   : > { %v1952_v29 = vmax.f32 %v1947_v26, 0.0 }
 0x73f   : > { %v1949_v30 = vpop.f32.mrf.mxu1 }
 0x740   : > { %v1960_v31 = vmul.f32 %v2283_v28, %v1952_v29 }
 0x741   : > { %v2424_v9 = vpop.f32.mrf.mxu1 }
 0x742   : > { %v1963_v34 = vpack.c.bf16 %v1960_v31, %v1960_v31 }
 0x744   : > { %2016 = vrot.lane.b32.xlu1 %v1963_v34, %s2558_s19  ;;  %2014 = vrot.lane.b32.xlu0 %v1963_v34, %s2559_s29 }
 0x748   : > { %2009 = vrot.lane.b32.xlu1 %v1963_v34, %s2562_s17  ;;  %2007 = vrot.lane.b32.xlu0 %v1963_v34, %s2563_s1 }
 0x74c   : > { %2002 = vrot.lane.b32.xlu1 %v1963_v34, %s2560_s18  ;;  %2000 = vrot.lane.b32.xlu0 %v1963_v34, %s2561_s20  ;;  %s3690_s18 = smov 39  }
 0x750   : > { %1995 = vrot.lane.b32.xlu1 %v1963_v34, %s3687_s0  ;;  %1993 = vrot.lane.b32.xlu0 %v1963_v34, %s3676_s2 }
 0x754   : > { %1988 = vrot.lane.b32.xlu1 %v1963_v34, %s3652_s25  ;;  %1986 = vrot.lane.b32.xlu0 %v1963_v34, %s2570_s26 }
 0x758   : > { %1981 = vrot.lane.b32.xlu1 %v1963_v34, %s2566_s27  ;;  %1979 = vrot.lane.b32.xlu0 %v1963_v34, %s2567_s24 }
 0x75c   : > { %1974 = vrot.lane.b32.xlu1 %v1963_v34, %s3688_s23  ;;  %1972 = vrot.lane.b32.xlu0 %v1963_v34, %s2565_s3 }
 0x760   : > { %1967 = vrot.lane.b32.xlu1 %v1963_v34, %s3689_s30  ;;  %1965 = vrot.lane.b32.xlu0 %v1963_v34, %s3690_s18 }
 0x764   : > { %2044 = vperm.xlu0 %2511, %v1962_v35  }
 0x7b6   : > { %v2017_v59 = vpop.permute.xlu1 %2016  ;;  %v2015_v33 = vpop.permute.xlu0 %2014 }
 0x7b7   : > { %v2020_v38 = vsel %vm1871_vm4, %v2015_v33, %v2017_v59 }
 0x7b8   : > { %v2051_v17 = vsel %vm3691_vm1, %v2020_v38, 0 }
 0x7b9   : > { %2426 = vmatpush3.bf16.msra.mxu1 %v2051_v17 }
 0x7ba   : > { %v2010_v40 = vpop.permute.xlu1 %2009  ;;  %v2008_v20 = vpop.permute.xlu0 %2007  ;;  %2427 = vmatprep.subr.bf16.mxu1 %v2550_v6 }
 0x7bb   : > { %v2013_v25 = vsel %vm1863_vm15, %v2008_v20, %v2010_v40 }
 0x7bc   : > { %v2028_v57 = vrot.slane %v2013_v25, 4 }
 0x7be   : > { %v2003_v27 = vpop.permute.xlu1 %2002  ;;  %v2001_v32 = vpop.permute.xlu0 %2000 }
 0x7bf   : > { %v2006_v3 = vsel %vm1855_vm10, %v2001_v32, %v2003_v27  ;;  %vm2132_vm10 = vcmask 818176  }
 0x7c0   : > { %v2040_v5 = vsel %vm3692_vm9, %v2006_v3, %v2028_v57 }
 0x7c1   : > { %2428 = vmatpush3.bf16.msra.mxu1 %v2040_v5 }
 0x7c2   : > { %v1996_v45 = vpop.permute.xlu1 %1995  ;;  %v1994_v47 = vpop.permute.xlu0 %1993  ;;  %2429 = vmatprep.subr.bf16.mxu1 %v2550_v6 }
 0x7c3   : > { %v1999_v50 = vsel %vm1847_vm11, %v1994_v47, %v1996_v45 }
 0x7c4   : > { %v2026_v52 = vrot.slane %v1999_v50, 4 }
 0x7c6   : > { %v1989_v37 = vpop.permute.xlu1 %1988  ;;  %v1987_v44 = vpop.permute.xlu0 %1986  ;;  %v2037_v14 = vsel %vm3693_vm13, %v1963_v34, %v2026_v52 }
 0x7c7   : > { %v1992_v36 = vsel %vm590_vm14, %v1987_v44, %v1989_v37  ;;  %2430 = vmatpush3.bf16.msra.mxu1 %v2037_v14  ;;  %vm3695_vm14 = vmmov %vm3694_vm0 }
 0x7c8   : > { %2431 = vmatprep.subr.bf16.mxu1 %v2550_v6  ;;  %v2024_v55 = vrot.slane %v1992_v36, 4 }
 0x7ca   : > { %v1982_v56 = vpop.permute.xlu1 %1981  ;;  %v1980_v18 = vpop.permute.xlu0 %1979 }
 0x7cb   : > { %v1985_v58 = vsel %vm1832_vm3, %v1980_v18, %v1982_v56 }
 0x7cc   : > { %v2033_v48 = vsel %vm3694_vm0, %v1985_v58, %v2024_v55 }
 0x7cd   : > { %2432 = vmatpush3.bf16.msra.mxu1 %v2033_v48 }
 0x7ce   : > { %v1975_v11 = vpop.permute.xlu1 %1974  ;;  %v1973_v46 = vpop.permute.xlu0 %1972  ;;  %2433 = vmatprep.subr.bf16.mxu1 %v2550_v6 }
 0x7cf   : > { %v1978_v2 = vsel %vm1824_vm7, %v1973_v46, %v1975_v11 }
 0x7d0   : > { %v2022_v39 = vrot.slane %v1978_v2, 4 }
 0x7d2   : > { %v1968_v51 = vpop.permute.xlu1 %1967  ;;  %v1966_v53 = vpop.permute.xlu0 %1965 }
 0x7d3   : > { %v1971_v24 = vsel %vm1816_vm2, %v1966_v53, %v1968_v51 }
 0x7d4   : > { %v2030_v21 = vsel %vm3695_vm14, %v1971_v24, %v2022_v39 }
 0x7d5   : > { %2434 = vmatpush3.bf16.msra.mxu1 %v2030_v21 }
 0x7d8   : > { %2436 = vmatmul.mubr.msk.bf16.vlgmr.msra.gmra.mxu1 %vm2047_vm6, %v1961_v13 }
 0x7df   : > { %v2045_v1 = vpop.permute.xlu0 %2044 }
 0x898   : > { %v2087_v4 = vpop.f32.mrf.mxu1 }
 0x899   : > { %v2088_v8 = vadd.f32 %v2087_v4, %v2045_v1 }
 0x89a   : > { %v2437_v10 = vpop.f32.mrf.mxu1 }
 0x89b   : > { %v2093_v12 = vmax.f32 %v2088_v8, 0.0 }
 0x89c   : > { %v2090_v19 = vpop.f32.mrf.mxu1 }
 0x89d   : > { %2098 = vrot.lane.b32.xlu0 %v2093_v12, %s3687_s0  ;;  %2095 = vrot.lane.b32.xlu1 %v2093_v12, %s3676_s2  ;;  %s2271_s2 = sshll.u32 %s3698_s22, 2 }
 0x89e   : > { %v2438_v23 = vpop.f32.mrf.mxu1 }
 0x8a1   : > { %2106 = vrot.lane.b32.xlu0 %v2093_v12, %s2562_s17  ;;  %2103 = vrot.lane.b32.xlu1 %v2093_v12, %s2563_s1  ;;  %s519_s17 = scalar_lea.vmem %s3562_s16, %s2271_s2 }
 0x8a5   : > { %2113 = vrot.lane.b32.xlu0 %v2093_v12, %s2558_s19  ;;  %2110 = vrot.lane.b32.xlu1 %v2093_v12, %s2559_s29 }
 0x90f   : > { %v2099_v26 = vpop.permute.xlu0 %2098  ;;  %v2096_v28 = vpop.permute.xlu1 %2095 }
 0x910   : > { %v2101_v30 = vsel %vm1847_vm11, %v2096_v28, %v2099_v26 }
 0x911   : > { %v2102_v35 = vmax.f32 %v2093_v12, %v2101_v30 }
 0x913   : > { %v2107_v7 = vpop.permute.xlu0 %2106  ;;  %v2104_v29 = vpop.permute.xlu1 %2103 }
 0x914   : > { %v2109_v6 = vsel %vm1863_vm15, %v2104_v29, %v2107_v7 }
 0x917   : > { %v2114_v31 = vpop.permute.xlu0 %2113  ;;  %v2111_v9 = vpop.permute.xlu1 %2110 }
 0x918   : > { %v2116_v34 = vsel %vm1871_vm4, %v2111_v9, %v2114_v31 }
 0x919   : > { %v2117_v59 = vmax.f32 %v2109_v6, %v2116_v34 }
 0x91b   : > { %v2118_v33 = vmax.f32 %v2102_v35, %v2117_v59 }
 0x91d   : > { %2466 = vmatmul.mubr.msk.f32.vlgmr.msra.gmra.mxu0 %vm2132_vm10, %v2118_v33 }
 0x9dd   : > { %v2205_v38 = vpop.f32.mrf.mxu0 }
 0x9de   : > { %v2209_v17 = vpack.c.bf16 %v2205_v38, %v2205_v38 }
 0x9df   : > { %v2467_v40 = vpop.f32.mrf.mxu0 }
 0x9e0   : > { %2211 = vst.msk [vmem:[%s519_s17] sm:$0xf] %vm2210_vm5, %v2209_v17 }
 0x9e1 PF: > { %s26_s21 = sadd.s32 1, %s2535_s21  }
 0x9e2   : > { %p23_p4 = scmp.ge.s32.totalorder %s26_s21, 4  }
 0x9e4   :  { %25 = sbr.rel (!%p23_p4) target bundleno = 5 (0x5), region = 114 }

</bundles_post_ra>
